<compile_context>
chip_gen: v5e
topology: v5e:2x2
jax: 0.10.0
libtpu: 0.0.40
codegen_flags: <defaults>
</compile_context>

<pallas_src>
import numpy as np
import jax
import jax.numpy as jnp
from jax import lax
from jax.experimental import pallas as pl
from jax.experimental.pallas import tpu as pltpu

LANE = 128


def _round_up(x, m):
    return (x + m - 1) // m * m


# ----------------------------- Pallas kernel ------------------------------- #

def fused_cnn_kernel(x_ref, w1_ref, w2_ref, w3_ref, w4_ref, b_ref, o_ref):
    """Whole CNN forward for one batch tile.

    x_ref : (BB, 400)   NCHW-flattened 1x20x20 input (no K padding)
    w1    : (400, 768)  conv1 as dense matmul (bf16), output order = NCHW flatten of (3,16,16)
    w2    : (768, 1536) conv2 as dense matmul (bf16), output order = torch view(-1,1440), padded
    w3    : (1536, 128) fc1 weight (bf16, 1440x50 zero padded)
    w4    : (128, 128)  fc2 weight (bf16, 50x10 zero padded)
    b_ref : (1, 2560)   concatenated f32 bias rows [b1 | b2 | b3 | b4], zero in padding
    o_ref : (BB, 128)   relu(fc2) output, real logits in columns [:10]
    """
    n1 = w1_ref.shape[1]
    n2 = w2_ref.shape[1]
    n3 = w3_ref.shape[1]
    n4 = w4_ref.shape[1]
    o1, o2, o3, o4 = 0, n1, n1 + n2, n1 + n2 + n3

    def dense_relu(h, w_ref, off, n):
        # bf16 operands on the MXU, f32 accumulate, f32 bias add + relu on the VPU.
        acc = jnp.dot(h.astype(jnp.bfloat16), w_ref[...],
                      preferred_element_type=jnp.float32)
        return jnp.maximum(acc + b_ref[:, off:off + n], 0.0)

    h = dense_relu(x_ref[...], w1_ref, o1, n1)   # conv1 + relu -> (BB, 768)
    h = dense_relu(h, w2_ref, o2, n2)            # conv2 + relu -> (BB, 1536) torch flatten order
    h = dense_relu(h, w3_ref, o3, n3)            # fc1   + relu -> (BB, 128)
    o_ref[...] = dense_relu(h, w4_ref, o4, n4)   # fc2   + relu -> (BB, 128)


# ----------------------- one-time weight preparation ------------------------ #

def _conv_as_matmul(w, b, H, W):
    """Dense matrix T and bias vector so that, for a VALID stride-1 conv:
         conv(x).reshape(B, Cout*OH*OW)  ==  x.reshape(B, Cin*H*W) @ T + bias
       with NCHW flatten order on both sides (matches torch .view)."""
    w = np.asarray(w, np.float32)
    b = np.asarray(b, np.float32)
    Cout, Cin, KH, KW = w.shape
    OH, OW = H - KH + 1, W - KW + 1
    T = np.zeros((Cin * H * W, Cout * OH * OW), np.float32)
    ow = np.arange(OW)
    for co in range(Cout):
        for ci in range(Cin):
            for kh in range(KH):
                for kw in range(KW):
                    wv = w[co, ci, kh, kw]
                    for oh in range(OH):
                        rows = ci * H * W + (oh + kh) * W + (ow + kw)
                        cols = co * OH * OW + oh * OW + ow
                        T[rows, cols] = wv
    bias = np.repeat(b, OH * OW)
    return T, bias


def _pad2(a, rows, cols):
    out = np.zeros((rows, cols), np.float32)
    out[:a.shape[0], :a.shape[1]] = a
    return out


def prepare_params(params):
    """Run ONCE (outside jit): build padded, MXU-ready bf16 weight slabs + f32 bias slab."""
    T1, b1 = _conv_as_matmul(params["conv1_w"], params["conv1_b"], 20, 20)  # (400, 768)
    T2, b2 = _conv_as_matmul(params["conv2_w"], params["conv2_b"], 16, 16)  # (768, 1440)
    wf1 = np.asarray(params["fc1_w"], np.float32).T                          # (1440, 50)
    bf1 = np.asarray(params["fc1_b"], np.float32)
    wf2 = np.asarray(params["fc2_w"], np.float32).T                          # (50, 10)
    bf2 = np.asarray(params["fc2_b"], np.float32)

    k1 = T1.shape[0]                     # 400: kept unpadded (full-extent block)
    n1 = _round_up(T1.shape[1], LANE)    # 768
    n2 = _round_up(T2.shape[1], LANE)    # 1536
    n3 = _round_up(wf1.shape[1], LANE)   # 128
    n4 = _round_up(wf2.shape[1], LANE)   # 128

    # Single concatenated f32 bias row (added to the f32 accumulator), zero in padding.
    b_all = np.zeros((1, n1 + n2 + n3 + n4), np.float32)
    b_all[0, :b1.size] = b1
    b_all[0, n1:n1 + b2.size] = b2
    b_all[0, n1 + n2:n1 + n2 + bf1.size] = bf1
    b_all[0, n1 + n2 + n3:n1 + n2 + n3 + bf2.size] = bf2

    return {
        "w1": jnp.asarray(_pad2(T1, k1, n1), jnp.bfloat16),
        "w2": jnp.asarray(_pad2(T2, n1, n2), jnp.bfloat16),
        "w3": jnp.asarray(_pad2(wf1, n2, n3), jnp.bfloat16),
        "w4": jnp.asarray(_pad2(wf2, n3, n4), jnp.bfloat16),
        "b_all": jnp.asarray(b_all, jnp.float32),
    }


# ------------------------------ forward pass -------------------------------- #

def _resident_spec(shape):
    """Full-array, grid-invariant block; single-buffered when the JAX version supports it."""
    idx = lambda i: (0, 0)
    try:
        return pl.BlockSpec(shape, idx, pipeline_mode=pl.Buffered(1))
    except (TypeError, AttributeError):
        return pl.BlockSpec(shape, idx)


@jax.jit
def cnn_forward(x_nchw, prep):
    """x_nchw: (B, 1, 20, 20) float32 -> (B, 10) float32."""
    B = x_nchw.shape[0]
    K = prep["w1"].shape[0]          # 400
    n_out = prep["w4"].shape[1]      # 128

    # Per-call glue: NCHW flatten (matches Toeplitz row order); only batch rows padded.
    x = x_nchw.reshape(B, -1)                                   # (B, 400)
    b_pad = _round_up(B, 8)
    bb = min(b_pad, 256)             # 256-row M tiles fill the 256x256 MXU (v6e/v7x)
    b_pad = _round_up(b_pad, bb)     # grid > 1 (megacore split) only once batch > 256
    x = jnp.pad(x, ((0, b_pad - B), (0, 0)))                    # (b_pad, 400)

    out = pl.pallas_call(
        fused_cnn_kernel,
        out_shape=jax.ShapeDtypeStruct((b_pad, n_out), jnp.float32),
        grid=(b_pad // bb,),
        in_specs=[
            pl.BlockSpec((bb, K), lambda i: (i, 0)),
            _resident_spec(prep["w1"].shape),
            _resident_spec(prep["w2"].shape),
            _resident_spec(prep["w3"].shape),
            _resident_spec(prep["w4"].shape),
            _resident_spec(prep["b_all"].shape),
        ],
        out_specs=pl.BlockSpec((bb, n_out), lambda i: (i, 0)),
        compiler_params=pltpu.CompilerParams(
            dimension_semantics=("parallel",),
            vmem_limit_bytes=32 * 1024 * 1024),
    )(x, prep["w1"], prep["w2"], prep["w3"], prep["w4"], prep["b_all"])

    return out[:B, :10]


# --------------------------- pure-JAX reference ------------------------------ #

def ref_forward(x, params):
    dn = ("NCHW", "OIHW", "NCHW")
    h = lax.conv_general_dilated(x, params["conv1_w"], (1, 1), "VALID",
                                 dimension_numbers=dn)
    h = jax.nn.relu(h + params["conv1_b"][None, :, None, None])
    h = lax.conv_general_dilated(h, params["conv2_w"], (1, 1), "VALID",
                                 dimension_numbers=dn)
    h = jax.nn.relu(h + params["conv2_b"][None, :, None, None])
    h = h.reshape(-1, 10 * 12 * 12)
    h = jax.nn.relu(h @ params["fc1_w"].T + params["fc1_b"])
    h = jax.nn.relu(h @ params["fc2_w"].T + params["fc2_b"])
    return h


# ---------------------------------- main ------------------------------------ #

if __name__ == "__main__":
    key = jax.random.PRNGKey(0)
    ks = jax.random.split(key, 9)

    B = 2
    # Spatial size must be 20x20 (the module hard-codes the 10*12*12 flatten).
    x = jax.random.normal(ks[0], (B, 1, 20, 20), jnp.float32)

    params = {
        "conv1_w": 0.1 * jax.random.normal(ks[1], (3, 1, 5, 5), jnp.float32),
        "conv1_b": 0.1 * jax.random.normal(ks[2], (3,), jnp.float32),
        "conv2_w": 0.1 * jax.random.normal(ks[3], (10, 3, 5, 5), jnp.float32),
        "conv2_b": 0.1 * jax.random.normal(ks[4], (10,), jnp.float32),
        "fc1_w": 0.05 * jax.random.normal(ks[5], (50, 10 * 12 * 12), jnp.float32),
        "fc1_b": 0.05 * jax.random.normal(ks[6], (50,), jnp.float32),
        "fc2_w": 0.1 * jax.random.normal(ks[7], (10, 50), jnp.float32),
        "fc2_b": 0.1 * jax.random.normal(ks[8], (10,), jnp.float32),
    }

    prepared = prepare_params(params)          # one-time weight prep, outside jit

    out = cnn_forward(x, prepared)
    out = jax.block_until_ready(out)
    assert out.shape == (B, 10), out.shape

    ref = ref_forward(x, params)
    # Tolerance loosened vs the f32 version: weights/activations are bf16 on the MXU
    # (f32 accumulate), equivalent to casting the original conv/fc weights to bf16.
    assert jnp.allclose(out, ref, rtol=2e-2, atol=2e-2), (
        float(jnp.max(jnp.abs(out - ref))))

    # TODO(synk): torch forward's print() size-logging has no kernel equivalent; omitted.
    print("KERNEL_OK")
</pallas_src>

<mosaic_0001>
module attributes {stable_mosaic.version = 11 : i64} {
  func.func @fused_cnn_kernel(%arg0: i32, %arg1: memref<8x400xf32, #tpu.memory_space<vmem>>, %arg2: memref<400x768xbf16, #tpu.memory_space<vmem>>, %arg3: memref<768x1536xbf16, #tpu.memory_space<vmem>>, %arg4: memref<1536x128xbf16, #tpu.memory_space<vmem>>, %arg5: memref<128x128xbf16, #tpu.memory_space<vmem>>, %arg6: memref<1x2560xf32, #tpu.memory_space<vmem>>, %arg7: memref<8x128xf32, #tpu.memory_space<vmem>>) attributes {dimension_semantics = [#tpu.dimension_semantics<parallel>], iteration_bounds = array<i64: 1>, scalar_prefetch = 0 : i64, scratch_operands = 0 : i64, tpu.core_type = #tpu.core_type<tc>, window_params = [{transform_indices = @transform_0, window_bounds = array<i64: 8, 400>}, {pipeline_mode = #tpu.pipeline_mode<synchronous>, transform_indices = @transform_1, window_bounds = array<i64: 400, 768>}, {pipeline_mode = #tpu.pipeline_mode<synchronous>, transform_indices = @transform_2, window_bounds = array<i64: 768, 1536>}, {pipeline_mode = #tpu.pipeline_mode<synchronous>, transform_indices = @transform_3, window_bounds = array<i64: 1536, 128>}, {pipeline_mode = #tpu.pipeline_mode<synchronous>, transform_indices = @transform_4, window_bounds = array<i64: 128, 128>}, {pipeline_mode = #tpu.pipeline_mode<synchronous>, transform_indices = @transform_5, window_bounds = array<i64: 1, 2560>}, {transform_indices = @transform_6, window_bounds = array<i64: 8, 128>}]} {
    %c0 = arith.constant 0 : index
    %c0_0 = arith.constant 0 : index
    %0 = vector.load %arg1[%c0, %c0_0] : memref<8x400xf32, #tpu.memory_space<vmem>>, vector<8x400xf32>
    %1 = arith.truncf %0 : vector<8x400xf32> to vector<8x400xbf16>
    %c0_1 = arith.constant 0 : index
    %c0_2 = arith.constant 0 : index
    %2 = vector.load %arg2[%c0_1, %c0_2] : memref<400x768xbf16, #tpu.memory_space<vmem>>, vector<400x768xbf16>
    %cst = arith.constant dense<0.000000e+00> : vector<8x768xf32>
    %3 = tpu.matmul %1, %2, %cst {dimension_numbers = #tpu.dot_dimension_numbers<[1], [0], [0], [1], [0, 0, 1, 1], [], []>} : vector<8x400xbf16>, vector<400x768xbf16>, vector<8x768xf32> -> vector<8x768xf32>
    %c0_3 = arith.constant 0 : index
    %c0_4 = arith.constant 0 : index
    %4 = vector.load %arg6[%c0_3, %c0_4] : memref<1x2560xf32, #tpu.memory_space<vmem>>, vector<1x768xf32>
    %5 = vector.broadcast %4 : vector<1x768xf32> to vector<8x768xf32>
    %6 = arith.addf %3, %5 : vector<8x768xf32>
    %cst_5 = arith.constant 0.000000e+00 : f32
    %7 = vector.broadcast %cst_5 : f32 to vector<8x768xf32>
    %8 = arith.maximumf %6, %7 : vector<8x768xf32>
    %9 = arith.truncf %8 : vector<8x768xf32> to vector<8x768xbf16>
    %c0_6 = arith.constant 0 : index
    %c0_7 = arith.constant 0 : index
    %10 = vector.load %arg3[%c0_6, %c0_7] : memref<768x1536xbf16, #tpu.memory_space<vmem>>, vector<768x1536xbf16>
    %cst_8 = arith.constant dense<0.000000e+00> : vector<8x1536xf32>
    %11 = tpu.matmul %9, %10, %cst_8 {dimension_numbers = #tpu.dot_dimension_numbers<[1], [0], [0], [1], [0, 0, 1, 1], [], []>} : vector<8x768xbf16>, vector<768x1536xbf16>, vector<8x1536xf32> -> vector<8x1536xf32>
    %c0_9 = arith.constant 0 : index
    %c768 = arith.constant 768 : index
    %12 = vector.load %arg6[%c0_9, %c768] : memref<1x2560xf32, #tpu.memory_space<vmem>>, vector<1x1536xf32>
    %13 = vector.broadcast %12 : vector<1x1536xf32> to vector<8x1536xf32>
    %14 = arith.addf %11, %13 : vector<8x1536xf32>
    %cst_10 = arith.constant 0.000000e+00 : f32
    %15 = vector.broadcast %cst_10 : f32 to vector<8x1536xf32>
    %16 = arith.maximumf %14, %15 : vector<8x1536xf32>
    %17 = arith.truncf %16 : vector<8x1536xf32> to vector<8x1536xbf16>
    %c0_11 = arith.constant 0 : index
    %c0_12 = arith.constant 0 : index
    %18 = vector.load %arg4[%c0_11, %c0_12] : memref<1536x128xbf16, #tpu.memory_space<vmem>>, vector<1536x128xbf16>
    %cst_13 = arith.constant dense<0.000000e+00> : vector<8x128xf32>
    %19 = tpu.matmul %17, %18, %cst_13 {dimension_numbers = #tpu.dot_dimension_numbers<[1], [0], [0], [1], [0, 0, 1, 1], [], []>} : vector<8x1536xbf16>, vector<1536x128xbf16>, vector<8x128xf32> -> vector<8x128xf32>
    %c0_14 = arith.constant 0 : index
    %c2304 = arith.constant 2304 : index
    %20 = vector.load %arg6[%c0_14, %c2304] : memref<1x2560xf32, #tpu.memory_space<vmem>>, vector<1x128xf32>
    %21 = vector.broadcast %20 : vector<1x128xf32> to vector<8x128xf32>
    %22 = arith.addf %19, %21 : vector<8x128xf32>
    %cst_15 = arith.constant 0.000000e+00 : f32
    %23 = vector.broadcast %cst_15 : f32 to vector<8x128xf32>
    %24 = arith.maximumf %22, %23 : vector<8x128xf32>
    %25 = arith.truncf %24 : vector<8x128xf32> to vector<8x128xbf16>
    %c0_16 = arith.constant 0 : index
    %c0_17 = arith.constant 0 : index
    %26 = vector.load %arg5[%c0_16, %c0_17] : memref<128x128xbf16, #tpu.memory_space<vmem>>, vector<128x128xbf16>
    %cst_18 = arith.constant dense<0.000000e+00> : vector<8x128xf32>
    %27 = tpu.matmul %25, %26, %cst_18 {dimension_numbers = #tpu.dot_dimension_numbers<[1], [0], [0], [1], [0, 0, 1, 1], [], []>} : vector<8x128xbf16>, vector<128x128xbf16>, vector<8x128xf32> -> vector<8x128xf32>
    %c0_19 = arith.constant 0 : index
    %c2432 = arith.constant 2432 : index
    %28 = vector.load %arg6[%c0_19, %c2432] : memref<1x2560xf32, #tpu.memory_space<vmem>>, vector<1x128xf32>
    %29 = vector.broadcast %28 : vector<1x128xf32> to vector<8x128xf32>
    %30 = arith.addf %27, %29 : vector<8x128xf32>
    %cst_20 = arith.constant 0.000000e+00 : f32
    %31 = vector.broadcast %cst_20 : f32 to vector<8x128xf32>
    %32 = arith.maximumf %30, %31 : vector<8x128xf32>
    %c0_21 = arith.constant 0 : index
    %c0_22 = arith.constant 0 : index
    %33 = vector.load %arg7[%c0_21, %c0_22] : memref<8x128xf32, #tpu.memory_space<vmem>>, vector<8x128xf32>
    tpu.vector_store %arg7[%c0_21, %c0_22], %32 {strides = array<i32>} : memref<8x128xf32, #tpu.memory_space<vmem>>, vector<8x128xf32>,
    return
  }
  func.func @transform_0(%arg0: i32) -> (i32, i32) {
    %c0_i32 = arith.constant 0 : i32
    %c0_i32_0 = arith.constant 0 : i32
    return %arg0, %c0_i32 : i32, i32
  }
  func.func @transform_1(%arg0: i32) -> (i32, i32) {
    %c0_i32 = arith.constant 0 : i32
    %c0_i32_0 = arith.constant 0 : i32
    %c0_i32_1 = arith.constant 0 : i32
    return %c0_i32, %c0_i32_0 : i32, i32
  }
  func.func @transform_2(%arg0: i32) -> (i32, i32) {
    %c0_i32 = arith.constant 0 : i32
    %c0_i32_0 = arith.constant 0 : i32
    %c0_i32_1 = arith.constant 0 : i32
    return %c0_i32, %c0_i32_0 : i32, i32
  }
  func.func @transform_3(%arg0: i32) -> (i32, i32) {
    %c0_i32 = arith.constant 0 : i32
    %c0_i32_0 = arith.constant 0 : i32
    %c0_i32_1 = arith.constant 0 : i32
    return %c0_i32, %c0_i32_0 : i32, i32
  }
  func.func @transform_4(%arg0: i32) -> (i32, i32) {
    %c0_i32 = arith.constant 0 : i32
    %c0_i32_0 = arith.constant 0 : i32
    %c0_i32_1 = arith.constant 0 : i32
    return %c0_i32, %c0_i32_0 : i32, i32
  }
  func.func @transform_5(%arg0: i32) -> (i32, i32) {
    %c0_i32 = arith.constant 0 : i32
    %c0_i32_0 = arith.constant 0 : i32
    %c0_i32_1 = arith.constant 0 : i32
    return %c0_i32, %c0_i32_0 : i32, i32
  }
  func.func @transform_6(%arg0: i32) -> (i32, i32) {
    %c0_i32 = arith.constant 0 : i32
    %c0_i32_0 = arith.constant 0 : i32
    return %arg0, %c0_i32 : i32, i32
  }
}

</mosaic_0001>

<bundles_post_ra>
// kernel: cnn_forward.1
= control target key start
LH: loop header
LB: loop body
LE: loop exit
PB: predicated region body
PF: predicated region fallthrough
CT: control target
= control target key end

     0   :  { %11 = vsyncpa [#allocation3], 0  ;;  %s11510_s0 = inlined_call_operand.vmem [shape: f32[8,400], index: 0, kind: input, shape index: {}]   ;;  %s11511_s1 = inlined_call_operand.hbm [shape: bf16[400,768], index: 1, kind: input, shape index: {}]   ;;  %s11512_s2 = inlined_call_operand.hbm [shape: bf16[768,1536], index: 2, kind: input, shape index: {}]   ;;  %s11513_s3 = inlined_call_operand.hbm [shape: bf16[1536,128], index: 3, kind: input, shape index: {}]   ;;  %s11514_s4 = inlined_call_operand.hbm [shape: bf16[128,128], index: 4, kind: input, shape index: {}]   ;;  %s11515_s5 = inlined_call_operand.hbm [shape: f32[1,2560], index: 5, kind: input, shape index: {}]   ;;  %s11516_s6 = inlined_call_operand.vmem [shape: f32[8,128], index: 6, kind: output, shape index: {}]  }
   0x1   :  { %12 = vsyncpa [#allocation5], 0  ;;  %s33_s23 = sshll.u32 %s11512_s2, 4  ;;  %s34_s23 = int_to_ptr.hbm [resolvable:$true] %s33_s23 }
   0x2   :  { %13 = vsyncpa [#allocation8], 0  ;;  %s11111_s24 = smov [#allocation4]   ;;  %s11112_s26 = smov 768  }
   0x3   :  { %s35_s25 = sshll.u32 %s11111_s24, 4  ;;  %s11113_s27 = smov 48   ;;  %s36_s25 = int_to_ptr.vmem [resolvable:$true] %s35_s25 }
   0x4   :  { %41 = dma.hbm_to_vmem [thread:$0]  %s34_s23, 73728, %s36_s25, [#allocation5], %s11112_s26, %s11112_s26, %s11113_s27  }
   0x5   :  { %s59_s30 = sshll.u32 %s11514_s4, 4  ;;  %s11114_s7 = smov [#allocation7]   ;;  %s60_s30 = int_to_ptr.hbm [resolvable:$true] %s59_s30 }
   0x6   :  { %s61_s8 = sshll.u32 %s11114_s7, 4  ;;  %s20_s11 = sshll.u32 %s11511_s1, 4  ;;  %s62_s8 = int_to_ptr.vmem [resolvable:$true] %s61_s8  ;;  %s21_s11 = int_to_ptr.hbm [resolvable:$true] %s20_s11 }
   0x7   :  { %s11115_s2 = smov 64   ;;  %s11116_s12 = smov 4  }
   0x8   :  { %67 = dma.hbm_to_vmem [thread:$0]  %s60_s30, 1024, %s62_s8, [#allocation8], %s11115_s2, %s11115_s2, %s11116_s12  }
   0x9   :  { %s11117_s13 = smov [#allocation2]   ;;  %s46_s17 = sshll.u32 %s11513_s3, 4  ;;  %s47_s17 = int_to_ptr.hbm [resolvable:$true] %s46_s17 }
   0xa   :  { %s22_s14 = sshll.u32 %s11117_s13, 4  ;;  %s11118_s4 = smov 384   ;;  %s23_s14 = int_to_ptr.vmem [resolvable:$true] %s22_s14 }
   0xb   :  { %s11119_s18 = smov 24   ;;  %s11120_s19 = smov [#allocation6]  }
   0xc   :  { %28 = dma.hbm_to_vmem [thread:$0]  %s21_s11, 19200, %s23_s14, [#allocation3], %s11118_s4, %s11118_s4, %s11119_s18  }
   0xd   :  { %s48_s20 = sshll.u32 %s11120_s19, 4  ;;  %s73_s22 = sshll.u32 %s11515_s5, 4  ;;  %s49_s20 = int_to_ptr.vmem [resolvable:$true] %s48_s20  ;;  %s74_s22 = int_to_ptr.hbm [resolvable:$true] %s73_s22 }
   0xe   :  { %54 = dma.hbm_to_vmem [thread:$0]  %s47_s17, 12288, %s49_s20, [#allocation5], %s11115_s2, %s11115_s2, %s11116_s12  }
   0xf   :  { %s11121_s23 = smov [#allocation9]  }
  0x10   :  { %s75_s24 = sshll.u32 %s11121_s23, 4  ;;  %s76_s24 = int_to_ptr.vmem [resolvable:$true] %s75_s24 }
  0x11   :  { %78 = dma.hbm_to_vmem [thread:$0]  %s74_s22, 320, %s76_s24, [#allocation8]  }
  0x12   :  { %11105 = dma.done.wait [#allocation3], 19200  }
  0x13   :  { %11106 = vsyncadd [#allocation3], 4294948096 }
  0x14   :  { %11107 = dma.done.wait [#allocation5], 86016  }
  0x15   :  { %11108 = vsyncadd [#allocation5], 4294881280 }
  0x16   :  { %11109 = dma.done.wait [#allocation8], 1344  }
  0x17   :  { %11110 = vsyncadd [#allocation8], 4294965952  ;;  %v6984_v0 = vld [vmem:[#allocation2 + $0x150] sm:$0xf]  ;;  %v10185_v1 = vld [vmem:[#allocation2 + $0x164] sm:$0xf0] }
  0x18   :  { %v7368_v2 = vld [vmem:[#allocation2 + $0x450] sm:$0xf]  ;;  %v6985_v3 = vor.u32 %v10185_v1, %v6984_v0  ;;  %v10281_v4 = vld [vmem:[#allocation2 + $0x464] sm:$0xf0]  ;;  %v7392_v5 = vld [vmem:[#allocation2 + $0x480] sm:$0xf] }
  0x19   :  { %v10287_v6 = vld [vmem:[#allocation2 + $0x494] sm:$0xf0]  ;;  %v7369_v7 = vor.u32 %v10281_v4, %v7368_v2  ;;  %v10182_v9 = vld [vmem:[#allocation2 + $0x154] sm:$0xf]  ;;  %v6986_v10 = vld [vmem:[#allocation2 + $0x168] sm:$0xf0] }
  0x1a   :  { %v7393_v8 = vor.u32 %v10287_v6, %v7392_v5  ;;  %v7176_v11 = vld [vmem:[#allocation2 + $0x2d0] sm:$0xf]  ;;  %1026 = vmatpush.bf16.msra.mxu0 %v6985_v3  ;;  %v6989_v12 = vor.u32 %v10182_v9, %v6986_v10  ;;  %v10233_v13 = vld [vmem:[#allocation2 + $0x2e4] sm:$0xf0]  ;;  %v6960_v14 = vld [vmem:[#allocation2 + $0x120] sm:$0xf] }
  0x1b   :  { %v10179_v15 = vld [vmem:[#allocation2 + $0x134] sm:$0xf0]  ;;  %1052 = vmatpush.bf16.msra.mxu2 %v7369_v7  ;;  %v7177_v16 = vor.u32 %v10233_v13, %v7176_v11  ;;  %v7344_v18 = vld [vmem:[#allocation2 + $0x420] sm:$0xf]  ;;  %v10176_v20 = vld [vmem:[#allocation2 + $0x124] sm:$0xf] }
  0x1c   :  { %1072 = vmatpush.bf16.msra.mxu3 %v7393_v8  ;;  %v6961_v17 = vor.u32 %v10179_v15, %v6960_v14  ;;  %v10275_v19 = vld [vmem:[#allocation2 + $0x434] sm:$0xf0]  ;;  %v6962_v22 = vld [vmem:[#allocation2 + $0x138] sm:$0xf0]  ;;  %v7152_v23 = vld [vmem:[#allocation2 + $0x2a0] sm:$0xf] }
  0x1d   :  { %v7345_v21 = vor.u32 %v10275_v19, %v7344_v18  ;;  %v10227_v24 = vld [vmem:[#allocation2 + $0x2b4] sm:$0xf0]  ;;  %1039 = vmatpush.bf16.msra.mxu1 %v7177_v16  ;;  %v6965_v25 = vor.u32 %v10176_v20, %v6962_v22  ;;  %v6936_v27 = vld [vmem:[#allocation2 + $0xf0] sm:$0xf]  ;;  %v10173_v28 = vld [vmem:[#allocation2 + $0x104] sm:$0xf0] }
  0x1e   :  { %v7153_v26 = vor.u32 %v10227_v24, %v7152_v23  ;;  %v7320_v29 = vld [vmem:[#allocation2 + $0x3f0] sm:$0xf]  ;;  %1027 = vmatpush.bf16.msra.mxu0 %v6961_v17  ;;  %v6937_v30 = vor.u32 %v10173_v28, %v6936_v27  ;;  %v10269_v31 = vld [vmem:[#allocation2 + $0x404] sm:$0xf0]  ;;  %v10170_v32 = vld [vmem:[#allocation2 + $0xf4] sm:$0xf] }
  0x1f   :  { %v6938_v33 = vld [vmem:[#allocation2 + $0x108] sm:$0xf0]  ;;  %1053 = vmatpush.bf16.msra.mxu2 %v7345_v21  ;;  %v7321_v34 = vor.u32 %v10269_v31, %v7320_v29  ;;  %v7128_v35 = vld [vmem:[#allocation2 + $0x270] sm:$0xf]  ;;  %v10221_v36 = vld [vmem:[#allocation2 + $0x284] sm:$0xf0] }
  0x20   :  { %1078 = vmatpush.bf16.msrb.mxu3 %v6989_v12  ;;  %v6912_v37 = vld [vmem:[#allocation2 + $0xc0] sm:$0xf]  ;;  %v6941_v38 = vor.u32 %v10170_v32, %v6938_v33  ;;  %v10167_v39 = vld [vmem:[#allocation2 + $0xd4] sm:$0xf0]  ;;  %v7129_v42 = vor.u32 %v10221_v36, %v7128_v35  ;;  %v10164_v43 = vld [vmem:[#allocation2 + $0xc4] sm:$0xf] }
  0x21   :  { %v7296_v40 = vld [vmem:[#allocation2 + $0x3c0] sm:$0xf]  ;;  %v10263_v41 = vld [vmem:[#allocation2 + $0x3d4] sm:$0xf0]  ;;  %1040 = vmatpush.bf16.msra.mxu1 %v7153_v26  ;;  %v6914_v44 = vld [vmem:[#allocation2 + $0xd8] sm:$0xf0]  ;;  %v6913_v45 = vor.u32 %v10167_v39, %v6912_v37 }
  0x22   :  { %1028 = vmatpush.bf16.msra.mxu0 %v6937_v30  ;;  %v7104_v46 = vld [vmem:[#allocation2 + $0x240] sm:$0xf]  ;;  %v10215_v47 = vld [vmem:[#allocation2 + $0x254] sm:$0xf0]  ;;  %v7297_v48 = vor.u32 %v10263_v41, %v7296_v40  ;;  %v6888_v49 = vld [vmem:[#allocation2 + $0x90] sm:$0xf]  ;;  %v6917_v51 = vor.u32 %v10164_v43, %v6914_v44 }
  0x23   :  { %1054 = vmatpush.bf16.msra.mxu2 %v7321_v34  ;;  %v10161_v50 = vld [vmem:[#allocation2 + $0xa4] sm:$0xf0]  ;;  %v7272_v52 = vld [vmem:[#allocation2 + $0x390] sm:$0xf]  ;;  %v7105_v54 = vor.u32 %v10215_v47, %v7104_v46  ;;  %v10158_v55 = vld [vmem:[#allocation2 + $0x94] sm:$0xf] }
  0x24   :  { %1079 = vmatpush.bf16.msrb.mxu3 %v6965_v25  ;;  %v10257_v53 = vld [vmem:[#allocation2 + $0x3a4] sm:$0xf0]  ;;  %v6890_v56 = vld [vmem:[#allocation2 + $0xa8] sm:$0xf0]  ;;  %v6889_v57 = vor.u32 %v10161_v50, %v6888_v49  ;;  %v7080_v58 = vld [vmem:[#allocation2 + $0x210] sm:$0xf] }
  0x25   :  { %1041 = vmatpush.bf16.msra.mxu1 %v7129_v42  ;;  %v10209_v59 = vld [vmem:[#allocation2 + $0x224] sm:$0xf0]  ;;  %v7273_v60 = vor.u32 %v10257_v53, %v7272_v52  ;;  %v6864_v61 = vld [vmem:[#allocation2 + $0x60] sm:$0xf]  ;;  %v10155_v62 = vld [vmem:[#allocation2 + $0x74] sm:$0xf0]  ;;  %v6893_v0 = vor.u32 %v10158_v55, %v6890_v56 }
  0x26   :  { %1029 = vmatpush.bf16.msra.mxu0 %v6913_v45  ;;  %v103_v63 = vld [vmem:[%s11510_s0 + $0x18] sm:$0xff]  ;;  %vm1022_vm0 = vcmask 130048   ;;  %v7248_v1 = vld [vmem:[#allocation2 + $0x360] sm:$0xf]  ;;  %v7081_v4 = vor.u32 %v10209_v59, %v7080_v58  ;;  %v10152_v5 = vld [vmem:[#allocation2 + $0x64] sm:$0xf]  ;;  %v6865_v7 = vor.u32 %v10155_v62, %v6864_v61 }
  0x27   :  { %1055 = vmatpush.bf16.msra.mxu2 %v7297_v48  ;;  %v10251_v2 = vld [vmem:[#allocation2 + $0x374] sm:$0xf0]  ;;  %v11175_v3 = vpack.c.bf16 %v103_v63, %v103_v63  ;;  %v6866_v6 = vld [vmem:[#allocation2 + $0x78] sm:$0xf0]  ;;  %v7056_v8 = vld [vmem:[#allocation2 + $0x1e0] sm:$0xf] }
  0x28   :  { %1080 = vmatpush.bf16.msrb.mxu3 %v6941_v38  ;;  %v10203_v9 = vld [vmem:[#allocation2 + $0x1f4] sm:$0xf0]  ;;  %v7249_v10 = vor.u32 %v10251_v2, %v7248_v1  ;;  %v6840_v11 = vld [vmem:[#allocation2 + $0x30] sm:$0xf]  ;;  %v10149_v12 = vld [vmem:[#allocation2 + $0x44] sm:$0xf0]  ;;  %v6869_v13 = vor.u32 %v10152_v5, %v6866_v6 }
  0x29   :  { %1042 = vmatpush.bf16.msra.mxu1 %v7105_v54  ;;  %7414 = vmatmul.msk.bf16.vlgmr.msra.gmra.mxu3 %vm1022_vm0, %v11175_v3  ;;  %v7224_v14 = vld [vmem:[#allocation2 + $0x330] sm:$0xf]  ;;  %v10245_v15 = vld [vmem:[#allocation2 + $0x344] sm:$0xf0]  ;;  %v7057_v16 = vor.u32 %v10203_v9, %v7056_v8  ;;  %v10146_v17 = vld [vmem:[#allocation2 + $0x34] sm:$0xf]  ;;  %v6841_v20 = vor.u32 %v10149_v12, %v6840_v11 }
  0x2a   :  { %1030 = vmatpush.bf16.msra.mxu0 %v6889_v57  ;;  %v6842_v18 = vld [vmem:[#allocation2 + $0x48] sm:$0xf0]  ;;  %v7032_v19 = vld [vmem:[#allocation2 + $0x1b0] sm:$0xf]  ;;  %v10197_v21 = vld [vmem:[#allocation2 + $0x1c4] sm:$0xf0]  ;;  %v7225_v24 = vor.u32 %v10245_v15, %v7224_v14 }
  0x2b   :  { %1056 = vmatpush.bf16.msra.mxu2 %v7273_v60  ;;  %v6816_v22 = vld [vmem:[#allocation2] sm:$0xf]  ;;  %v10143_v23 = vld [vmem:[#allocation2 + $0x14] sm:$0xf0]  ;;  %v10140_v27 = vld [vmem:[#allocation2 + $0x4] sm:$0xf]  ;;  %v6845_v28 = vor.u32 %v10146_v17, %v6842_v18  ;;  %v7033_v32 = vor.u32 %v10197_v21, %v7032_v19 }
  0x2c   :  { %1081 = vmatpush.bf16.msrb.mxu3 %v6917_v51  ;;  %v7200_v25 = vld [vmem:[#allocation2 + $0x300] sm:$0xf]  ;;  %v10239_v26 = vld [vmem:[#allocation2 + $0x314] sm:$0xf0]  ;;  %v6818_v29 = vld [vmem:[#allocation2 + $0x18] sm:$0xf0]  ;;  %v6817_v36 = vor.u32 %v10143_v23, %v6816_v22 }
  0x2d   :  { %1043 = vmatpush.bf16.msra.mxu1 %v7081_v4  ;;  %v10230_v30 = vld [vmem:[#allocation2 + $0x2d4] sm:$0xf]  ;;  %v7178_v31 = vld [vmem:[#allocation2 + $0x2e8] sm:$0xf0]  ;;  %v7008_v33 = vld [vmem:[#allocation2 + $0x180] sm:$0xf]  ;;  %v7201_v40 = vor.u32 %v10239_v26, %v7200_v25  ;;  %v6821_v45 = vor.u32 %v10140_v27, %v6818_v29 }
  0x2e   :  { %1031 = vmatpush.bf16.msra.mxu0 %v6865_v7  ;;  %v10284_v34 = vld [vmem:[#allocation2 + $0x484] sm:$0xf]  ;;  %v7394_v35 = vld [vmem:[#allocation2 + $0x498] sm:$0xf0]  ;;  %v10191_v37 = vld [vmem:[#allocation2 + $0x194] sm:$0xf0]  ;;  %v7181_v41 = vor.u32 %v10230_v30, %v7178_v31 }
  0x2f   :  { %1057 = vmatpush.bf16.msra.mxu2 %v7249_v10  ;;  %v6992_v38 = vld [vmem:[#allocation2 + $0x158] sm:$0xf]  ;;  %v10186_v39 = vld [vmem:[#allocation2 + $0x16c] sm:$0xf0]  ;;  %v10278_v43 = vld [vmem:[#allocation2 + $0x454] sm:$0xf]  ;;  %v7397_v47 = vor.u32 %v10284_v34, %v7394_v35  ;;  %v7009_v50 = vor.u32 %v10191_v37, %v7008_v33 }
  0x30   :  { %1082 = vmatpush.bf16.msrb.mxu3 %v6893_v0  ;;  %v102_v42 = vld [vmem:[%s11510_s0 + $0x10] sm:$0xff]  ;;  %v7370_v44 = vld [vmem:[#allocation2 + $0x468] sm:$0xf0]  ;;  %v100_v46 = vld [vmem:[%s11510_s0] sm:$0xff]  ;;  %v6993_v51 = vor.u32 %v10186_v39, %v6992_v38 }
  0x31   :  { %1044 = vmatpush.bf16.msra.mxu1 %v7057_v16  ;;  %v7184_v48 = vld [vmem:[#allocation2 + $0x2d8] sm:$0xf]  ;;  %v10234_v49 = vld [vmem:[#allocation2 + $0x2ec] sm:$0xf0]  ;;  %v10224_v52 = vld [vmem:[#allocation2 + $0x2a4] sm:$0xf]  ;;  %v11188_v55 = vpack.c.bf16 %v102_v42, %v102_v42  ;;  %v7373_v56 = vor.u32 %v10278_v43, %v7370_v44  ;;  %v11190_v59 = vpack.c.bf16 %v100_v46, %v100_v46 }
  0x32   :  { %1032 = vmatpush.bf16.msra.mxu0 %v6841_v20  ;;  %v7154_v53 = vld [vmem:[#allocation2 + $0x2b8] sm:$0xf0]  ;;  %v101_v54 = vld [vmem:[%s11510_s0 + $0x8] sm:$0xff]  ;;  %v10180_v58 = vld [vmem:[#allocation2 + $0x13c] sm:$0xf0]  ;;  %v7185_v60 = vor.u32 %v10234_v49, %v7184_v48 }
  0x33   :  { %1058 = vmatpush.bf16.msra.mxu2 %v7225_v24  ;;  %v6968_v57 = vld [vmem:[#allocation2 + $0x128] sm:$0xf]  ;;  %v10272_v61 = vld [vmem:[#allocation2 + $0x424] sm:$0xf]  ;;  %v7346_v62 = vld [vmem:[#allocation2 + $0x438] sm:$0xf0]  ;;  %v7157_v63 = vor.u32 %v10224_v52, %v7154_v53  ;;  %v11192_v0 = vpack.c.bf16 %v101_v54, %v101_v54 }
  0x34   :  { %1083 = vmatpush.bf16.msrb.mxu3 %v6869_v13  ;;  %v7160_v1 = vld [vmem:[#allocation2 + $0x2a8] sm:$0xf]  ;;  %v10228_v2 = vld [vmem:[#allocation2 + $0x2bc] sm:$0xf0]  ;;  %v6969_v4 = vor.u32 %v10180_v58, %v6968_v57  ;;  %v10218_v5 = vld [vmem:[#allocation2 + $0x274] sm:$0xf]  ;;  %v7349_v7 = vor.u32 %v10272_v61, %v7346_v62 }
  0x35   :  { %1045 = vmatpush.bf16.msra.mxu1 %v7033_v32  ;;  %v7130_v6 = vld [vmem:[#allocation2 + $0x288] sm:$0xf0]  ;;  %v6944_v8 = vld [vmem:[#allocation2 + $0xf8] sm:$0xf]  ;;  %v10174_v9 = vld [vmem:[#allocation2 + $0x10c] sm:$0xf0]  ;;  %v7161_v10 = vor.u32 %v10228_v2, %v7160_v1 }
  0x36   :  { %1033 = vmatpush.bf16.msra.mxu0 %v6817_v36  ;;  %v10266_v11 = vld [vmem:[#allocation2 + $0x3f4] sm:$0xf]  ;;  %v7322_v12 = vld [vmem:[#allocation2 + $0x408] sm:$0xf0]  ;;  %v7133_v13 = vor.u32 %v10218_v5, %v7130_v6  ;;  %v7136_v14 = vld [vmem:[#allocation2 + $0x278] sm:$0xf]  ;;  %v6945_v16 = vor.u32 %v10174_v9, %v6944_v8 }
  0x37   :  { %1059 = vmatpush.bf16.msra.mxu2 %v7201_v40  ;;  %v10222_v15 = vld [vmem:[#allocation2 + $0x28c] sm:$0xf0]  ;;  %v10212_v17 = vld [vmem:[#allocation2 + $0x244] sm:$0xf]  ;;  %v7106_v18 = vld [vmem:[#allocation2 + $0x258] sm:$0xf0]  ;;  %v7325_v19 = vor.u32 %v10266_v11, %v7322_v12 }
  0x38   :  { %1084 = vmatpush.bf16.msrb.mxu3 %v6845_v28  ;;  %v6920_v20 = vld [vmem:[#allocation2 + $0xc8] sm:$0xf]  ;;  %v10168_v21 = vld [vmem:[#allocation2 + $0xdc] sm:$0xf0]  ;;  %v7137_v22 = vor.u32 %v10222_v15, %v7136_v14  ;;  %v10260_v23 = vld [vmem:[#allocation2 + $0x3c4] sm:$0xf]  ;;  %v7109_v25 = vor.u32 %v10212_v17, %v7106_v18 }
  0x39   :  { %1046 = vmatpush.bf16.msra.mxu1 %v7009_v50  ;;  %1034 = vmatmul.bf16.vlgmr.msra.gmra.mxu0 %v11190_v59  ;;  %v7298_v24 = vld [vmem:[#allocation2 + $0x3d8] sm:$0xf0]  ;;  %v7112_v26 = vld [vmem:[#allocation2 + $0x248] sm:$0xf]  ;;  %v10216_v27 = vld [vmem:[#allocation2 + $0x25c] sm:$0xf0]  ;;  %v6921_v28 = vor.u32 %v10168_v21, %v6920_v20 }
  0x3a   :  { %1091 = vmatpush.bf16.msrb.mxu0 %v7181_v41  ;;  %1060 = vmatmul.bf16.vlgmr.msra.gmra.mxu2 %v11188_v55  ;;  %v10206_v29 = vld [vmem:[#allocation2 + $0x214] sm:$0xf]  ;;  %v7082_v30 = vld [vmem:[#allocation2 + $0x228] sm:$0xf0]  ;;  %v7301_v31 = vor.u32 %v10260_v23, %v7298_v24  ;;  %v6896_v32 = vld [vmem:[#allocation2 + $0x98] sm:$0xf]  ;;  %v7113_v34 = vor.u32 %v10216_v27, %v7112_v26 }
  0x3b   :  { %1124 = vmatpush.bf16.msrb.mxu2 %v7397_v47  ;;  %v10162_v33 = vld [vmem:[#allocation2 + $0xac] sm:$0xf0]  ;;  %v10254_v35 = vld [vmem:[#allocation2 + $0x394] sm:$0xf]  ;;  %v7274_v36 = vld [vmem:[#allocation2 + $0x3a8] sm:$0xf0]  ;;  %v7085_v37 = vor.u32 %v10206_v29, %v7082_v30 }
  0x3c   :  { %1085 = vmatpush.bf16.msrb.mxu3 %v6821_v45  ;;  %1047 = vmatmul.bf16.vlgmr.msra.gmra.mxu1 %v11192_v0  ;;  %v7088_v38 = vld [vmem:[#allocation2 + $0x218] sm:$0xf]  ;;  %v10210_v39 = vld [vmem:[#allocation2 + $0x22c] sm:$0xf0]  ;;  %v6897_v40 = vor.u32 %v10162_v33, %v6896_v32  ;;  %v10200_v41 = vld [vmem:[#allocation2 + $0x1e4] sm:$0xf]  ;;  %v7277_v43 = vor.u32 %v10254_v35, %v7274_v36 }
  0x3d   :  { %1104 = vmatpush.bf16.msrb.mxu1 %v7373_v56  ;;  %v7058_v42 = vld [vmem:[#allocation2 + $0x1f8] sm:$0xf0]  ;;  %v6872_v44 = vld [vmem:[#allocation2 + $0x68] sm:$0xf]  ;;  %v10156_v45 = vld [vmem:[#allocation2 + $0x7c] sm:$0xf0]  ;;  %v7089_v46 = vor.u32 %v10210_v39, %v7088_v38 }
  0x3e   :  { %1092 = vmatpush.bf16.msrb.mxu0 %v7157_v63  ;;  %v10248_v47 = vld [vmem:[#allocation2 + $0x364] sm:$0xf]  ;;  %v7250_v48 = vld [vmem:[#allocation2 + $0x378] sm:$0xf0]  ;;  %v7061_v49 = vor.u32 %v10200_v41, %v7058_v42  ;;  %v7064_v50 = vld [vmem:[#allocation2 + $0x1e8] sm:$0xf]  ;;  %v6873_v52 = vor.u32 %v10156_v45, %v6872_v44 }
  0x3f   :  { %1143 = vmatpush.bf16.msra.mxu2 %v7185_v60  ;;  %1086 = vmatmul.bf16.vlgmr.msrb.gmra.mxu3 %v11190_v59  ;;  %v10194_v53 = vld [vmem:[#allocation2 + $0x1b4] sm:$0xf]  ;;  %v7034_v54 = vld [vmem:[#allocation2 + $0x1c8] sm:$0xf0]  ;;  %v7253_v56 = vor.u32 %v10248_v47, %v7250_v48  ;;  %v6848_v57 = vld [vmem:[#allocation2 + $0x38] sm:$0xf] }
  0x40   :  { %1130 = vmatpush.bf16.msra.mxu3 %v6993_v51  ;;  %v10204_v51 = vld [vmem:[#allocation2 + $0x1fc] sm:$0xf0]  ;;  %v10150_v58 = vld [vmem:[#allocation2 + $0x4c] sm:$0xf0]  ;;  %v10242_v61 = vld [vmem:[#allocation2 + $0x334] sm:$0xf]  ;;  %v7037_v63 = vor.u32 %v10194_v53, %v7034_v54 }
  0x41   :  { %1105 = vmatpush.bf16.msrb.mxu1 %v7349_v7  ;;  %v7065_v60 = vor.u32 %v10204_v51, %v7064_v50  ;;  %v7226_v62 = vld [vmem:[#allocation2 + $0x348] sm:$0xf0]  ;;  %v10188_v1 = vld [vmem:[#allocation2 + $0x184] sm:$0xf]  ;;  %v7040_v2 = vld [vmem:[#allocation2 + $0x1b8] sm:$0xf]  ;;  %v6849_v5 = vor.u32 %v10150_v58, %v6848_v57 }
  0x42   :  { %1093 = vmatpush.bf16.msrb.mxu0 %v7133_v13  ;;  %v7010_v6 = vld [vmem:[#allocation2 + $0x198] sm:$0xf0]  ;;  %v6824_v7 = vld [vmem:[#allocation2 + $0x8] sm:$0xf]  ;;  %v10144_v8 = vld [vmem:[#allocation2 + $0x1c] sm:$0xf0]  ;;  %v7229_v9 = vor.u32 %v10242_v61, %v7226_v62 }
  0x43   :  { %1144 = vmatpush.bf16.msra.mxu2 %v7161_v10  ;;  %v7376_v10 = vld [vmem:[#allocation2 + $0x458] sm:$0xf]  ;;  %v10282_v11 = vld [vmem:[#allocation2 + $0x46c] sm:$0xf0]  ;;  %v10236_v12 = vld [vmem:[#allocation2 + $0x304] sm:$0xf]  ;;  %v7013_v17 = vor.u32 %v10188_v1, %v7010_v6  ;;  %v6825_v21 = vor.u32 %v10144_v8, %v6824_v7 }
  0x44   :  { %1131 = vmatpush.bf16.msra.mxu3 %v6969_v4  ;;  %v10198_v4 = vld [vmem:[#allocation2 + $0x1cc] sm:$0xf0]  ;;  %v7202_v14 = vld [vmem:[#allocation2 + $0x318] sm:$0xf0]  ;;  %v7016_v18 = vld [vmem:[#allocation2 + $0x188] sm:$0xf] }
  0x45   :  { %1106 = vmatpush.bf16.msrb.mxu1 %v7325_v19  ;;  %v7041_v13 = vor.u32 %v10198_v4, %v7040_v2  ;;  %v10183_v15 = vld [vmem:[#allocation2 + $0x15c] sm:$0xf]  ;;  %v10192_v19 = vld [vmem:[#allocation2 + $0x19c] sm:$0xf0]  ;;  %v7400_v20 = vld [vmem:[#allocation2 + $0x488] sm:$0xf]  ;;  %v7205_v26 = vor.u32 %v10236_v12, %v7202_v14 }
  0x46   :  { %1094 = vmatpush.bf16.msrb.mxu0 %v7109_v25  ;;  %v10288_v23 = vld [vmem:[#allocation2 + $0x49c] sm:$0xf0]  ;;  %v10231_v24 = vld [vmem:[#allocation2 + $0x2dc] sm:$0xf]  ;;  %v7186_v25 = vld [vmem:[#allocation2 + $0x2f0] sm:$0xf0]  ;;  %v7017_v30 = vor.u32 %v10192_v19, %v7016_v18 }
  0x47   :  { %1145 = vmatpush.bf16.msra.mxu2 %v7137_v22  ;;  %v7377_v22 = vor.u32 %v10282_v11, %v7376_v10  ;;  %v10276_v29 = vld [vmem:[#allocation2 + $0x43c] sm:$0xf0]  ;;  %v6970_v32 = vld [vmem:[#allocation2 + $0x140] sm:$0xf0]  ;;  %v7401_v33 = vor.u32 %v10288_v23, %v7400_v20  ;;  %v7378_v35 = vld [vmem:[#allocation2 + $0x470] sm:$0xf0]  ;;  %v7189_v36 = vor.u32 %v10231_v24, %v7186_v25 }
  0x48   :  { %1132 = vmatpush.bf16.msra.mxu3 %v6945_v16  ;;  %v6994_v16 = vld [vmem:[#allocation2 + $0x170] sm:$0xf0]  ;;  %v10225_v38 = vld [vmem:[#allocation2 + $0x2ac] sm:$0xf]  ;;  %v7162_v39 = vld [vmem:[#allocation2 + $0x2c0] sm:$0xf0] }
  0x49   :  { %1107 = vmatpush.bf16.msrb.mxu1 %v7301_v31  ;;  %v6997_v27 = vor.u32 %v10183_v15, %v6994_v16  ;;  %v10177_v31 = vld [vmem:[#allocation2 + $0x12c] sm:$0xf]  ;;  %v7328_v41 = vld [vmem:[#allocation2 + $0x3f8] sm:$0xf]  ;;  %v10270_v42 = vld [vmem:[#allocation2 + $0x40c] sm:$0xf0]  ;;  %v7165_v48 = vor.u32 %v10225_v38, %v7162_v39 }
  0x4a   :  { %1095 = vmatpush.bf16.msrb.mxu0 %v7085_v37  ;;  %7415 = vmatmul.msk.bf16.vlgmr.msrb.gmra.mxu2 %vm1022_vm0, %v11175_v3  ;;  %v10171_v44 = vld [vmem:[#allocation2 + $0xfc] sm:$0xf]  ;;  %v6946_v45 = vld [vmem:[#allocation2 + $0x110] sm:$0xf0]  ;;  %v7354_v47 = vld [vmem:[#allocation2 + $0x440] sm:$0xf0] }
  0x4b   :  { %1146 = vmatpush.bf16.msra.mxu2 %v7113_v34  ;;  %v10279_v34 = vld [vmem:[#allocation2 + $0x45c] sm:$0xf]  ;;  %v7138_v51 = vld [vmem:[#allocation2 + $0x290] sm:$0xf0]  ;;  %v7304_v53 = vld [vmem:[#allocation2 + $0x3c8] sm:$0xf] }
  0x4c   :  { %1133 = vmatpush.bf16.msra.mxu3 %v6921_v28  ;;  %v7352_v28 = vld [vmem:[#allocation2 + $0x428] sm:$0xf]  ;;  %v10219_v50 = vld [vmem:[#allocation2 + $0x27c] sm:$0xf]  ;;  %v10264_v54 = vld [vmem:[#allocation2 + $0x3dc] sm:$0xf0] }
  0x4d   :  { %1108 = vmatpush.bf16.msrb.mxu1 %v7277_v43  ;;  %v7353_v37 = vor.u32 %v10276_v29, %v7352_v28  ;;  %v7381_v43 = vor.u32 %v10279_v34, %v7378_v35  ;;  %v10165_v57 = vld [vmem:[#allocation2 + $0xcc] sm:$0xf]  ;;  %v6922_v58 = vld [vmem:[#allocation2 + $0xe0] sm:$0xf0]  ;;  %v7330_v61 = vld [vmem:[#allocation2 + $0x410] sm:$0xf0]  ;;  %v7141_v62 = vor.u32 %v10219_v50, %v7138_v51 }
  0x4e   :  { %1096 = vmatpush.bf16.msrb.mxu0 %v7061_v49  ;;  %v7329_v49 = vor.u32 %v10270_v42, %v7328_v41  ;;  %v10213_v1 = vld [vmem:[#allocation2 + $0x24c] sm:$0xf]  ;;  %v7114_v2 = vld [vmem:[#allocation2 + $0x260] sm:$0xf0]  ;;  %v6925_v4 = vor.u32 %v10165_v57, %v6922_v58  ;;  %v10258_v6 = vld [vmem:[#allocation2 + $0x3ac] sm:$0xf0] }
  0x4f   :  { %1147 = vmatpush.bf16.msra.mxu2 %v7089_v46  ;;  %v10273_v46 = vld [vmem:[#allocation2 + $0x42c] sm:$0xf]  ;;  %v10159_v8 = vld [vmem:[#allocation2 + $0x9c] sm:$0xf]  ;;  %v7306_v11 = vld [vmem:[#allocation2 + $0x3e0] sm:$0xf0]  ;;  %v7117_v12 = vor.u32 %v10213_v1, %v7114_v2 }
  0x50   :  { %1134 = vmatpush.bf16.msra.mxu3 %v6897_v40  ;;  %v6973_v40 = vor.u32 %v10177_v31, %v6970_v32  ;;  %v10261_v10 = vld [vmem:[#allocation2 + $0x3cc] sm:$0xf]  ;;  %v10207_v14 = vld [vmem:[#allocation2 + $0x21c] sm:$0xf]  ;;  %v7090_v15 = vld [vmem:[#allocation2 + $0x230] sm:$0xf0] }
  0x51   :  { %1109 = vmatpush.bf16.msrb.mxu1 %v7253_v56  ;;  %v7357_v56 = vor.u32 %v10273_v46, %v7354_v47  ;;  %v10252_v18 = vld [vmem:[#allocation2 + $0x37c] sm:$0xf0]  ;;  %v7309_v19 = vor.u32 %v10261_v10, %v7306_v11  ;;  %v10153_v20 = vld [vmem:[#allocation2 + $0x6c] sm:$0xf]  ;;  %v7282_v23 = vld [vmem:[#allocation2 + $0x3b0] sm:$0xf0]  ;;  %v7093_v24 = vor.u32 %v10207_v14, %v7090_v15 }
  0x52   :  { %1097 = vmatpush.bf16.msrb.mxu0 %v7037_v63  ;;  %v7305_v63 = vor.u32 %v10264_v54, %v7304_v53  ;;  %v7232_v29 = vld [vmem:[#allocation2 + $0x338] sm:$0xf]  ;;  %v10147_v32 = vld [vmem:[#allocation2 + $0x3c] sm:$0xf]  ;;  %v10249_v34 = vld [vmem:[#allocation2 + $0x36c] sm:$0xf] }
  0x53   :  { %1148 = vmatpush.bf16.msra.mxu2 %v7065_v60  ;;  %v10267_v60 = vld [vmem:[#allocation2 + $0x3fc] sm:$0xf]  ;;  %v7258_v35 = vld [vmem:[#allocation2 + $0x380] sm:$0xf0]  ;;  %v7208_v38 = vld [vmem:[#allocation2 + $0x308] sm:$0xf] }
  0x54   :  { %1135 = vmatpush.bf16.msra.mxu3 %v6873_v52  ;;  %v6949_v52 = vor.u32 %v10171_v44, %v6946_v45  ;;  %v7333_v7 = vor.u32 %v10267_v60, %v7330_v61  ;;  %v10195_v39 = vld [vmem:[#allocation2 + $0x1bc] sm:$0xf]  ;;  %v10240_v42 = vld [vmem:[#allocation2 + $0x31c] sm:$0xf0]  ;;  %v6826_v44 = vld [vmem:[#allocation2 + $0x20] sm:$0xf0]  ;;  %v7261_v45 = vor.u32 %v10249_v34, %v7258_v35 }
  0x55   :  { %1110 = vmatpush.bf16.msrb.mxu1 %v7229_v9  ;;  %v6898_v9 = vld [vmem:[#allocation2 + $0xb0] sm:$0xf0]  ;;  %v7000_v46 = vld [vmem:[#allocation2 + $0x160] sm:$0xf]  ;;  %v10285_v47 = vld [vmem:[#allocation2 + $0x48c] sm:$0xf]  ;;  %v7209_v53 = vor.u32 %v10240_v42, %v7208_v38 }
  0x56   :  { %1098 = vmatpush.bf16.msrb.mxu0 %v7013_v17  ;;  %v6901_v16 = vor.u32 %v10159_v8, %v6898_v9  ;;  %v7256_v17 = vld [vmem:[#allocation2 + $0x368] sm:$0xf]  ;;  %v10243_v50 = vld [vmem:[#allocation2 + $0x33c] sm:$0xf]  ;;  %v7234_v51 = vld [vmem:[#allocation2 + $0x350] sm:$0xf0] }
  0x57   :  { %1149 = vmatpush.bf16.msra.mxu2 %v7041_v13  ;;  %v7257_v25 = vor.u32 %v10252_v18, %v7256_v17  ;;  %v10189_v54 = vld [vmem:[#allocation2 + $0x18c] sm:$0xf]  ;;  %v7192_v60 = vld [vmem:[#allocation2 + $0x2e0] sm:$0xf]  ;;  %v10235_v61 = vld [vmem:[#allocation2 + $0x2f4] sm:$0xf0] }
  0x58   :  { %1136 = vmatpush.bf16.msra.mxu3 %v6849_v5  ;;  %v7280_v5 = vld [vmem:[#allocation2 + $0x398] sm:$0xf]  ;;  %v6976_v1 = vld [vmem:[#allocation2 + $0x130] sm:$0xf]  ;;  %v7384_v2 = vld [vmem:[#allocation2 + $0x460] sm:$0xf]  ;;  %v7193_v9 = vor.u32 %v10235_v61, %v7192_v60 }
  0x59   :  { %1111 = vmatpush.bf16.msrb.mxu1 %v7205_v26  ;;  %1099 = vmatmul.bf16.vlgmr.msrb.gmra.mxu0 %v11192_v0  ;;  %v7281_v13 = vor.u32 %v10258_v6, %v7280_v5  ;;  %v10201_v26 = vld [vmem:[#allocation2 + $0x1ec] sm:$0xf]  ;;  %v10181_v5 = vld [vmem:[#allocation2 + $0x144] sm:$0xf0]  ;;  %v7408_v10 = vld [vmem:[#allocation2 + $0x490] sm:$0xf] }
  0x5a   :  { %1156 = vmatpush.bf16.msra.mxu0 %v7377_v22  ;;  %v10255_v22 = vld [vmem:[#allocation2 + $0x39c] sm:$0xf]  ;;  %v10237_v6 = vld [vmem:[#allocation2 + $0x30c] sm:$0xf]  ;;  %v10289_v11 = vld [vmem:[#allocation2 + $0x4a4] sm:$0xf0]  ;;  %v6977_v15 = vor.u32 %v10181_v5, %v6976_v1 }
  0x5b   :  { %1150 = vmatpush.bf16.msra.mxu2 %v7017_v30  ;;  %v10246_v30 = vld [vmem:[#allocation2 + $0x34c] sm:$0xf0]  ;;  %v7285_v31 = vor.u32 %v10255_v22, %v7282_v23  ;;  %v6952_v17 = vld [vmem:[#allocation2 + $0x100] sm:$0xf]  ;;  %v10184_v22 = vld [vmem:[#allocation2 + $0x164] sm:$0xf] }
  0x5c   :  { %1137 = vmatpush.bf16.msra.mxu3 %v6825_v21  ;;  %1112 = vmatmul.bf16.vlgmr.msrb.gmra.mxu1 %v11188_v55  ;;  %v6874_v21 = vld [vmem:[#allocation2 + $0x80] sm:$0xf0]  ;;  %v7360_v18 = vld [vmem:[#allocation2 + $0x430] sm:$0xf]  ;;  %v7002_v23 = vld [vmem:[#allocation2 + $0x178] sm:$0xf0] }
  0x5d   :  { %1195 = vmatpush.bf16.msra.mxu1 %v7189_v36  ;;  %v6877_v28 = vor.u32 %v10153_v20, %v6874_v21  ;;  %v10175_v20 = vld [vmem:[#allocation2 + $0x114] sm:$0xf0]  ;;  %v7409_v21 = vor.u32 %v10289_v11, %v7408_v10  ;;  %v10178_v34 = vld [vmem:[#allocation2 + $0x134] sm:$0xf]  ;;  %v6978_v35 = vld [vmem:[#allocation2 + $0x148] sm:$0xf0] }
  0x5e   :  { %1157 = vmatpush.bf16.msra.mxu0 %v7353_v37  ;;  %1151 = vmatmul.bf16.vlgmr.msra.gmra.mxu2 %v11192_v0  ;;  %v7233_v37 = vor.u32 %v10246_v30, %v7232_v29  ;;  %v6928_v29 = vld [vmem:[#allocation2 + $0xd0] sm:$0xf]  ;;  %v7336_v30 = vld [vmem:[#allocation2 + $0x400] sm:$0xf]  ;;  %v10217_v38 = vld [vmem:[#allocation2 + $0x264] sm:$0xf0] }
  0x5f   :  { %1176 = vmatpush.bf16.msrb.mxu2 %v7401_v33  ;;  %1138 = vmatmul.bf16.vlgmr.msra.gmra.mxu3 %v11190_v59  ;;  %v6850_v33 = vld [vmem:[#allocation2 + $0x50] sm:$0xf0]  ;;  %v7312_v42 = vld [vmem:[#allocation2 + $0x3d0] sm:$0xf]  ;;  %v6930_v61 = vld [vmem:[#allocation2 + $0xe8] sm:$0xf0] }
  0x60   :  { %1182 = vmatpush.bf16.msrb.mxu3 %v6997_v27  ;;  %v7066_v27 = vld [vmem:[#allocation2 + $0x200] sm:$0xf0]  ;;  %v6853_v41 = vor.u32 %v10147_v32, %v6850_v33  ;;  %v7005_v32 = vor.u32 %v10184_v22, %v7002_v23  ;;  %v10169_v33 = vld [vmem:[#allocation2 + $0xe4] sm:$0xf0]  ;;  %v10166_v60 = vld [vmem:[#allocation2 + $0xd4] sm:$0xf] }
  0x61   :  { %1196 = vmatpush.bf16.msra.mxu1 %v7165_v48  ;;  %v7069_v36 = vor.u32 %v10201_v26, %v7066_v27  ;;  %v7402_v48 = vld [vmem:[#allocation2 + $0x4a0] sm:$0xf0]  ;;  %v10223_v26 = vld [vmem:[#allocation2 + $0x294] sm:$0xf0]  ;;  %v10205_v1 = vld [vmem:[#allocation2 + $0x204] sm:$0xf0] }
  0x62   :  { %1158 = vmatpush.bf16.msra.mxu0 %v7329_v49  ;;  %v10187_v49 = vld [vmem:[#allocation2 + $0x174] sm:$0xf0]  ;;  %v7405_v58 = vor.u32 %v10285_v47, %v7402_v48  ;;  %v6954_v47 = vld [vmem:[#allocation2 + $0x118] sm:$0xf0]  ;;  %v6856_v5 = vld [vmem:[#allocation2 + $0x40] sm:$0xf] }
  0x63   :  { %1208 = vmatpush.bf16.msra.mxu2 %v7381_v43  ;;  %v10141_v43 = vld [vmem:[#allocation2 + $0xc] sm:$0xf]  ;;  %v10160_v10 = vld [vmem:[#allocation2 + $0xa4] sm:$0xf]  ;;  %v6906_v11 = vld [vmem:[#allocation2 + $0xb8] sm:$0xf0] }
  0x64   :  { %1183 = vmatpush.bf16.msrb.mxu3 %v6973_v40  ;;  %v7042_v40 = vld [vmem:[#allocation2 + $0x1d0] sm:$0xf0]  ;;  %v6829_v57 = vor.u32 %v10141_v43, %v6826_v44  ;;  %v10265_v43 = vld [vmem:[#allocation2 + $0x3e4] sm:$0xf0]  ;;  %v6981_v44 = vor.u32 %v10178_v34, %v6978_v35  ;;  %v6882_v23 = vld [vmem:[#allocation2 + $0x88] sm:$0xf0] }
  0x65   :  { %1197 = vmatpush.bf16.msra.mxu1 %v7141_v62  ;;  %v7001_v62 = vor.u32 %v10187_v49, %v7000_v46  ;;  %v10172_v46 = vld [vmem:[#allocation2 + $0x104] sm:$0xf]  ;;  %v7096_v49 = vld [vmem:[#allocation2 + $0x220] sm:$0xf]  ;;  %v10154_v22 = vld [vmem:[#allocation2 + $0x74] sm:$0xf] }
  0x66   :  { %1159 = vmatpush.bf16.msra.mxu0 %v7305_v63  ;;  %v7237_v63 = vor.u32 %v10243_v50, %v7234_v51  ;;  %v10211_v50 = vld [vmem:[#allocation2 + $0x234] sm:$0xf0]  ;;  %v7313_v51 = vor.u32 %v10265_v43, %v7312_v42  ;;  %v6885_v34 = vor.u32 %v10154_v22, %v6882_v23  ;;  %v10286_v43 = vld [vmem:[#allocation2 + $0x494] sm:$0xf]  ;;  %v7614_v22 = vld [vmem:[#allocation4 + $0x180] sm:$0xf] }
  0x67   :  { %1209 = vmatpush.bf16.msra.mxu2 %v7357_v56  ;;  %v7018_v56 = vld [vmem:[#allocation2 + $0x1a0] sm:$0xf0]  ;;  %v10344_v23 = vld [vmem:[#allocation4 + $0x1ac] sm:$0xf0] }
  0x68   :  { %1184 = vmatpush.bf16.msrb.mxu3 %v6949_v52  ;;  %v7045_v52 = vor.u32 %v10195_v39, %v7042_v40  ;;  %v7021_v8 = vor.u32 %v10189_v54, %v7018_v56  ;;  %v6929_v40 = vor.u32 %v10169_v33, %v6928_v29  ;;  %v7288_v54 = vld [vmem:[#allocation2 + $0x3a0] sm:$0xf]  ;;  %v10259_v56 = vld [vmem:[#allocation2 + $0x3b4] sm:$0xf0]  ;;  %v7216_v33 = vld [vmem:[#allocation2 + $0x310] sm:$0xf] }
  0x69   :  { %1198 = vmatpush.bf16.msra.mxu1 %v7117_v12  ;;  %v7168_v12 = vld [vmem:[#allocation2 + $0x2b0] sm:$0xf] }
  0x6a   :  { %1160 = vmatpush.bf16.msra.mxu0 %v7281_v13  ;;  %v10229_v13 = vld [vmem:[#allocation2 + $0x2c4] sm:$0xf0] }
  0x6b   :  { %1210 = vmatpush.bf16.msra.mxu2 %v7333_v7  ;;  %v7210_v7 = vld [vmem:[#allocation2 + $0x320] sm:$0xf0] }
  0x6c   :  { %1185 = vmatpush.bf16.msrb.mxu3 %v6925_v4  ;;  %v10283_v4 = vld [vmem:[#allocation2 + $0x474] sm:$0xf0] }
  0x6d   :  { %1199 = vmatpush.bf16.msra.mxu1 %v7093_v24  ;;  %v7385_v14 = vor.u32 %v10283_v4, %v7384_v2  ;;  %v7169_v24 = vor.u32 %v10229_v13, %v7168_v12  ;;  %v7289_v2 = vor.u32 %v10259_v56, %v7288_v54  ;;  %v7048_v13 = vld [vmem:[#allocation2 + $0x1c0] sm:$0xf]  ;;  %v10220_v54 = vld [vmem:[#allocation2 + $0x284] sm:$0xf]  ;;  %v7146_v56 = vld [vmem:[#allocation2 + $0x298] sm:$0xf0] }
  0x6e   :  { %1161 = vmatpush.bf16.msra.mxu0 %v7257_v25  ;;  %7416 = vmatmul.msk.bf16.vlgmr.msrb.gmra.mxu2 %vm1022_vm0, %v11175_v3  ;;  %v7144_v25 = vld [vmem:[#allocation2 + $0x280] sm:$0xf] }
  0x6f   :  { %1211 = vmatpush.bf16.msra.mxu2 %v7309_v19  ;;  %v10277_v19 = vld [vmem:[#allocation2 + $0x444] sm:$0xf0] }
  0x70   :  { %1186 = vmatpush.bf16.msrb.mxu3 %v6901_v16  ;;  %v7213_v16 = vor.u32 %v10237_v6, %v7210_v7  ;;  %v7361_v27 = vor.u32 %v10277_v19, %v7360_v18  ;;  %v7264_v6 = vld [vmem:[#allocation2 + $0x370] sm:$0xf]  ;;  %v10253_v7 = vld [vmem:[#allocation2 + $0x384] sm:$0xf0]  ;;  %v7240_v18 = vld [vmem:[#allocation2 + $0x340] sm:$0xf] }
  0x71   :  { %1200 = vmatpush.bf16.msra.mxu1 %v7069_v36  ;;  %v7145_v36 = vor.u32 %v10223_v26, %v7144_v25  ;;  %v10247_v19 = vld [vmem:[#allocation2 + $0x354] sm:$0xf0]  ;;  %v10232_v25 = vld [vmem:[#allocation2 + $0x2e4] sm:$0xf]  ;;  %v7194_v26 = vld [vmem:[#allocation2 + $0x2f8] sm:$0xf0] }
  0x72   :  { %1162 = vmatpush.bf16.msra.mxu0 %v7233_v37  ;;  %v7120_v37 = vld [vmem:[#allocation2 + $0x250] sm:$0xf]  ;;  %v7241_v29 = vor.u32 %v10247_v19, %v7240_v18  ;;  %v7197_v35 = vor.u32 %v10232_v25, %v7194_v26  ;;  %v7290_v18 = vld [vmem:[#allocation2 + $0x3b8] sm:$0xf0]  ;;  %v10476_v26 = vld [vmem:[#allocation4 + $0x5cc] sm:$0xf0] }
  0x73   :  { %1212 = vmatpush.bf16.msra.mxu2 %v7285_v31  ;;  %v10271_v31 = vld [vmem:[#allocation2 + $0x414] sm:$0xf0]  ;;  %v7121_v48 = vor.u32 %v10217_v38, %v7120_v37  ;;  %v10148_v37 = vld [vmem:[#allocation2 + $0x44] sm:$0xf]  ;;  %v6858_v38 = vld [vmem:[#allocation2 + $0x58] sm:$0xf0] }
  0x74   :  { %1187 = vmatpush.bf16.msrb.mxu3 %v6877_v28  ;;  %v6953_v28 = vor.u32 %v10175_v20, %v6952_v17  ;;  %v7337_v39 = vor.u32 %v10271_v31, %v7336_v30  ;;  %v6832_v17 = vld [vmem:[#allocation2 + $0x10] sm:$0xf]  ;;  %v6909_v20 = vor.u32 %v10160_v10, %v6906_v11  ;;  %v10280_v31 = vld [vmem:[#allocation2 + $0x464] sm:$0xf] }
  0x75   :  { %1201 = vmatpush.bf16.msra.mxu1 %v7045_v52  ;;  %v8142_v25 = vld [vmem:[#allocation4 + $0x5a0] sm:$0xf] }
  0x76   :  { %1163 = vmatpush.bf16.msra.mxu0 %v7209_v53  ;;  %v6880_v53 = vld [vmem:[#allocation2 + $0x70] sm:$0xf] }
  0x77   :  { %1213 = vmatpush.bf16.msra.mxu2 %v7261_v45  ;;  %v10163_v45 = vld [vmem:[#allocation2 + $0xb4] sm:$0xf0] }
  0x78   :  { %1188 = vmatpush.bf16.msrb.mxu3 %v6853_v41  ;;  %v6904_v41 = vld [vmem:[#allocation2 + $0xa0] sm:$0xf] }
  0x79   :  { %1164 = vmatmul.bf16.vlgmr.msra.gmra.mxu0 %v11188_v55  ;;  %1202 = vmatpush.bf16.msra.mxu1 %v7021_v8  ;;  %v6905_v52 = vor.u32 %v10163_v45, %v6904_v41  ;;  %v6933_v8 = vor.u32 %v10166_v60, %v6930_v61  ;;  %v7170_v41 = vld [vmem:[#allocation2 + $0x2c8] sm:$0xf0]  ;;  %v10274_v45 = vld [vmem:[#allocation2 + $0x434] sm:$0xf]  ;;  %v10268_v60 = vld [vmem:[#allocation2 + $0x404] sm:$0xf] }
  0x7a   :  { %1228 = vmatpush.bf16.msrb.mxu0 %v7405_v58  ;;  %v10157_v58 = vld [vmem:[#allocation2 + $0x84] sm:$0xf0]  ;;  %v7338_v61 = vld [vmem:[#allocation2 + $0x418] sm:$0xf0] }
  0x7b   :  { %1214 = vmatpush.bf16.msra.mxu2 %v7237_v63  ;;  %v7072_v63 = vld [vmem:[#allocation2 + $0x1f0] sm:$0xf]  ;;  %v6881_v4 = vor.u32 %v10157_v58, %v6880_v53  ;;  %v10380_v53 = vld [vmem:[#allocation4 + $0x2cc] sm:$0xf0] }
  0x7c   :  { %1189 = vmatpush.bf16.msrb.mxu3 %v6829_v57  ;;  %1203 = vmatmul.bf16.vlgmr.msra.gmra.mxu1 %v11192_v0  ;;  %v6957_v57 = vor.u32 %v10172_v46, %v6954_v47  ;;  %v7073_v12 = vor.u32 %v10205_v1, %v7072_v63  ;;  %v7362_v46 = vld [vmem:[#allocation2 + $0x448] sm:$0xf0]  ;;  %v7149_v1 = vor.u32 %v10220_v54, %v7146_v56  ;;  %v7998_v54 = vld [vmem:[#allocation4 + $0x480] sm:$0xf]  ;;  %v10440_v56 = vld [vmem:[#allocation4 + $0x4ac] sm:$0xf0] }
  0x7d   :  { %1260 = vmatpush.bf16.msrb.mxu1 %v7385_v14  ;;  %v10199_v14 = vld [vmem:[#allocation2 + $0x1d4] sm:$0xf0]  ;;  %v7365_v58 = vor.u32 %v10274_v45, %v7362_v46  ;;  %v7026_v45 = vld [vmem:[#allocation2 + $0x1a8] sm:$0xf0]  ;;  %v7518_v46 = vld [vmem:[#allocation4 + $0xc0] sm:$0xf] }
  0x7e   :  { %1247 = vmatpush.bf16.msra.mxu0 %v7193_v9  ;;  %v10151_v9 = vld [vmem:[#allocation2 + $0x54] sm:$0xf0] }
  0x7f   :  { %1190 = vmatmul.bf16.vlgmr.msrb.gmra.mxu3 %v11190_v59  ;;  %1215 = vmatpush.bf16.msra.mxu2 %v7213_v16  ;;  %v6857_v16 = vor.u32 %v10151_v9, %v6856_v5  ;;  %v10214_v5 = vld [vmem:[#allocation2 + $0x254] sm:$0xf]  ;;  %v7314_v9 = vld [vmem:[#allocation2 + $0x3e8] sm:$0xf0] }
  0x80   :  { %1234 = vmatpush.bf16.msra.mxu3 %v7001_v62  ;;  %v7097_v62 = vor.u32 %v10211_v50, %v7096_v49  ;;  %v10142_v49 = vld [vmem:[#allocation2 + $0x14] sm:$0xf] }
  0x81   :  { %1261 = vmatpush.bf16.msrb.mxu1 %v7361_v27  ;;  %v7024_v27 = vld [vmem:[#allocation2 + $0x190] sm:$0xf] }
  0x82   :  { %1248 = vmatpush.bf16.msra.mxu0 %v7169_v24  ;;  %1216 = vmatmul.bf16.vlgmr.msra.gmra.mxu2 %v11188_v55  ;;  %v7049_v24 = vor.u32 %v10199_v14, %v7048_v13  ;;  %v10356_v13 = vld [vmem:[#allocation4 + $0x20c] sm:$0xf0]  ;;  %v10208_v14 = vld [vmem:[#allocation2 + $0x224] sm:$0xf] }
  0x83   :  { %1280 = vmatpush.bf16.msrb.mxu2 %v7409_v21  ;;  %v10145_v21 = vld [vmem:[#allocation2 + $0x24] sm:$0xf0] }
  0x84   :  { %1235 = vmatpush.bf16.msra.mxu3 %v6977_v15  ;;  %v7265_v15 = vor.u32 %v10253_v7, %v7264_v6  ;;  %v6833_v30 = vor.u32 %v10145_v21, %v6832_v17  ;;  %v7122_v6 = vld [vmem:[#allocation2 + $0x268] sm:$0xf0]  ;;  %v7341_v7 = vor.u32 %v10268_v60, %v7338_v61  ;;  %v10256_v17 = vld [vmem:[#allocation2 + $0x3a4] sm:$0xf]  ;;  %v10202_v21 = vld [vmem:[#allocation2 + $0x1f4] sm:$0xf] }
  0x85   :  { %1262 = vmatpush.bf16.msrb.mxu1 %v7337_v39  ;;  %v7125_v11 = vor.u32 %v10214_v5, %v7122_v6  ;;  %v10668_v5 = vld [vmem:[#allocation4 + $0xbcc] sm:$0xf0] }
  0x86   :  { %1249 = vmatpush.bf16.msra.mxu0 %v7145_v36  ;;  %v10241_v36 = vld [vmem:[#allocation2 + $0x324] sm:$0xf0] }
  0x87   :  { %1286 = vmatpush.bf16.msra.mxu2 %v7005_v32  ;;  %v7386_v32 = vld [vmem:[#allocation2 + $0x478] sm:$0xf0]  ;;  %v7217_v47 = vor.u32 %v10241_v36, %v7216_v33  ;;  %v7566_v33 = vld [vmem:[#allocation4 + $0x120] sm:$0xf] }
  0x88   :  { %1236 = vmatpush.bf16.msra.mxu3 %v6953_v28  ;;  %v10193_v28 = vld [vmem:[#allocation2 + $0x1a4] sm:$0xf0]  ;;  %v7389_v42 = vor.u32 %v10280_v31, %v7386_v32  ;;  %v7615_v31 = vor.u32 %v10344_v23, %v7614_v22  ;;  %v10196_v32 = vld [vmem:[#allocation2 + $0x1c4] sm:$0xf]  ;;  %v8094_v36 = vld [vmem:[#allocation4 + $0x540] sm:$0xf] }
  0x89   :  { %1263 = vmatpush.bf16.msrb.mxu1 %v7313_v51  ;;  %7417 = vmatmul.msk.bf16.vlgmr.msrb.gmra.mxu0 %vm1022_vm0, %v11175_v3  ;;  %v7025_v39 = vor.u32 %v10193_v28, %v7024_v27  ;;  %v6834_v51 = vld [vmem:[#allocation2 + $0x28] sm:$0xf0]  ;;  %v7293_v27 = vor.u32 %v10256_v17, %v7290_v18  ;;  %v8143_v28 = vor.u32 %v10476_v26, %v8142_v25  ;;  %v10548_v17 = vld [vmem:[#allocation4 + $0x80c] sm:$0xf0]  ;;  %v11224_v26 = vld [vmem:[#allocation9] sm:$0x3f] }
  0x8a   :  { %1250 = vmatpush.bf16.msra.mxu0 %v7121_v48  ;;  %v6861_v48 = vor.u32 %v10148_v37, %v6858_v38  ;;  %v10464_v37 = vld [vmem:[#allocation4 + $0x56c] sm:$0xf0] }
  0x8b   :  { %1287 = vmatpush.bf16.msra.mxu2 %v6981_v44  ;;  %v7410_v44 = vld [vmem:[#allocation2 + $0x4a8] sm:$0xf0]  ;;  %v10416_v25 = vld [vmem:[#allocation4 + $0x3ec] sm:$0xf0] }
  0x8c   :  { %1237 = vmatpush.bf16.msra.mxu3 %v6929_v40  ;;  %v10226_v40 = vld [vmem:[#allocation2 + $0x2b4] sm:$0xf] }
  0x8d   :  { %1264 = vmatpush.bf16.msrb.mxu1 %v7289_v2  ;;  %v7173_v50 = vor.u32 %v10226_v40, %v7170_v41  ;;  %v7710_v2 = vld [vmem:[#allocation4 + $0x240] sm:$0xf]  ;;  %v10244_v40 = vld [vmem:[#allocation2 + $0x344] sm:$0xf]  ;;  %v7242_v41 = vld [vmem:[#allocation2 + $0x358] sm:$0xf0] }
  0x8e   :  { %1251 = vmatpush.bf16.msra.mxu0 %v7097_v62  ;;  %v6837_v62 = vor.u32 %v10142_v49, %v6834_v51  ;;  %v8046_v49 = vld [vmem:[#allocation4 + $0x4e0] sm:$0xf]  ;;  %v7245_v51 = vor.u32 %v10244_v40, %v7242_v41 }
  0x8f   :  { %1288 = vmatpush.bf16.msra.mxu2 %v6957_v57  ;;  %v7413_v57 = vor.u32 %v10286_v43, %v7410_v44 }
  0x90   :  { %1238 = vmatpush.bf16.msra.mxu3 %v6905_v52  ;;  %v7758_v52 = vld [vmem:[#allocation4 + $0x2a0] sm:$0xf] }
  0x91   :  { %1265 = vmatpush.bf16.msrb.mxu1 %v7265_v15  ;;  %v7759_v63 = vor.u32 %v10380_v53, %v7758_v52  ;;  %v7098_v15 = vld [vmem:[#allocation2 + $0x238] sm:$0xf0]  ;;  %v10572_v52 = vld [vmem:[#allocation4 + $0x8cc] sm:$0xf0] }
  0x92   :  { %1252 = vmatpush.bf16.msra.mxu0 %v7073_v12  ;;  %7418 = vmatmul.msk.bf16.vlgmr.msrb.gmra.mxu2 %vm1022_vm0, %v11175_v3  ;;  %v7662_v12 = vld [vmem:[#allocation4 + $0x1e0] sm:$0xf] }
  0x93   :  { %1289 = vmatpush.bf16.msra.mxu2 %v6933_v8  ;;  %v10262_v8 = vld [vmem:[#allocation2 + $0x3d4] sm:$0xf]  ;;  %v7663_v19 = vor.u32 %v10356_v13, %v7662_v12 }
  0x94   :  { %1239 = vmatpush.bf16.msra.mxu3 %v6881_v4  ;;  %v10368_v4 = vld [vmem:[#allocation4 + $0x26c] sm:$0xf0] }
  0x95   :  { %1266 = vmatpush.bf16.msrb.mxu1 %v7241_v29  ;;  %v7711_v10 = vor.u32 %v10368_v4, %v7710_v2  ;;  %v10250_v29 = vld [vmem:[#allocation2 + $0x374] sm:$0xf]  ;;  %v8910_v4 = vld [vmem:[#allocation4 + $0xba0] sm:$0xf] }
  0x96   :  { %1253 = vmatpush.bf16.msra.mxu0 %v7049_v24  ;;  %v7074_v24 = vld [vmem:[#allocation2 + $0x208] sm:$0xf0] }
  0x97   :  { %1290 = vmatpush.bf16.msra.mxu2 %v6909_v20  ;;  %v7101_v20 = vor.u32 %v10208_v14, %v7098_v15  ;;  %v7950_v14 = vld [vmem:[#allocation4 + $0x420] sm:$0xf]  ;;  %v10428_v15 = vld [vmem:[#allocation4 + $0x44c] sm:$0xf0] }
  0x98   :  { %1240 = vmatpush.bf16.msra.mxu3 %v6857_v16  ;;  %v7317_v16 = vor.u32 %v10262_v8, %v7314_v9  ;;  %v7422_v9 = vld [vmem:[#allocation4] sm:$0xf]  ;;  %v7951_v18 = vor.u32 %v10428_v15, %v7950_v14 }
  0x99   :  { %1267 = vmatpush.bf16.msrb.mxu1 %v7217_v47  ;;  %v10320_v47 = vld [vmem:[#allocation4 + $0xec] sm:$0xf0] }
  0x9a   :  { %1254 = vmatpush.bf16.msra.mxu0 %v7025_v39  ;;  %v8095_v39 = vor.u32 %v10464_v37, %v8094_v36  ;;  %v7519_v60 = vor.u32 %v10320_v47, %v7518_v46  ;;  %v10524_v36 = vld [vmem:[#allocation4 + $0x74c] sm:$0xf0]  ;;  %v8286_v47 = vld [vmem:[#allocation4 + $0x6c0] sm:$0xf] }
  0x9b   :  { %1291 = vmatpush.bf16.msra.mxu2 %v6885_v34  ;;  %v10332_v34 = vld [vmem:[#allocation4 + $0x14c] sm:$0xf0] }
  0x9c   :  { %1241 = vmatpush.bf16.msra.mxu3 %v6833_v30  ;;  %1268 = vmatmul.bf16.vlgmr.msrb.gmra.mxu1 %v11188_v55  ;;  %v7266_v30 = vld [vmem:[#allocation2 + $0x388] sm:$0xf0]  ;;  %v7567_v43 = vor.u32 %v10332_v34, %v7566_v33  ;;  %v7854_v33 = vld [vmem:[#allocation4 + $0x360] sm:$0xf]  ;;  %v10404_v34 = vld [vmem:[#allocation4 + $0x38c] sm:$0xf0] }
  0x9d   :  { %1255 = vmatmul.bf16.vlgmr.msra.gmra.mxu0 %v11192_v0  ;;  %1332 = vmatpush.bf16.msra.mxu1 %v7413_v57  ;;  %v7269_v38 = vor.u32 %v10250_v29, %v7266_v30  ;;  %v10238_v57 = vld [vmem:[#allocation2 + $0x314] sm:$0xf]  ;;  %v8814_v30 = vld [vmem:[#allocation4 + $0xae0] sm:$0xf]  ;;  %v7855_v37 = vor.u32 %v10404_v34, %v7854_v33  ;;  %v10392_v46 = vld [vmem:[#allocation4 + $0x32c] sm:$0xf0] }
  0x9e   :  { %1312 = vmatpush.bf16.msrb.mxu0 %v7389_v42  ;;  %v10190_v42 = vld [vmem:[#allocation2 + $0x194] sm:$0xf]  ;;  %v7664_v33 = vld [vmem:[#allocation4 + $0x210] sm:$0xf0] }
  0x9f   :  { %1242 = vmatmul.bf16.vlgmr.msra.gmra.mxu3 %v11190_v59  ;;  %1292 = vmatpush.bf16.msra.mxu2 %v6861_v48  ;;  %v8526_v48 = vld [vmem:[#allocation4 + $0x8a0] sm:$0xf]  ;;  %v7029_v61 = vor.u32 %v10190_v42, %v7026_v45  ;;  %v10458_v34 = vld [vmem:[#allocation4 + $0x544] sm:$0xf] }
  0xa0   :  { %1299 = vmatpush.bf16.msrb.mxu3 %v7197_v35  ;;  %v7050_v35 = vld [vmem:[#allocation2 + $0x1d8] sm:$0xf0]  ;;  %v8527_v2 = vor.u32 %v10572_v52, %v8526_v48  ;;  %v7806_v45 = vld [vmem:[#allocation4 + $0x300] sm:$0xf]  ;;  %v10512_v48 = vld [vmem:[#allocation4 + $0x6ec] sm:$0xf0] }
  0xa1   :  { %4834 = vmatpush.bf16.msrb.mxu1 %v7759_v63  ;;  %v7053_v44 = vor.u32 %v10196_v32, %v7050_v35  ;;  %v10308_v63 = vld [vmem:[#allocation4 + $0x8c] sm:$0xf0]  ;;  %v8334_v35 = vld [vmem:[#allocation4 + $0x720] sm:$0xf] }
  0xa2   :  { %1313 = vmatpush.bf16.msrb.mxu0 %v7365_v58  ;;  %v7218_v58 = vld [vmem:[#allocation2 + $0x328] sm:$0xf0]  ;;  %v10620_v52 = vld [vmem:[#allocation4 + $0xa4c] sm:$0xf0] }
  0xa3   :  { %1293 = vmatpush.bf16.msra.mxu2 %v6837_v62  ;;  %v7470_v62 = vld [vmem:[#allocation4 + $0x60] sm:$0xf]  ;;  %v7221_v6 = vor.u32 %v10238_v57, %v7218_v58 }
  0xa4   :  { %1300 = vmatpush.bf16.msrb.mxu3 %v7173_v50  ;;  %v10452_v50 = vld [vmem:[#allocation4 + $0x50c] sm:$0xf0]  ;;  %v7471_v8 = vor.u32 %v10308_v63, %v7470_v62  ;;  %v8238_v58 = vld [vmem:[#allocation4 + $0x660] sm:$0xf] }
  0xa5   :  { %4835 = vmatpush.bf16.msrb.mxu1 %v7711_v10  ;;  %v8047_v53 = vor.u32 %v10452_v50, %v8046_v49  ;;  %v10296_v10 = vld [vmem:[#allocation4 + $0x2c] sm:$0xf0]  ;;  %v7807_v49 = vor.u32 %v10392_v46, %v7806_v45  ;;  %v10446_v45 = vld [vmem:[#allocation4 + $0x4e4] sm:$0xf]  ;;  %v8048_v46 = vld [vmem:[#allocation4 + $0x510] sm:$0xf0] }
  0xa6   :  { %1314 = vmatpush.bf16.msrb.mxu0 %v7341_v7  ;;  %1294 = vmatmul.bf16.vlgmr.msra.gmra.mxu2 %v11190_v59  ;;  %v7077_v59 = vor.u32 %v10202_v21, %v7074_v24  ;;  %v10560_v7 = vld [vmem:[#allocation4 + $0x86c] sm:$0xf0]  ;;  %v7902_v24 = vld [vmem:[#allocation4 + $0x3c0] sm:$0xf] }
  0xa7   :  { %4847 = vmatpush.bf16.msrb.mxu2 %v8143_v28  ;;  %v10656_v21 = vld [vmem:[#allocation4 + $0xb6c] sm:$0xf0]  ;;  %v7903_v29 = vor.u32 %v10416_v25, %v7902_v24  ;;  %v7712_v24 = vld [vmem:[#allocation4 + $0x270] sm:$0xf0]  ;;  %v10470_v25 = vld [vmem:[#allocation4 + $0x5a4] sm:$0xf] }
  0xa8   :  { %1301 = vmatpush.bf16.msrb.mxu3 %v7149_v1  ;;  %v7999_v1 = vor.u32 %v10440_v56, %v7998_v54  ;;  %v10536_v28 = vld [vmem:[#allocation4 + $0x7ac] sm:$0xf0]  ;;  %v8287_v56 = vor.u32 %v10512_v48, %v8286_v47  ;;  %v8051_v48 = vor.u32 %v10446_v45, %v8048_v46  ;;  %v9630_v46 = vld [vmem:[#allocation4 + $0x1140] sm:$0xf] }
  0xa9   :  { %4836 = vmatpush.bf16.msrb.mxu1 %v7663_v19  ;;  %v8862_v19 = vld [vmem:[#allocation4 + $0xb40] sm:$0xf]  ;;  %v10608_v62 = vld [vmem:[#allocation4 + $0x9ec] sm:$0xf0] }
  0xaa   :  { %1315 = vmatpush.bf16.msrb.mxu0 %v7317_v16  ;;  %v8430_v16 = vld [vmem:[#allocation4 + $0x7e0] sm:$0xf]  ;;  %v8863_v22 = vor.u32 %v10656_v21, %v8862_v19 }
  0xab   :  { %4848 = vmatpush.bf16.msrb.mxu2 %v8095_v39  ;;  %v8431_v23 = vor.u32 %v10548_v17, %v8430_v16  ;;  %v10632_v39 = vld [vmem:[#allocation4 + $0xaac] sm:$0xf0]  ;;  %v9294_v17 = vld [vmem:[#allocation4 + $0xea0] sm:$0xf] }
  0xac   :  { %1302 = vmatpush.bf16.msrb.mxu3 %v7125_v11  ;;  %7419 = vmatmul.msk.bf16.vlgmr.msra.gmra.mxu1 %vm1022_vm0, %v11175_v3  ;;  %v8478_v3 = vld [vmem:[#allocation4 + $0x840] sm:$0xf]  ;;  %v8911_v11 = vor.u32 %v10668_v5, %v8910_v4  ;;  %v11220_v12 = vpop.f32.mrf.mxu3 }
  0xad   :  { %4837 = vmatpush.bf16.msrb.mxu1 %v7615_v31  ;;  %v8479_v13 = vor.u32 %v10560_v7, %v8478_v3  ;;  %v8622_v3 = vld [vmem:[#allocation4 + $0x960] sm:$0xf]  ;;  %v10596_v7 = vld [vmem:[#allocation4 + $0x98c] sm:$0xf0] }
  0xae   :  { %1316 = vmatpush.bf16.msrb.mxu0 %v7293_v27  ;;  %v8382_v27 = vld [vmem:[#allocation4 + $0x780] sm:$0xf]  ;;  %v8623_v15 = vor.u32 %v10596_v7, %v8622_v3  ;;  %v10314_v3 = vld [vmem:[#allocation4 + $0xc4] sm:$0xf]  ;;  %v7520_v7 = vld [vmem:[#allocation4 + $0xf0] sm:$0xf0] }
  0xaf   :  { %4849 = vmatpush.bf16.msrb.mxu2 %v8047_v53 }
  0xb0   :  { %1303 = vmatpush.bf16.msrb.mxu3 %v7101_v20  ;;  %v7423_v20 = vor.u32 %v10296_v10, %v7422_v9  ;;  %v8190_v9 = vld [vmem:[#allocation4 + $0x600] sm:$0xf]  ;;  %v10488_v10 = vld [vmem:[#allocation4 + $0x62c] sm:$0xf0] }
  0xb1   :  { %4838 = vmatpush.bf16.msrb.mxu1 %v7567_v43 }
  0xb2   :  { %1317 = vmatpush.bf16.msrb.mxu0 %v7269_v38  ;;  %v8766_v38 = vld [vmem:[#allocation4 + $0xa80] sm:$0xf] }
  0xb3   :  { %4850 = vmatpush.bf16.msrb.mxu2 %v7999_v1  ;;  %v8767_v41 = vor.u32 %v10632_v39, %v8766_v38  ;;  %v9198_v39 = vld [vmem:[#allocation4 + $0xde0] sm:$0xf] }
  0xb4   :  { %1304 = vmatpush.bf16.msrb.mxu3 %v7077_v59  ;;  %v260_v59 = vperm.slane %v11224_v26, 0  ;;  %v1076_v32 = vpop.f32.mrf.mxu3 }
  0xb5   :  { %4839 = vmatpush.bf16.msrb.mxu1 %v7519_v60  ;;  %v10500_v60 = vld [vmem:[#allocation4 + $0x68c] sm:$0xf0] }
  0xb6   :  { %1318 = vmatpush.bf16.msrb.mxu0 %v7245_v51  ;;  %v1035_v40 = vpop.f32.mrf.mxu0  ;;  %v8718_v51 = vld [vmem:[#allocation4 + $0xa20] sm:$0xf] }
  0xb7   :  { %4851 = vmatpush.bf16.msrb.mxu2 %v7951_v18  ;;  %v1036_v42 = vadd.f32 %v1035_v40, %v260_v59  ;;  %v8719_v53 = vor.u32 %v10620_v52, %v8718_v51  ;;  %v10764_v18 = vld [vmem:[#allocation4 + $0xecc] sm:$0xf0] }
  0xb8   :  { %1305 = vmatpush.bf16.msrb.mxu3 %v7053_v44  ;;  %v8335_v44 = vor.u32 %v10524_v36, %v8334_v35  ;;  %v9295_v21 = vor.u32 %v10764_v18, %v9294_v17  ;;  %v8096_v35 = vld [vmem:[#allocation4 + $0x570] sm:$0xf0]  ;;  %v10740_v40 = vld [vmem:[#allocation4 + $0xe0c] sm:$0xf0]  ;;  %v10302_v17 = vld [vmem:[#allocation4 + $0x64] sm:$0xf] }
  0xb9   :  { %4840 = vmatpush.bf16.msrb.mxu1 %v7471_v8  ;;  %v1048_v43 = vpop.f32.mrf.mxu1  ;;  %v8099_v38 = vor.u32 %v10458_v34, %v8096_v35  ;;  %v7472_v18 = vld [vmem:[#allocation4 + $0x90] sm:$0xf0]  ;;  %v10398_v34 = vld [vmem:[#allocation4 + $0x364] sm:$0xf] }
  0xba   :  { %1319 = vmatpush.bf16.msrb.mxu0 %v7221_v6  ;;  %v1049_v50 = vadd.f32 %v1048_v43, %v1036_v42  ;;  %v8239_v6 = vor.u32 %v10500_v60, %v8238_v58  ;;  %v9199_v42 = vor.u32 %v10740_v40, %v9198_v39  ;;  %v10338_v43 = vld [vmem:[#allocation4 + $0x184] sm:$0xf]  ;;  %v8000_v58 = vld [vmem:[#allocation4 + $0x4b0] sm:$0xf0]  ;;  %v10680_v39 = vld [vmem:[#allocation4 + $0xc2c] sm:$0xf0] }
  0xbb   :  { %4852 = vmatpush.bf16.msrb.mxu2 %v7903_v29  ;;  %v9246_v29 = vld [vmem:[#allocation4 + $0xe40] sm:$0xf] }
  0xbc   :  { %1306 = vmatpush.bf16.msrb.mxu3 %v7029_v61  ;;  %v8670_v61 = vld [vmem:[#allocation4 + $0x9c0] sm:$0xf] }
  0xbd   :  { %1320 = vmatmul.bf16.vlgmr.msrb.gmra.mxu0 %v11188_v55  ;;  %4841 = vmatpush.bf16.msrb.mxu1 %v7423_v20  ;;  %v8383_v55 = vor.u32 %v10536_v28, %v8382_v27  ;;  %v1061_v54 = vpop.f32.mrf.mxu2  ;;  %v10362_v20 = vld [vmem:[#allocation4 + $0x244] sm:$0xf]  ;;  %v8144_v27 = vld [vmem:[#allocation4 + $0x5d0] sm:$0xf0] }
  0xbe   :  { %4873 = vmatpush.bf16.msra.mxu0 %v8911_v11  ;;  %v1062_v57 = vadd.f32 %v1061_v54, %v1049_v50  ;;  %v1037_v1 = vpop.f32.mrf.mxu0  ;;  %v10374_v11 = vld [vmem:[#allocation4 + $0x2a4] sm:$0xf]  ;;  %v7715_v32 = vor.u32 %v10362_v20, %v7712_v24  ;;  %v10728_v50 = vld [vmem:[#allocation4 + $0xdac] sm:$0xf0]  ;;  %v7568_v54 = vld [vmem:[#allocation4 + $0x150] sm:$0xf0] }
  0xbf   :  { %1307 = vmatmul.bf16.vlgmr.msrb.gmra.mxu3 %v11192_v0  ;;  %v10644_v0 = vld [vmem:[#allocation4 + $0xb0c] sm:$0xf0]  ;;  %4853 = vmatpush.bf16.msrb.mxu2 %v7855_v37  ;;  %v261_v37 = vperm.slane %v11224_v26, 1  ;;  %v7904_v24 = vld [vmem:[#allocation4 + $0x3f0] sm:$0xf0] }
  0xc0   :  { %4860 = vmatpush.bf16.msra.mxu3 %v8527_v2  ;;  %v8815_v31 = vor.u32 %v10644_v0, %v8814_v30  ;;  %v1075_v63 = vadd.f32 %v11220_v12, %v1062_v57  ;;  %v8671_v2 = vor.u32 %v10608_v62, %v8670_v61  ;;  %v8191_v12 = vor.u32 %v10488_v10, %v8190_v9  ;;  %v10752_v30 = vld [vmem:[#allocation4 + $0xe6c] sm:$0xf0]  ;;  %v10434_v57 = vld [vmem:[#allocation4 + $0x484] sm:$0xf]  ;;  %v7952_v10 = vld [vmem:[#allocation4 + $0x450] sm:$0xf0] }
  0xc1   :  { %v1050_v4 = vpop.f32.mrf.mxu1  ;;  %4886 = vmatpush.bf16.msra.mxu1 %v9295_v21  ;;  %v9247_v59 = vor.u32 %v10752_v30, %v9246_v29  ;;  %v8003_v62 = vor.u32 %v10434_v57, %v8000_v58  ;;  %v10716_v1 = vld [vmem:[#allocation4 + $0xd4c] sm:$0xf0]  ;;  %v10422_v9 = vld [vmem:[#allocation4 + $0x424] sm:$0xf]  ;;  %v9006_v30 = vld [vmem:[#allocation4 + $0xc60] sm:$0xf] }
  0xc2   :  { %4874 = vmatpush.bf16.msra.mxu0 %v8863_v22  ;;  %v1087_v5 = vpop.f32.mrf.mxu3  ;;  %v1338_v8 = vmax.f32 %v1075_v63, 0.0  ;;  %v8574_v22 = vld [vmem:[#allocation4 + $0x900] sm:$0xf] }
  0xc3   :  { %4854 = vmatpush.bf16.msrb.mxu2 %v7807_v49  ;;  %v1088_v47 = vadd.f32 %v1087_v5, %v261_v37  ;;  %v9150_v49 = vld [vmem:[#allocation4 + $0xd80] sm:$0xf]  ;;  %v7856_v37 = vld [vmem:[#allocation4 + $0x390] sm:$0xf0] }
  0xc4   :  { %4861 = vmatpush.bf16.msra.mxu3 %v8479_v13  ;;  %v7760_v13 = vld [vmem:[#allocation4 + $0x2d0] sm:$0xf0]  ;;  %v11228_v14 = vpack.c.bf16 %v1338_v8, %v1338_v8  ;;  %v9151_v52 = vor.u32 %v10728_v50, %v9150_v49  ;;  %v9102_v63 = vld [vmem:[#allocation4 + $0xd20] sm:$0xf]  ;;  %v7859_v40 = vor.u32 %v10398_v34, %v7856_v37  ;;  %v262_v49 = vperm.slane %v11224_v26, 2 }
  0xc5   :  { %v1063_v16 = vpop.f32.mrf.mxu2  ;;  %v7763_v19 = vor.u32 %v10374_v11, %v7760_v13  ;;  %4887 = vmatpush.bf16.msra.mxu1 %v9247_v59  ;;  %v9103_v5 = vor.u32 %v10716_v1, %v9102_v63  ;;  %v7523_v11 = vor.u32 %v10314_v3, %v7520_v7  ;;  %v7955_v13 = vor.u32 %v10422_v9, %v7952_v10  ;;  %v7424_v59 = vld [vmem:[#allocation4 + $0x30] sm:$0xf0]  ;;  %v9582_v58 = vld [vmem:[#allocation4 + $0x10e0] sm:$0xf]  ;;  %v10542_v63 = vld [vmem:[#allocation4 + $0x7e4] sm:$0xf] }
  0xc6   :  { %4875 = vmatpush.bf16.msra.mxu0 %v8815_v31  ;;  %4842 = vmatmul.bf16.vlgmr.msrb.gmra.mxu1 %v11228_v14  ;;  %v8147_v31 = vor.u32 %v10470_v25, %v8144_v27  ;;  %v10704_v16 = vld [vmem:[#allocation4 + $0xcec] sm:$0xf0]  ;;  %v8432_v1 = vld [vmem:[#allocation4 + $0x810] sm:$0xf0] }
  0xc7   :  { %v8384_v9 = vld [vmem:[#allocation4 + $0x7b0] sm:$0xf0] }
  0xc8   :  { %4862 = vmatpush.bf16.msra.mxu3 %v8431_v23  ;;  %v10584_v23 = vld [vmem:[#allocation4 + $0x92c] sm:$0xf0]  ;;  %v9248_v34 = vld [vmem:[#allocation4 + $0xe70] sm:$0xf0] }
  0xc9   :  { %v8575_v28 = vor.u32 %v10584_v23, %v8574_v22  ;;  %4888 = vmatpush.bf16.msra.mxu1 %v9199_v42  ;;  %v10410_v23 = vld [vmem:[#allocation4 + $0x3c4] sm:$0xf] }
  0xca   :  { %4876 = vmatpush.bf16.msra.mxu0 %v8767_v41  ;;  %v1089_v0 = vpop.f32.mrf.mxu3  ;;  %v7907_v29 = vor.u32 %v10410_v23, %v7904_v24  ;;  %v10566_v42 = vld [vmem:[#allocation4 + $0x8a4] sm:$0xf]  ;;  %v9296_v23 = vld [vmem:[#allocation4 + $0xed0] sm:$0xf0] }
  0xcb   :  { %v10692_v0 = vld [vmem:[#allocation4 + $0xc8c] sm:$0xf0] }
  0xcc   :  { %4863 = vmatpush.bf16.msra.mxu3 %v8383_v55  ;;  %v10350_v55 = vld [vmem:[#allocation4 + $0x1e4] sm:$0xf] }
  0xcd   :  { %v1126_v36 = vpop.f32.mrf.mxu2  ;;  %v7667_v41 = vor.u32 %v10350_v55, %v7664_v33  ;;  %4889 = vmatpush.bf16.msra.mxu1 %v9151_v52  ;;  %v9678_v55 = vld [vmem:[#allocation4 + $0x11a0] sm:$0xf]  ;;  %v10860_v33 = vld [vmem:[#allocation4 + $0x11cc] sm:$0xf0]  ;;  %v7808_v52 = vld [vmem:[#allocation4 + $0x330] sm:$0xf0] }
  0xce   :  { %4877 = vmatpush.bf16.msra.mxu0 %v8719_v53  ;;  %v10326_v53 = vld [vmem:[#allocation4 + $0x124] sm:$0xf] }
  0xcf   :  { %v7571_v4 = vor.u32 %v10326_v53, %v7568_v54  ;;  %v10554_v54 = vld [vmem:[#allocation4 + $0x844] sm:$0xf] }
  0xd0   :  { %4864 = vmatpush.bf16.msra.mxu3 %v8335_v44  ;;  %v7616_v44 = vld [vmem:[#allocation4 + $0x1b0] sm:$0xf0] }
  0xd1   :  { %v7619_v51 = vor.u32 %v10338_v43, %v7616_v44  ;;  %4890 = vmatpush.bf16.msra.mxu1 %v9103_v5  ;;  %v8528_v43 = vld [vmem:[#allocation4 + $0x8d0] sm:$0xf0]  ;;  %v9534_v5 = vld [vmem:[#allocation4 + $0x1080] sm:$0xf] }
  0xd2   :  { %4878 = vmatpush.bf16.msra.mxu0 %v8671_v2  ;;  %v8531_v44 = vor.u32 %v10566_v42, %v8528_v43 }
  0xd4   :  { %4865 = vmatpush.bf16.msra.mxu3 %v8287_v56 }
  0xd5   :  { %v1128_v61 = vpop.f32.mrf.mxu2 }
  0xd6   :  { %4879 = vmatpush.bf16.msra.mxu0 %v8623_v15  ;;  %v1100_v56 = vpop.f32.mrf.mxu0  ;;  %v9054_v15 = vld [vmem:[#allocation4 + $0xcc0] sm:$0xf] }
  0xd7   :  { %v1101_v60 = vadd.f32 %v1100_v56, %v1088_v47  ;;  %v10848_v47 = vld [vmem:[#allocation4 + $0x116c] sm:$0xf0]  ;;  %v8480_v56 = vld [vmem:[#allocation4 + $0x870] sm:$0xf0] }
  0xd8   :  { %4866 = vmatpush.bf16.msra.mxu3 %v8239_v6  ;;  %v8483_v57 = vor.u32 %v10554_v54, %v8480_v56  ;;  %v10662_v56 = vld [vmem:[#allocation4 + $0xba4] sm:$0xf] }
  0xd9   :  { %v1113_v2 = vpop.f32.mrf.mxu1 }
  0xda   :  { %4880 = vmatpush.bf16.msra.mxu0 %v8575_v28  ;;  %v1114_v6 = vadd.f32 %v1113_v2, %v1101_v60  ;;  %v7475_v28 = vor.u32 %v10302_v17, %v7472_v18  ;;  %v10836_v60 = vld [vmem:[#allocation4 + $0x110c] sm:$0xf0]  ;;  %v8435_v2 = vor.u32 %v10542_v63, %v8432_v1  ;;  %v10518_v17 = vld [vmem:[#allocation4 + $0x724] sm:$0xf]  ;;  %v8336_v18 = vld [vmem:[#allocation4 + $0x750] sm:$0xf0] }
  0xdb   :  { %v8339_v24 = vor.u32 %v10518_v17, %v8336_v18  ;;  %v9152_v63 = vld [vmem:[#allocation4 + $0xdb0] sm:$0xf0]  ;;  %v10842_v17 = vld [vmem:[#allocation4 + $0x1144] sm:$0xf] }
  0xdc   :  { %4867 = vmatpush.bf16.msra.mxu3 %v8191_v12  ;;  %v1127_v8 = vadd.f32 %v1126_v36, %v1114_v6  ;;  %v9679_v36 = vor.u32 %v10860_v33, %v9678_v55  ;;  %v10824_v6 = vld [vmem:[#allocation4 + $0x10ac] sm:$0xf0]  ;;  %v10746_v33 = vld [vmem:[#allocation4 + $0xe44] sm:$0xf] }
  0xdd   :  { %v9535_v7 = vor.u32 %v10824_v6, %v9534_v5  ;;  %v9251_v43 = vor.u32 %v10746_v33, %v9248_v34  ;;  %v10854_v5 = vld [vmem:[#allocation4 + $0x11a4] sm:$0xf] }
  0xde   :  { %4925 = vmatpush.bf16.msrb.mxu0 %v8147_v31  ;;  %v1339_v12 = vmax.f32 %v1127_v8, 0.0  ;;  %v1102_v20 = vpop.f32.mrf.mxu0  ;;  %v10290_v31 = vld [vmem:[#allocation4 + $0x4] sm:$0xf]  ;;  %4899 = vmatpush.bf16.msra.mxu2 %v9679_v36 }
  0xdf   :  { %v7427_v35 = vor.u32 %v10290_v31, %v7424_v59  ;;  %v10530_v8 = vld [vmem:[#allocation4 + $0x784] sm:$0xf] }
  0xe0   :  { %4912 = vmatpush.bf16.msrb.mxu3 %v7763_v19  ;;  %v9055_v19 = vor.u32 %v10704_v16, %v9054_v15  ;;  %v11232_v21 = vpack.c.bf16 %v1339_v12, %v1339_v12  ;;  %v8387_v10 = vor.u32 %v10530_v8, %v8384_v9  ;;  %v10812_v15 = vld [vmem:[#allocation4 + $0x104c] sm:$0xf0]  ;;  %v10758_v20 = vld [vmem:[#allocation4 + $0xea4] sm:$0xf]  ;;  %v8864_v9 = vld [vmem:[#allocation4 + $0xb70] sm:$0xf0] }
  0xe1   :  { %v11234_v22 = vpop.f32.mrf.mxu2  ;;  %v1115_v27 = vpop.f32.mrf.mxu1  ;;  %v9299_v31 = vor.u32 %v10758_v20, %v9296_v23  ;;  %v10506_v59 = vld [vmem:[#allocation4 + $0x6c4] sm:$0xf]  ;;  %v9632_v20 = vld [vmem:[#allocation4 + $0x1170] sm:$0xf0] }
  0xe2   :  { %4926 = vmatpush.bf16.msrb.mxu0 %v8099_v38  ;;  %4891 = vmatpush.bf16.msra.mxu1 %v9055_v19  ;;  %v1139_v25 = vpop.f32.mrf.mxu3  ;;  %v8958_v38 = vld [vmem:[#allocation4 + $0xc00] sm:$0xf]  ;;  %v10650_v8 = vld [vmem:[#allocation4 + $0xb44] sm:$0xf] }
  0xe3   :  { %4855 = vmatmul.bf16.vlgmr.msrb.gmra.mxu2 %v11232_v21  ;;  %v1140_v61 = vadd.f32 %v1139_v25, %v262_v49  ;;  %v263_v25 = vperm.slane %v11224_v26, 3  ;;  %v10638_v23 = vld [vmem:[#allocation4 + $0xae4] sm:$0xf] }
  0xe4   :  { %4913 = vmatpush.bf16.msrb.mxu3 %v7715_v32  ;;  %v9007_v32 = vor.u32 %v10692_v0, %v9006_v30 }
  0xe5   :  { %v1153_v3 = vadd.f32 %v11234_v22, %v1140_v61  ;;  %v10482_v61 = vld [vmem:[#allocation4 + $0x604] sm:$0xf] }
  0xe6   :  { %4927 = vmatpush.bf16.msrb.mxu0 %v8051_v48  ;;  %4892 = vmatpush.bf16.msra.mxu1 %v9007_v32  ;;  %v10386_v48 = vld [vmem:[#allocation4 + $0x304] sm:$0xf] }
  0xe7   :  { %v7811_v53 = vor.u32 %v10386_v48, %v7808_v52  ;;  %v10776_v52 = vld [vmem:[#allocation4 + $0xf2c] sm:$0xf0] }
  0xe8   :  { %4914 = vmatpush.bf16.msrb.mxu3 %v7667_v41  ;;  %v8959_v41 = vor.u32 %v10680_v39, %v8958_v38  ;;  %v9390_v39 = vld [vmem:[#allocation4 + $0xf60] sm:$0xf] }
  0xe9   :  { %v1154_v45 = vpop.f32.mrf.mxu2 }
  0xea   :  { %4928 = vmatpush.bf16.msrb.mxu0 %v8003_v62  ;;  %4893 = vmatpush.bf16.msra.mxu1 %v8959_v41  ;;  %v1141_v50 = vpop.f32.mrf.mxu3  ;;  %v9583_v62 = vor.u32 %v10836_v60, %v9582_v58  ;;  %v8240_v45 = vld [vmem:[#allocation4 + $0x690] sm:$0xf0] }
  0xec   :  { %4915 = vmatpush.bf16.msrb.mxu3 %v7619_v51  ;;  %v9631_v51 = vor.u32 %v10848_v47, %v9630_v46  ;;  %v10734_v46 = vld [vmem:[#allocation4 + $0xde4] sm:$0xf]  ;;  %v9200_v47 = vld [vmem:[#allocation4 + $0xe10] sm:$0xf0] }
  0xed   :  { %v9203_v58 = vor.u32 %v10734_v46, %v9200_v47  ;;  %v10674_v46 = vld [vmem:[#allocation4 + $0xc04] sm:$0xf]  ;;  %v8960_v47 = vld [vmem:[#allocation4 + $0xc30] sm:$0xf0] }
  0xee   :  { %4929 = vmatpush.bf16.msrb.mxu0 %v7955_v13  ;;  %4938 = vmatpush.bf16.msrb.mxu1 %v8531_v44  ;;  %v9486_v13 = vld [vmem:[#allocation4 + $0x1020] sm:$0xf]  ;;  %v10494_v44 = vld [vmem:[#allocation4 + $0x664] sm:$0xf] }
  0xef   :  { %4900 = vmatpush.bf16.msra.mxu2 %v9631_v51  ;;  %v9487_v12 = vor.u32 %v10812_v15, %v9486_v13  ;;  %v8243_v48 = vor.u32 %v10494_v44, %v8240_v45  ;;  %v9342_v51 = vld [vmem:[#allocation4 + $0xf00] sm:$0xf]  ;;  %v10710_v15 = vld [vmem:[#allocation4 + $0xd24] sm:$0xf]  ;;  %v264_v45 = vperm.slane %v11224_v26, 4 }
  0xf0   :  { %4916 = vmatpush.bf16.msrb.mxu3 %v7571_v4  ;;  %v9343_v54 = vor.u32 %v10776_v52, %v9342_v51  ;;  %v10573_v51 = vld [vmem:[#allocation4 + $0x8d4] sm:$0xf0]  ;;  %v10806_v52 = vld [vmem:[#allocation4 + $0x1024] sm:$0xf] }
  0xf1   :  { %v1178_v4 = vpop.f32.mrf.mxu2 }
  0xf2   :  { %4930 = vmatpush.bf16.msrb.mxu0 %v7907_v29  ;;  %4939 = vmatpush.bf16.msrb.mxu1 %v8483_v57  ;;  %v10800_v29 = vld [vmem:[#allocation4 + $0xfec] sm:$0xf0]  ;;  %v8912_v57 = vld [vmem:[#allocation4 + $0xbd0] sm:$0xf0] }
  0xf3   :  { %4901 = vmatpush.bf16.msra.mxu2 %v9583_v62  ;;  %v8915_v60 = vor.u32 %v10662_v56, %v8912_v57  ;;  %v10722_v62 = vld [vmem:[#allocation4 + $0xd84] sm:$0xf]  ;;  %v8672_v56 = vld [vmem:[#allocation4 + $0x9f0] sm:$0xf0]  ;;  %v8963_v57 = vor.u32 %v10674_v46, %v8960_v47  ;;  %v10525_v46 = vld [vmem:[#allocation4 + $0x754] sm:$0xf0] }
  0xf4   :  { %4917 = vmatpush.bf16.msrb.mxu3 %v7523_v11 }
  0xf6   :  { %4931 = vmatpush.bf16.msrb.mxu0 %v7859_v40  ;;  %4940 = vmatpush.bf16.msrb.mxu1 %v8435_v2  ;;  %v1165_v11 = vpop.f32.mrf.mxu0  ;;  %v10788_v40 = vld [vmem:[#allocation4 + $0xf8c] sm:$0xf0]  ;;  %v8192_v2 = vld [vmem:[#allocation4 + $0x630] sm:$0xf0] }
  0xf7   :  { %4902 = vmatpush.bf16.msra.mxu2 %v9535_v7  ;;  %v1166_v16 = vadd.f32 %v1165_v11, %v1153_v3  ;;  %v9391_v41 = vor.u32 %v10788_v40, %v9390_v39  ;;  %v8195_v6 = vor.u32 %v10482_v61, %v8192_v2  ;;  %v9680_v7 = vld [vmem:[#allocation4 + $0x11d0] sm:$0xf0]  ;;  %v8867_v11 = vor.u32 %v10650_v8, %v8864_v9  ;;  %v10561_v2 = vld [vmem:[#allocation4 + $0x874] sm:$0xf0] }
  0xf8   :  { %4918 = vmatpush.bf16.msrb.mxu3 %v7475_v28  ;;  %v9438_v28 = vld [vmem:[#allocation4 + $0xfc0] sm:$0xf]  ;;  %v9536_v40 = vld [vmem:[#allocation4 + $0x10b0] sm:$0xf0] }
  0xf9   :  { %v1179_v19 = vadd.f32 %v1178_v4, %v1166_v16  ;;  %v1180_v22 = vpop.f32.mrf.mxu2  ;;  %v1204_v27 = vpop.f32.mrf.mxu1  ;;  %v9439_v0 = vor.u32 %v10800_v29, %v9438_v28  ;;  %v9104_v16 = vld [vmem:[#allocation4 + $0xd50] sm:$0xf0]  ;;  %v9635_v29 = vor.u32 %v10842_v17, %v9632_v20 }
  0xfa   :  { %4932 = vmatpush.bf16.msrb.mxu0 %v7811_v53  ;;  %4941 = vmatpush.bf16.msrb.mxu1 %v8387_v10  ;;  %v9155_v10 = vor.u32 %v10722_v62, %v9152_v63  ;;  %v9107_v22 = vor.u32 %v10710_v15, %v9104_v16  ;;  %v9056_v28 = vld [vmem:[#allocation4 + $0xcf0] sm:$0xf0]  ;;  %v8438_v15 = vld [vmem:[#allocation4 + $0x7e8] sm:$0xf]  ;;  %v10549_v16 = vld [vmem:[#allocation4 + $0x814] sm:$0xf0] }
  0xfb   :  { %4903 = vmatpush.bf16.msra.mxu2 %v9487_v12  ;;  %v1340_v30 = vmax.f32 %v1179_v19, 0.0  ;;  %v9683_v12 = vor.u32 %v10854_v5, %v9680_v7  ;;  %v10590_v7 = vld [vmem:[#allocation4 + $0x964] sm:$0xf]  ;;  %v8624_v8 = vld [vmem:[#allocation4 + $0x990] sm:$0xf0] }
  0xfc   :  { %4919 = vmatpush.bf16.msrb.mxu3 %v7427_v35  ;;  %v8288_v35 = vld [vmem:[#allocation4 + $0x6f0] sm:$0xf0]  ;;  %v8627_v9 = vor.u32 %v10590_v7, %v8624_v8  ;;  %v265_v7 = vperm.slane %v11224_v26, 5 }
  0xfd   :  { %v11240_v32 = vpack.c.bf16 %v1340_v30, %v1340_v30  ;;  %v8291_v38 = vor.u32 %v10506_v59, %v8288_v35  ;;  %v10626_v59 = vld [vmem:[#allocation4 + $0xa84] sm:$0xf]  ;;  %v9392_v20 = vld [vmem:[#allocation4 + $0xf90] sm:$0xf0] }
  0xfe   :  { %4942 = vmatpush.bf16.msrb.mxu1 %v8339_v24  ;;  %v1167_v36 = vpop.f32.mrf.mxu0  ;;  %v8816_v24 = vld [vmem:[#allocation4 + $0xb10] sm:$0xf0]  ;;  %v10686_v35 = vld [vmem:[#allocation4 + $0xc64] sm:$0xf] }
  0xff   :  { %4904 = vmatpush.bf16.msra.mxu2 %v9439_v0  ;;  %4868 = vmatmul.bf16.vlgmr.msra.gmra.mxu3 %v11240_v32  ;;  %v10830_v0 = vld [vmem:[#allocation4 + $0x10e4] sm:$0xf]  ;;  %v9008_v36 = vld [vmem:[#allocation4 + $0xc90] sm:$0xf0] }
 0x100   :  { %4964 = vmatpush.bf16.msra.mxu3 %v9299_v31  ;;  %v9584_v31 = vld [vmem:[#allocation4 + $0x1110] sm:$0xf0] }
 0x101   :  { %v1206_v50 = vpop.f32.mrf.mxu1 }
 0x102   :  { %v1191_v55 = vpop.f32.mrf.mxu3  ;;  %4943 = vmatpush.bf16.msrb.mxu1 %v8291_v38  ;;  %v10818_v38 = vld [vmem:[#allocation4 + $0x1084] sm:$0xf]  ;;  %v8534_v50 = vld [vmem:[#allocation4 + $0x8a8] sm:$0xf] }
 0x103   :  { %v1192_v37 = vadd.f32 %v1191_v55, %v263_v25  ;;  %4905 = vmatpush.bf16.msra.mxu2 %v9391_v41  ;;  %v8819_v25 = vor.u32 %v10638_v23, %v8816_v24  ;;  %v8768_v55 = vld [vmem:[#allocation4 + $0xab0] sm:$0xf0]  ;;  %v10614_v41 = vld [vmem:[#allocation4 + $0xa24] sm:$0xf]  ;;  %v8535_v61 = vor.u32 %v10573_v51, %v8534_v50  ;;  %v10657_v50 = vld [vmem:[#allocation4 + $0xb74] sm:$0xf0] }
 0x104   :  { %4965 = vmatpush.bf16.msra.mxu3 %v9251_v43  ;;  %v8771_v34 = vor.u32 %v10626_v59, %v8768_v55  ;;  %v9011_v43 = vor.u32 %v10686_v35, %v9008_v36  ;;  %v10578_v23 = vld [vmem:[#allocation4 + $0x904] sm:$0xf]  ;;  %v8576_v24 = vld [vmem:[#allocation4 + $0x930] sm:$0xf0]  ;;  %v8390_v59 = vld [vmem:[#allocation4 + $0x788] sm:$0xf] }
 0x105   :  { %v1205_v42 = vadd.f32 %v1204_v27, %v1192_v37  ;;  %v1217_v49 = vpop.f32.mrf.mxu2  ;;  %v10698_v27 = vld [vmem:[#allocation4 + $0xcc4] sm:$0xf]  ;;  %v9587_v37 = vor.u32 %v10830_v0, %v9584_v31  ;;  %v10537_v55 = vld [vmem:[#allocation4 + $0x7b4] sm:$0xf0]  ;;  %v9344_v36 = vld [vmem:[#allocation4 + $0xf30] sm:$0xf0] }
 0x106   :  { %4944 = vmatpush.bf16.msrb.mxu1 %v8243_v48  ;;  %v1230_v4 = vpop.f32.mrf.mxu0  ;;  %v9059_v33 = vor.u32 %v10698_v27, %v9056_v28  ;;  %v9539_v48 = vor.u32 %v10818_v38, %v9536_v40  ;;  %v8439_v28 = vor.u32 %v10549_v16, %v8438_v15  ;;  %v10770_v35 = vld [vmem:[#allocation4 + $0xf04] sm:$0xf]  ;;  %v8918_v38 = vld [vmem:[#allocation4 + $0xba8] sm:$0xf]  ;;  %v10669_v40 = vld [vmem:[#allocation4 + $0xbd4] sm:$0xf0] }
 0x107   :  { %v1218_v53 = vadd.f32 %v1217_v49, %v1205_v42  ;;  %4906 = vmatpush.bf16.msra.mxu2 %v9343_v54  ;;  %v8720_v42 = vld [vmem:[#allocation4 + $0xa50] sm:$0xf0]  ;;  %v10602_v54 = vld [vmem:[#allocation4 + $0x9c4] sm:$0xf]  ;;  %v8919_v47 = vor.u32 %v10669_v40, %v8918_v38  ;;  %v7574_v15 = vld [vmem:[#allocation4 + $0x128] sm:$0xf] }
 0x108   :  { %4966 = vmatpush.bf16.msra.mxu3 %v9203_v58  ;;  %v8723_v44 = vor.u32 %v10614_v41, %v8720_v42  ;;  %v7718_v42 = vld [vmem:[#allocation4 + $0x248] sm:$0xf]  ;;  %v10333_v16 = vld [vmem:[#allocation4 + $0x154] sm:$0xf0] }
 0x109   :  { %v1231_v3 = vadd.f32 %v1230_v4, %v1218_v53  ;;  %v9488_v53 = vld [vmem:[#allocation4 + $0x1050] sm:$0xf0]  ;;  %v10794_v4 = vld [vmem:[#allocation4 + $0xfc4] sm:$0xf]  ;;  %v7575_v26 = vor.u32 %v10333_v16, %v7574_v15  ;;  %v7478_v38 = vld [vmem:[#allocation4 + $0x68] sm:$0xf] }
 0x10a   :  { %v1193_v1 = vpop.f32.mrf.mxu3  ;;  %4945 = vmatpush.bf16.msrb.mxu1 %v8195_v6  ;;  %v9491_v63 = vor.u32 %v10806_v52, %v9488_v53  ;;  %v7670_v53 = vld [vmem:[#allocation4 + $0x1e8] sm:$0xf]  ;;  %v10309_v40 = vld [vmem:[#allocation4 + $0x94] sm:$0xf0] }
 0x10b   :  { %4951 = vmatpush.bf16.msrb.mxu2 %v8915_v60  ;;  %v1341_v13 = vmax.f32 %v1231_v3, 0.0  ;;  %v8675_v60 = vor.u32 %v10602_v54, %v8672_v56  ;;  %v8486_v1 = vld [vmem:[#allocation4 + $0x848] sm:$0xf]  ;;  %v9440_v3 = vld [vmem:[#allocation4 + $0xff0] sm:$0xf0] }
 0x10c   :  { %4967 = vmatpush.bf16.msra.mxu3 %v9155_v10  ;;  %v10357_v54 = vld [vmem:[#allocation4 + $0x214] sm:$0xf0]  ;;  %v8294_v56 = vld [vmem:[#allocation4 + $0x6c8] sm:$0xf] }
 0x10d   :  { %v1219_v18 = vpop.f32.mrf.mxu2  ;;  %v11243_v19 = vpack.c.bf16 %v1341_v13, %v1341_v13  ;;  %v9443_v13 = vor.u32 %v10794_v4, %v9440_v3  ;;  %v10345_v4 = vld [vmem:[#allocation4 + $0x1b4] sm:$0xf0]  ;;  %v9254_v15 = vld [vmem:[#allocation4 + $0xe48] sm:$0xf] }
 0x10e   :  { %v1232_v30 = vpop.f32.mrf.mxu0  ;;  %v10753_v16 = vld [vmem:[#allocation4 + $0xe74] sm:$0xf0] }
 0x10f   :  { %4952 = vmatpush.bf16.msrb.mxu2 %v8867_v11  ;;  %4881 = vmatmul.bf16.vlgmr.msra.gmra.mxu0 %v11243_v19  ;;  %v8487_v11 = vor.u32 %v10561_v2, %v8486_v1  ;;  %v10381_v30 = vld [vmem:[#allocation4 + $0x2d4] sm:$0xf0]  ;;  %v7622_v2 = vld [vmem:[#allocation4 + $0x188] sm:$0xf] }
 0x110   :  { %4977 = vmatpush.bf16.msra.mxu0 %v9683_v12  ;;  %4920 = vmatmul.bf16.vlgmr.msrb.gmra.mxu3 %v11228_v14  ;;  %v10782_v12 = vld [vmem:[#allocation4 + $0xf64] sm:$0xf]  ;;  %v7623_v8 = vor.u32 %v10345_v4, %v7622_v2 }
 0x111   :  { %4968 = vmatpush.bf16.msra.mxu3 %v9107_v22  ;;  %v9395_v0 = vor.u32 %v10782_v12, %v9392_v20  ;;  %v8198_v12 = vld [vmem:[#allocation4 + $0x608] sm:$0xf] }
 0x113   :  { %4953 = vmatpush.bf16.msrb.mxu2 %v8819_v25  ;;  %v8579_v25 = vor.u32 %v10578_v23, %v8576_v24  ;;  %v10375_v23 = vld [vmem:[#allocation4 + $0x2ac] sm:$0xf]  ;;  %v7768_v24 = vld [vmem:[#allocation4 + $0x2d8] sm:$0xf0] }
 0x114   :  { %4978 = vmatpush.bf16.msra.mxu0 %v9635_v29  ;;  %v7766_v29 = vld [vmem:[#allocation4 + $0x2a8] sm:$0xf] }
 0x115   :  { %v1282_v39 = vpop.f32.mrf.mxu2  ;;  %4969 = vmatpush.bf16.msra.mxu3 %v9059_v33 }
 0x117   :  { %4954 = vmatpush.bf16.msrb.mxu2 %v8771_v34 }
 0x118   :  { %4979 = vmatpush.bf16.msra.mxu0 %v9587_v37  ;;  %v7767_v37 = vor.u32 %v10381_v30, %v7766_v29  ;;  %v7526_v29 = vld [vmem:[#allocation4 + $0xc8] sm:$0xf]  ;;  %v10321_v30 = vld [vmem:[#allocation4 + $0xf4] sm:$0xf0] }
 0x119   :  { %4970 = vmatpush.bf16.msra.mxu3 %v9011_v43  ;;  %v1269_v58 = vpop.f32.mrf.mxu1  ;;  %v10369_v43 = vld [vmem:[#allocation4 + $0x274] sm:$0xf0] }
 0x11a   :  { %v1256_v49 = vpop.f32.mrf.mxu0 }
 0x11b   :  { %4955 = vmatpush.bf16.msrb.mxu2 %v8723_v44  ;;  %v9347_v44 = vor.u32 %v10770_v35, %v9344_v36  ;;  %v7527_v36 = vor.u32 %v10321_v30, %v7526_v29  ;;  %v9206_v29 = vld [vmem:[#allocation4 + $0xde8] sm:$0xf]  ;;  %v10741_v30 = vld [vmem:[#allocation4 + $0xe14] sm:$0xf0] }
 0x11c   :  { %4980 = vmatpush.bf16.msra.mxu0 %v9539_v48  ;;  %v7719_v48 = vor.u32 %v10369_v43, %v7718_v42 }
 0x11d   :  { %v1284_v5 = vpop.f32.mrf.mxu2  ;;  %4971 = vmatpush.bf16.msra.mxu3 %v8963_v57  ;;  %v10513_v57 = vld [vmem:[#allocation4 + $0x6f4] sm:$0xf0] }
 0x11e   :  { %v8295_v1 = vor.u32 %v10513_v57, %v8294_v56  ;;  %v8246_v5 = vld [vmem:[#allocation4 + $0x668] sm:$0xf]  ;;  %v10297_v56 = vld [vmem:[#allocation4 + $0x34] sm:$0xf0] }
 0x11f   :  { %4956 = vmatpush.bf16.msrb.mxu2 %v8675_v60  ;;  %4933 = vmatmul.bf16.vlgmr.msrb.gmra.mxu0 %v11232_v21 }
 0x120   :  { %4981 = vmatpush.bf16.msra.mxu0 %v9491_v63  ;;  %v10645_v63 = vld [vmem:[#allocation4 + $0xb14] sm:$0xf0] }
 0x121   :  { %5016 = vmatpush.bf16.msrb.mxu3 %v8535_v61  ;;  %v1271_v22 = vpop.f32.mrf.mxu1  ;;  %v7671_v61 = vor.u32 %v10357_v54, %v7670_v53  ;;  %v10597_v53 = vld [vmem:[#allocation4 + $0x994] sm:$0xf0]  ;;  %v7430_v54 = vld [vmem:[#allocation4 + $0x8] sm:$0xf] }
 0x122   :  { %v1243_v62 = vpop.f32.mrf.mxu3  ;;  %v1258_v17 = vpop.f32.mrf.mxu0 }
 0x123   :  { %v1244_v6 = vadd.f32 %v1243_v62, %v264_v45  ;;  %4957 = vmatpush.bf16.msrb.mxu2 %v8627_v9  ;;  %v8342_v45 = vld [vmem:[#allocation4 + $0x728] sm:$0xf]  ;;  %v10489_v17 = vld [vmem:[#allocation4 + $0x634] sm:$0xf0] }
 0x124   :  { %4982 = vmatpush.bf16.msra.mxu0 %v9443_v13  ;;  %v8343_v52 = vor.u32 %v10525_v46, %v8342_v45  ;;  %v8822_v62 = vld [vmem:[#allocation4 + $0xae8] sm:$0xf]  ;;  %v10351_v45 = vld [vmem:[#allocation4 + $0x1ec] sm:$0xf]  ;;  %v7672_v46 = vld [vmem:[#allocation4 + $0x218] sm:$0xf0] }
 0x125   :  { %v1257_v10 = vadd.f32 %v1256_v49, %v1244_v6  ;;  %5017 = vmatpush.bf16.msrb.mxu3 %v8487_v11  ;;  %v8870_v49 = vld [vmem:[#allocation4 + $0xb48] sm:$0xf]  ;;  %v10501_v6 = vld [vmem:[#allocation4 + $0x694] sm:$0xf0]  ;;  %v8823_v3 = vor.u32 %v10645_v63, %v8822_v62 }
 0x126   :  { %v8871_v60 = vor.u32 %v10657_v50, %v8870_v49  ;;  %v8774_v9 = vld [vmem:[#allocation4 + $0xa88] sm:$0xf]  ;;  %v8247_v13 = vor.u32 %v10501_v6, %v8246_v5  ;;  %v10477_v50 = vld [vmem:[#allocation4 + $0x5d4] sm:$0xf0]  ;;  %v7431_v5 = vor.u32 %v10297_v56, %v7430_v54 }
 0x127   :  { %v1270_v18 = vadd.f32 %v1269_v58, %v1257_v10  ;;  %4958 = vmatpush.bf16.msrb.mxu2 %v8579_v25  ;;  %v10633_v10 = vld [vmem:[#allocation4 + $0xab4] sm:$0xf0]  ;;  %v8726_v25 = vld [vmem:[#allocation4 + $0xa28] sm:$0xf] }
 0x128   :  { %4983 = vmatpush.bf16.msra.mxu0 %v9395_v0  ;;  %v8775_v20 = vor.u32 %v10633_v10, %v8774_v9  ;;  %v7771_v0 = vor.u32 %v10375_v23, %v7768_v24  ;;  %v8150_v49 = vld [vmem:[#allocation4 + $0x5a8] sm:$0xf]  ;;  %v10585_v9 = vld [vmem:[#allocation4 + $0x934] sm:$0xf0]  ;;  %v10471_v10 = vld [vmem:[#allocation4 + $0x5ac] sm:$0xf] }
 0x129   :  { %v1283_v27 = vadd.f32 %v1282_v39, %v1270_v18  ;;  %v11249_v33 = vpop.f32.mrf.mxu2  ;;  %5018 = vmatpush.bf16.msrb.mxu3 %v8439_v28  ;;  %v8391_v39 = vor.u32 %v10537_v55, %v8390_v59  ;;  %v11255_v51 = vpop.f32.mrf.mxu1  ;;  %v8199_v28 = vor.u32 %v10489_v17, %v8198_v12  ;;  %v10363_v55 = vld [vmem:[#allocation4 + $0x24c] sm:$0xf]  ;;  %v8151_v63 = vor.u32 %v10477_v50, %v8150_v49  ;;  %v8102_v6 = vld [vmem:[#allocation4 + $0x548] sm:$0xf]  ;;  %v10453_v24 = vld [vmem:[#allocation4 + $0x514] sm:$0xf0] }
 0x12a   :  { %v1245_v31 = vpop.f32.mrf.mxu3  ;;  %v1296_v22 = vadd.f32 %v11249_v33, %v265_v7  ;;  %v8678_v33 = vld [vmem:[#allocation4 + $0x9c8] sm:$0xf]  ;;  %v10327_v17 = vld [vmem:[#allocation4 + $0x12c] sm:$0xf]  ;;  %v10717_v56 = vld [vmem:[#allocation4 + $0xd54] sm:$0xf0] }
 0x12b   :  { %v1342_v34 = vmax.f32 %v1283_v27, 0.0  ;;  %v10621_v27 = vld [vmem:[#allocation4 + $0xa54] sm:$0xf0]  ;;  %v8054_v23 = vld [vmem:[#allocation4 + $0x4e8] sm:$0xf] }
 0x12c   :  { %4984 = vmatpush.bf16.msra.mxu0 %v9347_v44  ;;  %v8727_v59 = vor.u32 %v10621_v27, %v8726_v25  ;;  %v10459_v25 = vld [vmem:[#allocation4 + $0x54c] sm:$0xf]  ;;  %v9110_v54 = vld [vmem:[#allocation4 + $0xd28] sm:$0xf] }
 0x12d   :  { %v11251_v41 = vpack.c.bf16 %v1342_v34, %v1342_v34  ;;  %5019 = vmatpush.bf16.msrb.mxu3 %v8391_v39  ;;  %v7720_v34 = vld [vmem:[#allocation4 + $0x278] sm:$0xf0]  ;;  %v10435_v50 = vld [vmem:[#allocation4 + $0x48c] sm:$0xf] }
 0x12e   :  { %v7723_v42 = vor.u32 %v10363_v55, %v7720_v34  ;;  %v8006_v34 = vld [vmem:[#allocation4 + $0x488] sm:$0xf] }
 0x12f   :  { %4894 = vmatmul.bf16.vlgmr.msra.gmra.mxu1 %v11251_v41  ;;  %4972 = vmatmul.bf16.vlgmr.msra.gmra.mxu3 %v11251_v41 }
 0x130   :  { %4990 = vmatpush.bf16.msra.mxu1 %v7767_v37  ;;  %5029 = vmatpush.bf16.msrb.mxu0 %v8919_v47  ;;  %v10609_v37 = vld [vmem:[#allocation4 + $0x9f4] sm:$0xf0] }
 0x131   :  { %v1297_v58 = vpop.f32.mrf.mxu2  ;;  %5020 = vmatpush.bf16.msrb.mxu3 %v8343_v52  ;;  %v1336_v11 = vpop.f32.mrf.mxu1  ;;  %v8679_v44 = vor.u32 %v10609_v37, %v8678_v33  ;;  %v8630_v52 = vld [vmem:[#allocation4 + $0x968] sm:$0xf]  ;;  %v9207_v33 = vor.u32 %v10741_v30, %v9206_v29  ;;  %v10447_v37 = vld [vmem:[#allocation4 + $0x4ec] sm:$0xf]  ;;  %v9208_v30 = vld [vmem:[#allocation4 + $0xe18] sm:$0xf0] }
 0x132   :  { %v7675_v58 = vor.u32 %v10351_v45, %v7672_v46  ;;  %v8631_v4 = vor.u32 %v10597_v53, %v8630_v52  ;;  %v7480_v45 = vld [vmem:[#allocation4 + $0x98] sm:$0xf0]  ;;  %v7958_v46 = vld [vmem:[#allocation4 + $0x428] sm:$0xf]  ;;  %v10735_v29 = vld [vmem:[#allocation4 + $0xdec] sm:$0xf] }
 0x133   :  { %v8008_v53 = vld [vmem:[#allocation4 + $0x4b8] sm:$0xf0] }
 0x134   :  { %4991 = vmatpush.bf16.msra.mxu1 %v7719_v48  ;;  %5030 = vmatpush.bf16.msrb.mxu0 %v8871_v60  ;;  %v7479_v48 = vor.u32 %v10309_v40, %v7478_v38  ;;  %v9302_v60 = vld [vmem:[#allocation4 + $0xea8] sm:$0xf]  ;;  %v8056_v40 = vld [vmem:[#allocation4 + $0x518] sm:$0xf0] }
 0x135   :  { %5021 = vmatpush.bf16.msrb.mxu3 %v8295_v1  ;;  %v10339_v1 = vld [vmem:[#allocation4 + $0x18c] sm:$0xf] }
 0x138   :  { %4992 = vmatpush.bf16.msra.mxu1 %v7671_v61  ;;  %5031 = vmatpush.bf16.msrb.mxu0 %v8823_v3  ;;  %v10765_v61 = vld [vmem:[#allocation4 + $0xed4] sm:$0xf0] }
 0x139   :  { %5022 = vmatpush.bf16.msrb.mxu3 %v8247_v13  ;;  %v10465_v3 = vld [vmem:[#allocation4 + $0x574] sm:$0xf0]  ;;  %v9303_v7 = vor.u32 %v10765_v61, %v9302_v60  ;;  %v8152_v13 = vld [vmem:[#allocation4 + $0x5d8] sm:$0xf0]  ;;  %v7910_v61 = vld [vmem:[#allocation4 + $0x3c8] sm:$0xf] }
 0x13a   :  { %v1321_v18 = vpop.f32.mrf.mxu0  ;;  %v8103_v12 = vor.u32 %v10465_v3, %v8102_v6  ;;  %v7432_v60 = vld [vmem:[#allocation4 + $0x38] sm:$0xf0]  ;;  %v10423_v6 = vld [vmem:[#allocation4 + $0x42c] sm:$0xf] }
 0x13c   :  { %4993 = vmatpush.bf16.msra.mxu1 %v7623_v8  ;;  %5032 = vmatpush.bf16.msrb.mxu0 %v8775_v20  ;;  %v8582_v8 = vld [vmem:[#allocation4 + $0x908] sm:$0xf] }
 0x13d   :  { %5023 = vmatpush.bf16.msrb.mxu3 %v8199_v28  ;;  %v8583_v20 = vor.u32 %v10585_v9, %v8582_v8  ;;  %v8104_v28 = vld [vmem:[#allocation4 + $0x578] sm:$0xf0]  ;;  %v9062_v8 = vld [vmem:[#allocation4 + $0xcc8] sm:$0xf]  ;;  %v10705_v9 = vld [vmem:[#allocation4 + $0xcf4] sm:$0xf0] }
 0x13f   :  { %4946 = vmatmul.bf16.vlgmr.msrb.gmra.mxu1 %v11240_v32 }
 0x140   :  { %4994 = vmatpush.bf16.msra.mxu1 %v7575_v26  ;;  %5033 = vmatpush.bf16.msrb.mxu0 %v8727_v59  ;;  %v9255_v26 = vor.u32 %v10753_v16, %v9254_v15  ;;  %v7528_v59 = vld [vmem:[#allocation4 + $0xf8] sm:$0xf0]  ;;  %v10405_v15 = vld [vmem:[#allocation4 + $0x394] sm:$0xf0]  ;;  %v10747_v16 = vld [vmem:[#allocation4 + $0xe4c] sm:$0xf] }
 0x141   :  { %5068 = vmatpush.bf16.msra.mxu3 %v7771_v0  ;;  %v8055_v0 = vor.u32 %v10453_v24, %v8054_v23  ;;  %v7912_v23 = vld [vmem:[#allocation4 + $0x3f8] sm:$0xf0]  ;;  %v9014_v24 = vld [vmem:[#allocation4 + $0xc68] sm:$0xf] }
 0x142   :  { %v1308_v31 = vpop.f32.mrf.mxu3  ;;  %v1323_v43 = vpop.f32.mrf.mxu0  ;;  %5024 = vmatmul.bf16.vlgmr.msrb.gmra.mxu3 %v11240_v32 }
 0x143   :  { %v1309_v35 = vadd.f32 %v1308_v31, %v1296_v22  ;;  %v8155_v22 = vor.u32 %v10471_v10, %v8152_v13  ;;  %v10315_v31 = vld [vmem:[#allocation4 + $0xcc] sm:$0xf]  ;;  %v11267_v55 = vpop.f32.mrf.mxu1  ;;  %v7862_v13 = vld [vmem:[#allocation4 + $0x368] sm:$0xf] }
 0x144   :  { %4995 = vmatpush.bf16.msra.mxu1 %v7527_v36  ;;  %5034 = vmatpush.bf16.msrb.mxu0 %v8679_v44  ;;  %v8107_v36 = vor.u32 %v10459_v25, %v8104_v28  ;;  %v7531_v38 = vor.u32 %v10315_v31, %v7528_v59  ;;  %v10303_v44 = vld [vmem:[#allocation4 + $0x6c] sm:$0xf]  ;;  %v10393_v28 = vld [vmem:[#allocation4 + $0x334] sm:$0xf0]  ;;  %v9686_v59 = vld [vmem:[#allocation4 + $0x11a8] sm:$0xf] }
 0x145   :  { %v1322_v39 = vadd.f32 %v1321_v18, %v1309_v35  ;;  %5069 = vmatpush.bf16.msra.mxu3 %v7723_v42  ;;  %v7576_v18 = vld [vmem:[#allocation4 + $0x158] sm:$0xf0]  ;;  %v10441_v35 = vld [vmem:[#allocation4 + $0x4b4] sm:$0xf0]  ;;  %v7483_v52 = vor.u32 %v10303_v44, %v7480_v45  ;;  %v10723_v44 = vld [vmem:[#allocation4 + $0xd8c] sm:$0xf] }
 0x146   :  { %v7579_v27 = vor.u32 %v10327_v17, %v7576_v18  ;;  %v10729_v42 = vld [vmem:[#allocation4 + $0xdb4] sm:$0xf0]  ;;  %v8007_v43 = vor.u32 %v10441_v35, %v8006_v34  ;;  %v9063_v18 = vor.u32 %v10705_v9, %v9062_v8  ;;  %v10399_v35 = vld [vmem:[#allocation4 + $0x36c] sm:$0xf]  ;;  %v9160_v45 = vld [vmem:[#allocation4 + $0xdb8] sm:$0xf0] }
 0x147   :  { %v1335_v47 = vadd.f32 %v11255_v51, %v1322_v39  ;;  %v7624_v51 = vld [vmem:[#allocation4 + $0x1b8] sm:$0xf0]  ;;  %v9158_v39 = vld [vmem:[#allocation4 + $0xd88] sm:$0xf]  ;;  %v10861_v34 = vld [vmem:[#allocation4 + $0x11d4] sm:$0xf0] }
 0x148   :  { %4996 = vmatpush.bf16.msra.mxu1 %v7479_v48  ;;  %v7627_v11 = vor.u32 %v10339_v1, %v7624_v51  ;;  %5035 = vmatpush.bf16.msrb.mxu0 %v8631_v4  ;;  %v8059_v48 = vor.u32 %v10447_v37, %v8056_v40  ;;  %v9159_v49 = vor.u32 %v10729_v42, %v9158_v39  ;;  %v10759_v1 = vld [vmem:[#allocation4 + $0xeac] sm:$0xf]  ;;  %v9304_v51 = vld [vmem:[#allocation4 + $0xed8] sm:$0xf0]  ;;  %v10681_v37 = vld [vmem:[#allocation4 + $0xc34] sm:$0xf0] }
 0x149   :  { %v1343_v57 = vmax.f32 %v1335_v47, 0.0  ;;  %5070 = vmatpush.bf16.msra.mxu3 %v7675_v58  ;;  %v10429_v47 = vld [vmem:[#allocation4 + $0x454] sm:$0xf0]  ;;  %v10291_v58 = vld [vmem:[#allocation4 + $0xc] sm:$0xf]  ;;  %v8011_v4 = vor.u32 %v10435_v50, %v8008_v53  ;;  %v9211_v40 = vor.u32 %v10735_v29, %v9208_v30 }
 0x14a   :  { %v1310_v62 = vpop.f32.mrf.mxu3  ;;  %v7435_v3 = vor.u32 %v10291_v58, %v7432_v60  ;;  %v10567_v39 = vld [vmem:[#allocation4 + $0x8ac] sm:$0xf]  ;;  %v8536_v42 = vld [vmem:[#allocation4 + $0x8d8] sm:$0xf0]  ;;  %v10849_v50 = vld [vmem:[#allocation4 + $0x1174] sm:$0xf0] }
 0x14b   :  { %v11262_v2 = vpack.c.bf16 %v1343_v57, %v1343_v57  ;;  %v7959_v57 = vor.u32 %v10429_v47, %v7958_v46  ;;  %v4845_v62 = vpop.f32.mrf.mxu1  ;;  %v11272_v46 = vld [vmem:[#allocation9 + $0x6] sm:$0xff]  ;;  %v9688_v58 = vld [vmem:[#allocation4 + $0x11d8] sm:$0xf0] }
 0x14c   :  { %4997 = vmatpush.bf16.msra.mxu1 %v7431_v5  ;;  %5036 = vmatpush.bf16.msrb.mxu0 %v8583_v20  ;;  %v9111_v5 = vor.u32 %v10717_v56, %v9110_v54  ;;  %v10411_v20 = vld [vmem:[#allocation4 + $0x3cc] sm:$0xf]  ;;  %v7816_v54 = vld [vmem:[#allocation4 + $0x338] sm:$0xf0] }
 0x14d   :  { %4907 = vmatmul.bf16.vlgmr.msra.gmra.mxu2 %v11262_v2  ;;  %4985 = vmatmul.bf16.vlgmr.msra.gmra.mxu0 %v11262_v2  ;;  %v10387_v53 = vld [vmem:[#allocation4 + $0x30c] sm:$0xf]  ;;  %v8392_v29 = vld [vmem:[#allocation4 + $0x7b8] sm:$0xf0] }
 0x14e   :  { %5003 = vmatpush.bf16.msra.mxu2 %v8151_v63  ;;  %5071 = vmatpush.bf16.msra.mxu3 %v7627_v11  ;;  %v10417_v63 = vld [vmem:[#allocation4 + $0x3f4] sm:$0xf0]  ;;  %v9307_v11 = vor.u32 %v10759_v1, %v9304_v51  ;;  %v10855_v56 = vld [vmem:[#allocation4 + $0x11ac] sm:$0xf]  ;;  %v9112_v1 = vld [vmem:[#allocation4 + $0xd58] sm:$0xf0]  ;;  %v7819_v51 = vor.u32 %v10387_v53, %v7816_v54 }
 0x14f   :  { %4998 = vmatmul.bf16.vlgmr.msra.gmra.mxu1 %v11228_v14  ;;  %v7911_v10 = vor.u32 %v10417_v63, %v7910_v61  ;;  %v10555_v60 = vld [vmem:[#allocation4 + $0x84c] sm:$0xf]  ;;  %v8488_v61 = vld [vmem:[#allocation4 + $0x878] sm:$0xf0] }
 0x150   :  { %5042 = vmatpush.bf16.msrb.mxu1 %v9303_v7  ;;  %5081 = vmatpush.bf16.msra.mxu0 %v8155_v22  ;;  %v7960_v7 = vld [vmem:[#allocation4 + $0x458] sm:$0xf0]  ;;  %v10693_v22 = vld [vmem:[#allocation4 + $0xc94] sm:$0xf0]  ;;  %v10711_v63 = vld [vmem:[#allocation4 + $0xd2c] sm:$0xf] }
 0x151   :  { %v7963_v17 = vor.u32 %v10423_v6, %v7960_v7  ;;  %v9015_v31 = vor.u32 %v10693_v22, %v9014_v24  ;;  %v1930_v6 = vperm.slane %v11272_v46, 0  ;;  %v8491_v7 = vor.u32 %v10555_v60, %v8488_v61  ;;  %v10843_v8 = vld [vmem:[#allocation4 + $0x114c] sm:$0xf]  ;;  %v8296_v60 = vld [vmem:[#allocation4 + $0x6f8] sm:$0xf0] }
 0x152   :  { %5004 = vmatpush.bf16.msra.mxu2 %v8103_v12  ;;  %5072 = vmatpush.bf16.msra.mxu3 %v7579_v27  ;;  %v9256_v12 = vld [vmem:[#allocation4 + $0xe78] sm:$0xf0]  ;;  %v7814_v27 = vld [vmem:[#allocation4 + $0x308] sm:$0xf]  ;;  %v9115_v9 = vor.u32 %v10711_v63, %v9112_v1  ;;  %v10831_v22 = vld [vmem:[#allocation4 + $0x10ec] sm:$0xf] }
 0x153   :  { %v9259_v25 = vor.u32 %v10747_v16, %v9256_v12  ;;  %v10699_v16 = vld [vmem:[#allocation4 + $0xccc] sm:$0xf]  ;;  %v9064_v12 = vld [vmem:[#allocation4 + $0xcf8] sm:$0xf0]  ;;  %v9398_v63 = vld [vmem:[#allocation4 + $0xf68] sm:$0xf] }
 0x154   :  { %5043 = vmatpush.bf16.msrb.mxu1 %v9255_v26  ;;  %5082 = vmatpush.bf16.msra.mxu0 %v8107_v36  ;;  %v7863_v26 = vor.u32 %v10405_v15, %v7862_v13  ;;  %v7864_v36 = vld [vmem:[#allocation4 + $0x398] sm:$0xf0]  ;;  %v10807_v53 = vld [vmem:[#allocation4 + $0x102c] sm:$0xf]  ;;  %v10789_v1 = vld [vmem:[#allocation4 + $0xf94] sm:$0xf0] }
 0x155   :  { %v7867_v47 = vor.u32 %v10399_v35, %v7864_v36  ;;  %v8440_v13 = vld [vmem:[#allocation4 + $0x818] sm:$0xf0] }
 0x156   :  { %5005 = vmatpush.bf16.msra.mxu2 %v8055_v0  ;;  %5073 = vmatpush.bf16.msra.mxu3 %v7531_v38  ;;  %v7915_v0 = vor.u32 %v10411_v20, %v7912_v23  ;;  %v7815_v38 = vor.u32 %v10393_v28, %v7814_v27  ;;  %v4844_v20 = vadd.f32 %v11267_v55, %v1930_v6  ;;  %v9592_v27 = vld [vmem:[#allocation4 + $0x1118] sm:$0xf0]  ;;  %v10531_v28 = vld [vmem:[#allocation4 + $0x78c] sm:$0xf]  ;;  %v9494_v55 = vld [vmem:[#allocation4 + $0x1028] sm:$0xf] }
 0x157   :  { %v9595_v35 = vor.u32 %v10831_v22, %v9592_v27  ;;  %v8395_v36 = vor.u32 %v10531_v28, %v8392_v29  ;;  %v9400_v22 = vld [vmem:[#allocation4 + $0xf98] sm:$0xf0]  ;;  %v7774_v29 = vld [vmem:[#allocation4 + $0x2b0] sm:$0xf] }
 0x158   :  { %5044 = vmatpush.bf16.msrb.mxu1 %v9207_v33  ;;  %5083 = vmatpush.bf16.msra.mxu0 %v8059_v48  ;;  %v8966_v33 = vld [vmem:[#allocation4 + $0xc08] sm:$0xf] }
 0x159   :  { %v8967_v48 = vor.u32 %v10681_v37, %v8966_v33  ;;  %v10819_v33 = vld [vmem:[#allocation4 + $0x108c] sm:$0xf] }
 0x15a   :  { %5006 = vmatpush.bf16.msra.mxu2 %v8007_v43  ;;  %5074 = vmatpush.bf16.msra.mxu3 %v7483_v52  ;;  %v9687_v43 = vor.u32 %v10861_v34, %v9686_v59  ;;  %v8539_v52 = vor.u32 %v10567_v39, %v8536_v42  ;;  %v9016_v59 = vld [vmem:[#allocation4 + $0xc98] sm:$0xf0]  ;;  %v10813_v34 = vld [vmem:[#allocation4 + $0x1054] sm:$0xf0] }
 0x15b   :  { %v8344_v39 = vld [vmem:[#allocation4 + $0x758] sm:$0xf0]  ;;  %v9495_v42 = vor.u32 %v10813_v34, %v9494_v55  ;;  %v10538_v55 = vld [vmem:[#allocation4 + $0x7bc] sm:$0xf0] }
 0x15c   :  { %5045 = vmatpush.bf16.msrb.mxu1 %v9159_v49  ;;  %5084 = vmatpush.bf16.msra.mxu0 %v8011_v4  ;;  %v9638_v49 = vld [vmem:[#allocation4 + $0x1148] sm:$0xf] }
 0x15d   :  { %4959 = vmatmul.bf16.vlgmr.msrb.gmra.mxu2 %v11243_v19  ;;  %5037 = vmatmul.bf16.vlgmr.msrb.gmra.mxu0 %v11243_v19  ;;  %v9639_v62 = vor.u32 %v10849_v50, %v9638_v49  ;;  %v9590_v4 = vld [vmem:[#allocation4 + $0x10e8] sm:$0xf]  ;;  %v10574_v49 = vld [vmem:[#allocation4 + $0x8dc] sm:$0xf0] }
 0x15e   :  { %5007 = vmatpush.bf16.msra.mxu2 %v7959_v57  ;;  %5075 = vmatpush.bf16.msra.mxu3 %v7435_v3  ;;  %v9163_v57 = vor.u32 %v10723_v44, %v9160_v45  ;;  %v9691_v3 = vor.u32 %v10855_v56, %v9688_v58  ;;  %v8968_v44 = vld [vmem:[#allocation4 + $0xc38] sm:$0xf0]  ;;  %v9446_v45 = vld [vmem:[#allocation4 + $0xfc8] sm:$0xf]  ;;  %v10507_v58 = vld [vmem:[#allocation4 + $0x6cc] sm:$0xf] }
 0x15f   :  { %v8299_v6 = vor.u32 %v10507_v58, %v8296_v60  ;;  %v10658_v60 = vld [vmem:[#allocation4 + $0xb7c] sm:$0xf0] }
 0x160   :  { %5046 = vmatpush.bf16.msrb.mxu1 %v9111_v5  ;;  %5085 = vmatpush.bf16.msra.mxu0 %v7963_v17  ;;  %v10837_v5 = vld [vmem:[#allocation4 + $0x1114] sm:$0xf0]  ;;  %v9542_v17 = vld [vmem:[#allocation4 + $0x1088] sm:$0xf] }
 0x161   :  { %5076 = vmatmul.bf16.vlgmr.msra.gmra.mxu3 %v11228_v14  ;;  %v9591_v15 = vor.u32 %v10837_v5, %v9590_v4  ;;  %v10562_v4 = vld [vmem:[#allocation4 + $0x87c] sm:$0xf0] }
 0x162   :  { %5008 = vmatpush.bf16.msra.mxu2 %v7911_v10  ;;  %5120 = vmatpush.bf16.msrb.mxu3 %v9307_v11  ;;  %v9640_v10 = vld [vmem:[#allocation4 + $0x1178] sm:$0xf0]  ;;  %v10543_v11 = vld [vmem:[#allocation4 + $0x7ec] sm:$0xf] }
 0x163   :  { %v9643_v23 = vor.u32 %v10843_v8, %v9640_v10  ;;  %v8443_v24 = vor.u32 %v10543_v11, %v8440_v13  ;;  %v10495_v8 = vld [vmem:[#allocation4 + $0x66c] sm:$0xf]  ;;  %v9399_v10 = vor.u32 %v10789_v1, %v9398_v63  ;;  %v9350_v13 = vld [vmem:[#allocation4 + $0xf08] sm:$0xf]  ;;  %v8302_v1 = vld [vmem:[#allocation4 + $0x6d0] sm:$0xf] }
 0x164   :  { %5047 = vmatpush.bf16.msrb.mxu1 %v9063_v18  ;;  %5086 = vmatpush.bf16.msra.mxu0 %v7915_v0  ;;  %v10825_v18 = vld [vmem:[#allocation4 + $0x10b4] sm:$0xf0] }
 0x165   :  { %v9543_v0 = vor.u32 %v10825_v18, %v9542_v17 }
 0x166   :  { %5009 = vmatpush.bf16.msra.mxu2 %v7863_v26  ;;  %5121 = vmatpush.bf16.msrb.mxu3 %v9259_v25  ;;  %v4856_v26 = vpop.f32.mrf.mxu2  ;;  %v9067_v25 = vor.u32 %v10699_v16, %v9064_v12  ;;  %v8446_v16 = vld [vmem:[#allocation4 + $0x7f0] sm:$0xf]  ;;  %v10550_v12 = vld [vmem:[#allocation4 + $0x81c] sm:$0xf0] }
 0x167   :  { %v11279_v30 = vadd.f32 %v4856_v26, %v4844_v20  ;;  %v10663_v20 = vld [vmem:[#allocation4 + $0xbac] sm:$0xf]  ;;  %v8447_v28 = vor.u32 %v10550_v12, %v8446_v16  ;;  %v8254_v12 = vld [vmem:[#allocation4 + $0x670] sm:$0xf] }
 0x168   :  { %5048 = vmatpush.bf16.msrb.mxu1 %v9015_v31  ;;  %5087 = vmatpush.bf16.msra.mxu0 %v7867_v47  ;;  %v10687_v31 = vld [vmem:[#allocation4 + $0xc6c] sm:$0xf]  ;;  %v10801_v47 = vld [vmem:[#allocation4 + $0xff4] sm:$0xf0] }
 0x169   :  { %v9019_v37 = vor.u32 %v10687_v31, %v9016_v59  ;;  %v9447_v61 = vor.u32 %v10801_v47, %v9446_v45  ;;  %v10483_v26 = vld [vmem:[#allocation4 + $0x60c] sm:$0xf]  ;;  %v8398_v59 = vld [vmem:[#allocation4 + $0x790] sm:$0xf]  ;;  %v10370_v45 = vld [vmem:[#allocation4 + $0x27c] sm:$0xf0] }
 0x16a   :  { %5010 = vmatpush.bf16.msra.mxu2 %v7815_v38  ;;  %5122 = vmatpush.bf16.msrb.mxu3 %v9211_v40  ;;  %v9544_v38 = vld [vmem:[#allocation4 + $0x10b8] sm:$0xf0]  ;;  %v10519_v40 = vld [vmem:[#allocation4 + $0x72c] sm:$0xf] }
 0x16b   :  { %v9547_v50 = vor.u32 %v10819_v33, %v9544_v38  ;;  %v8872_v33 = vld [vmem:[#allocation4 + $0xb78] sm:$0xf0]  ;;  %v10771_v38 = vld [vmem:[#allocation4 + $0xf0c] sm:$0xf] }
 0x16c   :  { %5049 = vmatpush.bf16.msrb.mxu1 %v8967_v48  ;;  %5088 = vmatpush.bf16.msra.mxu0 %v7819_v51  ;;  %v8542_v48 = vld [vmem:[#allocation4 + $0x8b0] sm:$0xf] }
 0x16d   :  { %5011 = vmatmul.bf16.vlgmr.msra.gmra.mxu2 %v11232_v21  ;;  %v8494_v51 = vld [vmem:[#allocation4 + $0x850] sm:$0xf] }
 0x16e   :  { %5055 = vmatpush.bf16.msrb.mxu2 %v9687_v43  ;;  %5123 = vmatpush.bf16.msrb.mxu3 %v9163_v57  ;;  %v10675_v43 = vld [vmem:[#allocation4 + $0xc0c] sm:$0xf]  ;;  %v4858_v54 = vpop.f32.mrf.mxu2  ;;  %v9496_v57 = vld [vmem:[#allocation4 + $0x1058] sm:$0xf0]  ;;  %v8495_v11 = vor.u32 %v10562_v4, %v8494_v51  ;;  %v10514_v51 = vld [vmem:[#allocation4 + $0x6fc] sm:$0xf0] }
 0x16f   :  { %5050 = vmatmul.bf16.vlgmr.msrb.gmra.mxu1 %v11251_v41  ;;  %5089 = vmatmul.bf16.vlgmr.msra.gmra.mxu0 %v11232_v21  ;;  %v8971_v56 = vor.u32 %v10675_v43, %v8968_v44  ;;  %v9499_v5 = vor.u32 %v10807_v53, %v9496_v57  ;;  %v10670_v43 = vld [vmem:[#allocation4 + $0xbdc] sm:$0xf0]  ;;  %v7726_v44 = vld [vmem:[#allocation4 + $0x250] sm:$0xf]  ;;  %v8824_v53 = vld [vmem:[#allocation4 + $0xb18] sm:$0xf0] }
 0x170   :  { %5094 = vmatpush.bf16.msra.mxu1 %v8539_v52  ;;  %5133 = vmatpush.bf16.msrb.mxu0 %v9691_v3  ;;  %v8347_v52 = vor.u32 %v10519_v40, %v8344_v39  ;;  %v10795_v3 = vld [vmem:[#allocation4 + $0xfcc] sm:$0xf]  ;;  %v9352_v40 = vld [vmem:[#allocation4 + $0xf38] sm:$0xf0]  ;;  %v8926_v39 = vld [vmem:[#allocation4 + $0xbb0] sm:$0xf] }
 0x171   :  { %v8927_v54 = vor.u32 %v10670_v43, %v8926_v39  ;;  %v8878_v57 = vld [vmem:[#allocation4 + $0xb50] sm:$0xf] }
 0x172   :  { %5056 = vmatpush.bf16.msrb.mxu2 %v9639_v62  ;;  %5124 = vmatpush.bf16.msrb.mxu3 %v9115_v9  ;;  %v8543_v62 = vor.u32 %v10574_v49, %v8542_v48  ;;  %v8248_v9 = vld [vmem:[#allocation4 + $0x698] sm:$0xf0]  ;;  %v8350_v48 = vld [vmem:[#allocation4 + $0x730] sm:$0xf]  ;;  %v10526_v49 = vld [vmem:[#allocation4 + $0x75c] sm:$0xf0] }
 0x173   :  { %v8251_v18 = vor.u32 %v10495_v8, %v8248_v9  ;;  %v8351_v58 = vor.u32 %v10526_v49, %v8350_v48  ;;  %v8830_v9 = vld [vmem:[#allocation4 + $0xaf0] sm:$0xf]  ;;  %v10591_v48 = vld [vmem:[#allocation4 + $0x96c] sm:$0xf]  ;;  %v8632_v49 = vld [vmem:[#allocation4 + $0x998] sm:$0xf0] }
 0x174   :  { %5095 = vmatpush.bf16.msra.mxu1 %v8491_v7  ;;  %5134 = vmatpush.bf16.msrb.mxu0 %v9643_v23  ;;  %v9448_v7 = vld [vmem:[#allocation4 + $0xff8] sm:$0xf0]  ;;  %v7534_v43 = vld [vmem:[#allocation4 + $0xd0] sm:$0xf] }
 0x175   :  { %v9451_v17 = vor.u32 %v10795_v3, %v9448_v7  ;;  %v8920_v23 = vld [vmem:[#allocation4 + $0xbd8] sm:$0xf0]  ;;  %v8879_v7 = vor.u32 %v10658_v60, %v8878_v57  ;;  %v10610_v57 = vld [vmem:[#allocation4 + $0x9fc] sm:$0xf0] }
 0x176   :  { %5057 = vmatpush.bf16.msrb.mxu2 %v9591_v15  ;;  %5125 = vmatpush.bf16.msrb.mxu3 %v9067_v25  ;;  %v10777_v15 = vld [vmem:[#allocation4 + $0xf34] sm:$0xf0]  ;;  %v8200_v25 = vld [vmem:[#allocation4 + $0x638] sm:$0xf0]  ;;  %v8923_v31 = vor.u32 %v10663_v20, %v8920_v23  ;;  %v10310_v60 = vld [vmem:[#allocation4 + $0x9c] sm:$0xf0] }
 0x177   :  { %v9351_v27 = vor.u32 %v10777_v15, %v9350_v13  ;;  %v7630_v13 = vld [vmem:[#allocation4 + $0x190] sm:$0xf]  ;;  %v10346_v15 = vld [vmem:[#allocation4 + $0x1bc] sm:$0xf0]  ;;  %v8728_v20 = vld [vmem:[#allocation4 + $0xa58] sm:$0xf0] }
 0x178   :  { %5096 = vmatpush.bf16.msra.mxu1 %v8443_v24  ;;  %5135 = vmatpush.bf16.msrb.mxu0 %v9595_v35  ;;  %v10783_v24 = vld [vmem:[#allocation4 + $0xf6c] sm:$0xf]  ;;  %v8203_v35 = vor.u32 %v10483_v26, %v8200_v25  ;;  %v7631_v23 = vor.u32 %v10346_v15, %v7630_v13  ;;  %v10634_v26 = vld [vmem:[#allocation4 + $0xabc] sm:$0xf0]  ;;  %v7582_v25 = vld [vmem:[#allocation4 + $0x130] sm:$0xf] }
 0x179   :  { %v9403_v34 = vor.u32 %v10783_v24, %v9400_v22  ;;  %v8782_v24 = vld [vmem:[#allocation4 + $0xa90] sm:$0xf]  ;;  %v10298_v15 = vld [vmem:[#allocation4 + $0x3c] sm:$0xf0] }
 0x17a   :  { %5058 = vmatpush.bf16.msrb.mxu2 %v9543_v0  ;;  %5126 = vmatpush.bf16.msrb.mxu3 %v9019_v37  ;;  %v10382_v0 = vld [vmem:[#allocation4 + $0x2dc] sm:$0xf0]  ;;  %v7438_v13 = vld [vmem:[#allocation4 + $0x10] sm:$0xf] }
 0x17b   :  { %v7775_v37 = vor.u32 %v10382_v0, %v7774_v29  ;;  %v8206_v29 = vld [vmem:[#allocation4 + $0x610] sm:$0xf]  ;;  %v10490_v0 = vld [vmem:[#allocation4 + $0x63c] sm:$0xf0] }
 0x17c   :  { %5097 = vmatpush.bf16.msra.mxu1 %v8395_v36  ;;  %5136 = vmatpush.bf16.msrb.mxu0 %v9547_v50  ;;  %v10651_v36 = vld [vmem:[#allocation4 + $0xb4c] sm:$0xf]  ;;  %v9355_v50 = vor.u32 %v10771_v38, %v9352_v40  ;;  %v8734_v40 = vld [vmem:[#allocation4 + $0xa30] sm:$0xf]  ;;  %v8207_v39 = vor.u32 %v10490_v0, %v8206_v29  ;;  %v10586_v0 = vld [vmem:[#allocation4 + $0x93c] sm:$0xf0] }
 0x17d   :  { %v8875_v47 = vor.u32 %v10651_v36, %v8872_v33  ;;  %v7776_v36 = vld [vmem:[#allocation4 + $0x2e0] sm:$0xf0]  ;;  %v8590_v29 = vld [vmem:[#allocation4 + $0x910] sm:$0xf] }
 0x17e   :  { %5059 = vmatpush.bf16.msrb.mxu2 %v9495_v42  ;;  %5127 = vmatpush.bf16.msrb.mxu3 %v8971_v56  ;;  %v8399_v42 = vor.u32 %v10538_v55, %v8398_v59  ;;  %v7727_v56 = vor.u32 %v10370_v45, %v7726_v44  ;;  %v10322_v44 = vld [vmem:[#allocation4 + $0xfc] sm:$0xf0] }
 0x180   :  { %5098 = vmatpush.bf16.msra.mxu1 %v8347_v52  ;;  %5137 = vmatpush.bf16.msrb.mxu0 %v9499_v5  ;;  %v10639_v52 = vld [vmem:[#allocation4 + $0xaec] sm:$0xf] }
 0x181   :  { %5128 = vmatmul.bf16.vlgmr.msrb.gmra.mxu3 %v11251_v41  ;;  %v8827_v63 = vor.u32 %v10639_v52, %v8824_v53  ;;  %v10627_v5 = vld [vmem:[#allocation4 + $0xa8c] sm:$0xf]  ;;  %v7728_v52 = vld [vmem:[#allocation4 + $0x280] sm:$0xf0] }
 0x182   :  { %5060 = vmatpush.bf16.msrb.mxu2 %v9447_v61  ;;  %5172 = vmatpush.bf16.msra.mxu3 %v8543_v62  ;;  %v7678_v61 = vld [vmem:[#allocation4 + $0x1f0] sm:$0xf]  ;;  %v10358_v62 = vld [vmem:[#allocation4 + $0x21c] sm:$0xf0]  ;;  %v4869_v4 = vpop.f32.mrf.mxu3 }
 0x183   :  { %v4870_v3 = vadd.f32 %v4869_v4, %v11279_v30  ;;  %v7679_v8 = vor.u32 %v10358_v62, %v7678_v61  ;;  %v8635_v61 = vor.u32 %v10591_v48, %v8632_v49  ;;  %v8584_v4 = vld [vmem:[#allocation4 + $0x938] sm:$0xf0]  ;;  %v10460_v49 = vld [vmem:[#allocation4 + $0x554] sm:$0xf] }
 0x184   :  { %5099 = vmatpush.bf16.msra.mxu1 %v8299_v6  ;;  %5138 = vmatpush.bf16.msrb.mxu0 %v9451_v17  ;;  %v8776_v6 = vld [vmem:[#allocation4 + $0xab8] sm:$0xf0]  ;;  %v10502_v17 = vld [vmem:[#allocation4 + $0x69c] sm:$0xf0] }
 0x185   :  { %v8779_v16 = vor.u32 %v10627_v5, %v8776_v6  ;;  %v8255_v22 = vor.u32 %v10502_v17, %v8254_v12  ;;  %v10352_v5 = vld [vmem:[#allocation4 + $0x1f4] sm:$0xf]  ;;  %v7680_v6 = vld [vmem:[#allocation4 + $0x220] sm:$0xf0] }
 0x186   :  { %5061 = vmatpush.bf16.msrb.mxu2 %v9399_v10  ;;  %5173 = vmatpush.bf16.msra.mxu3 %v8495_v11  ;;  %v8303_v10 = vor.u32 %v10514_v51, %v8302_v1  ;;  %v10646_v11 = vld [vmem:[#allocation4 + $0xb1c] sm:$0xf0]  ;;  %v7683_v17 = vor.u32 %v10352_v5, %v7680_v6  ;;  %v9166_v5 = vld [vmem:[#allocation4 + $0xd90] sm:$0xf] }
 0x187   :  { %v8831_v30 = vor.u32 %v10646_v11, %v8830_v9  ;;  %v10478_v9 = vld [vmem:[#allocation4 + $0x5dc] sm:$0xf0] }
 0x188   :  { %5100 = vmatpush.bf16.msra.mxu1 %v8251_v18  ;;  %5139 = vmatpush.bf16.msrb.mxu0 %v9403_v34  ;;  %v10615_v18 = vld [vmem:[#allocation4 + $0xa2c] sm:$0xf]  ;;  %v8680_v34 = vld [vmem:[#allocation4 + $0x9f8] sm:$0xf0]  ;;  %v10598_v11 = vld [vmem:[#allocation4 + $0x99c] sm:$0xf0] }
 0x189   :  { %v10730_v6 = vld [vmem:[#allocation4 + $0xdbc] sm:$0xf0] }
 0x18a   :  { %5062 = vmatpush.bf16.msrb.mxu2 %v9351_v27  ;;  %5174 = vmatpush.bf16.msra.mxu3 %v8447_v28  ;;  %v10334_v27 = vld [vmem:[#allocation4 + $0x15c] sm:$0xf0]  ;;  %v8731_v28 = vor.u32 %v10615_v18, %v8728_v20  ;;  %v4871_v59 = vpop.f32.mrf.mxu3  ;;  %v9310_v18 = vld [vmem:[#allocation4 + $0xeb0] sm:$0xf] }
 0x18b   :  { %v7583_v38 = vor.u32 %v10334_v27, %v7582_v25  ;;  %v10766_v20 = vld [vmem:[#allocation4 + $0xedc] sm:$0xf0]  ;;  %v8110_v25 = vld [vmem:[#allocation4 + $0x550] sm:$0xf] }
 0x18c   :  { %5101 = vmatpush.bf16.msra.mxu1 %v8203_v35  ;;  %5140 = vmatpush.bf16.msrb.mxu0 %v9355_v50  ;;  %v4882_v55 = vpop.f32.mrf.mxu0  ;;  %v10376_v35 = vld [vmem:[#allocation4 + $0x2b4] sm:$0xf]  ;;  %v10466_v27 = vld [vmem:[#allocation4 + $0x57c] sm:$0xf0] }
 0x18d   :  { %5063 = vmatmul.bf16.vlgmr.msrb.gmra.mxu2 %v11262_v2  ;;  %v11286_v33 = vadd.f32 %v4882_v55, %v4870_v3  ;;  %v10364_v50 = vld [vmem:[#allocation4 + $0x254] sm:$0xf]  ;;  %v8160_v55 = vld [vmem:[#allocation4 + $0x5e0] sm:$0xf0] }
 0x18e   :  { %5107 = vmatpush.bf16.msra.mxu2 %v8923_v31  ;;  %5175 = vmatpush.bf16.msra.mxu3 %v8399_v42  ;;  %v10603_v31 = vld [vmem:[#allocation4 + $0x9cc] sm:$0xf]  ;;  %v10622_v42 = vld [vmem:[#allocation4 + $0xa5c] sm:$0xf0]  ;;  %v7731_v62 = vor.u32 %v10364_v50, %v7728_v52  ;;  %v8112_v52 = vld [vmem:[#allocation4 + $0x580] sm:$0xf0] }
 0x18f   :  { %5102 = vmatmul.bf16.vlgmr.msra.gmra.mxu1 %v11240_v32  ;;  %5141 = vmatmul.bf16.vlgmr.msrb.gmra.mxu0 %v11262_v2  ;;  %v8683_v45 = vor.u32 %v10603_v31, %v8680_v34  ;;  %v8735_v53 = vor.u32 %v10622_v42, %v8734_v40  ;;  %v10472_v31 = vld [vmem:[#allocation4 + $0x5b4] sm:$0xf]  ;;  %v9262_v34 = vld [vmem:[#allocation4 + $0xe50] sm:$0xf] }
 0x190   :  { %5146 = vmatpush.bf16.msrb.mxu1 %v7775_v37  ;;  %5185 = vmatpush.bf16.msra.mxu0 %v8927_v54  ;;  %v8783_v37 = vor.u32 %v10634_v26, %v8782_v24  ;;  %v7535_v54 = vor.u32 %v10322_v44, %v7534_v43  ;;  %v7632_v24 = vld [vmem:[#allocation4 + $0x1c0] sm:$0xf0]  ;;  %v7439_v26 = vor.u32 %v10298_v15, %v7438_v13  ;;  %v10328_v40 = vld [vmem:[#allocation4 + $0x134] sm:$0xf]  ;;  %v8062_v44 = vld [vmem:[#allocation4 + $0x4f0] sm:$0xf] }
 0x191   :  { %v8591_v43 = vor.u32 %v10586_v0, %v8590_v29  ;;  %v9312_v29 = vld [vmem:[#allocation4 + $0xee0] sm:$0xf0] }
 0x192   :  { %5108 = vmatpush.bf16.msra.mxu2 %v8875_v47  ;;  %5176 = vmatpush.bf16.msra.mxu3 %v8351_v58  ;;  %v7779_v47 = vor.u32 %v10376_v35, %v7776_v36  ;;  %v7486_v58 = vld [vmem:[#allocation4 + $0x70] sm:$0xf]  ;;  %v10754_v35 = vld [vmem:[#allocation4 + $0xe7c] sm:$0xf0] }
 0x193   :  { %v4921_v51 = vpop.f32.mrf.mxu3  ;;  %v9263_v48 = vor.u32 %v10754_v35, %v9262_v34  ;;  %v10706_v34 = vld [vmem:[#allocation4 + $0xcfc] sm:$0xf0] }
 0x194   :  { %5147 = vmatpush.bf16.msrb.mxu1 %v7727_v56  ;;  %5186 = vmatpush.bf16.msra.mxu0 %v8879_v7  ;;  %v8686_v56 = vld [vmem:[#allocation4 + $0x9d0] sm:$0xf]  ;;  %v4884_v1 = vpop.f32.mrf.mxu0  ;;  %v7487_v7 = vor.u32 %v10310_v60, %v7486_v58  ;;  %v7536_v58 = vld [vmem:[#allocation4 + $0x100] sm:$0xf0] }
 0x195   :  { %v8687_v3 = vor.u32 %v10610_v57, %v8686_v56  ;;  %v10316_v57 = vld [vmem:[#allocation4 + $0xd4] sm:$0xf]  ;;  %v8014_v60 = vld [vmem:[#allocation4 + $0x490] sm:$0xf] }
 0x196   :  { %5109 = vmatpush.bf16.msra.mxu2 %v8827_v63  ;;  %5177 = vmatpush.bf16.msra.mxu3 %v8303_v10  ;;  %v10579_v63 = vld [vmem:[#allocation4 + $0x90c] sm:$0xf]  ;;  %v8638_v10 = vld [vmem:[#allocation4 + $0x970] sm:$0xf]  ;;  %v10448_v1 = vld [vmem:[#allocation4 + $0x4f4] sm:$0xf] }
 0x197   :  { %v8587_v12 = vor.u32 %v10579_v63, %v8584_v4  ;;  %v8064_v4 = vld [vmem:[#allocation4 + $0x520] sm:$0xf0] }
 0x198   :  { %5148 = vmatpush.bf16.msrb.mxu1 %v7679_v8  ;;  %5187 = vmatpush.bf16.msra.mxu0 %v8831_v30  ;;  %v8158_v8 = vld [vmem:[#allocation4 + $0x5b0] sm:$0xf]  ;;  %v8067_v15 = vor.u32 %v10448_v1, %v8064_v4  ;;  %v10862_v1 = vld [vmem:[#allocation4 + $0x11dc] sm:$0xf0]  ;;  %v7872_v4 = vld [vmem:[#allocation4 + $0x3a0] sm:$0xf0] }
 0x199   :  { %v8159_v30 = vor.u32 %v10478_v9, %v8158_v8  ;;  %v10304_v8 = vld [vmem:[#allocation4 + $0x74] sm:$0xf]  ;;  %v7488_v9 = vld [vmem:[#allocation4 + $0xa0] sm:$0xf0] }
 0x19a   :  { %5110 = vmatpush.bf16.msra.mxu2 %v8779_v16  ;;  %5178 = vmatpush.bf16.msra.mxu3 %v8255_v22  ;;  %v1931_v16 = vperm.slane %v11272_v46, 1  ;;  %v8639_v22 = vor.u32 %v10598_v11, %v8638_v10  ;;  %v7966_v10 = vld [vmem:[#allocation4 + $0x430] sm:$0xf]  ;;  %v10430_v11 = vld [vmem:[#allocation4 + $0x45c] sm:$0xf0] }
 0x19b   :  { %v4923_v36 = vpop.f32.mrf.mxu3 }
 0x19c   :  { %5149 = vmatpush.bf16.msrb.mxu1 %v7631_v23  ;;  %5188 = vmatpush.bf16.msra.mxu0 %v8783_v37  ;;  %v10340_v23 = vld [vmem:[#allocation4 + $0x194] sm:$0xf]  ;;  %v4922_v46 = vadd.f32 %v4921_v51, %v1931_v16  ;;  %v4934_v37 = vpop.f32.mrf.mxu0  ;;  %v7539_v51 = vor.u32 %v10316_v57, %v7536_v58  ;;  %v9167_v16 = vor.u32 %v10730_v6, %v9166_v5  ;;  %v10394_v57 = vld [vmem:[#allocation4 + $0x33c] sm:$0xf0]  ;;  %v8974_v5 = vld [vmem:[#allocation4 + $0xc10] sm:$0xf] }
 0x19d   :  { %v7635_v59 = vor.u32 %v10340_v23, %v7632_v24  ;;  %v10718_v23 = vld [vmem:[#allocation4 + $0xd5c] sm:$0xf0]  ;;  %v7967_v24 = vor.u32 %v10430_v11, %v7966_v10  ;;  %v10736_v58 = vld [vmem:[#allocation4 + $0xdf4] sm:$0xf]  ;;  %v8544_v10 = vld [vmem:[#allocation4 + $0x8e0] sm:$0xf0] }
 0x19e   :  { %5111 = vmatpush.bf16.msra.mxu2 %v8731_v28  ;;  %5179 = vmatpush.bf16.msra.mxu3 %v8207_v39  ;;  %v9311_v28 = vor.u32 %v10766_v20, %v9310_v18  ;;  %v7584_v39 = vld [vmem:[#allocation4 + $0x160] sm:$0xf0]  ;;  %v11290_v42 = vadd.f32 %v4934_v37, %v4922_v46  ;;  %v7491_v18 = vor.u32 %v10304_v8, %v7488_v9  ;;  %v10424_v46 = vld [vmem:[#allocation4 + $0x434] sm:$0xf]  ;;  %v10682_v6 = vld [vmem:[#allocation4 + $0xc3c] sm:$0xf0] }
 0x19f   :  { %v7587_v50 = vor.u32 %v10328_v40, %v7584_v39  ;;  %v8016_v20 = vld [vmem:[#allocation4 + $0x4c0] sm:$0xf0]  ;;  %v10406_v40 = vld [vmem:[#allocation4 + $0x39c] sm:$0xf0]  ;;  %v10748_v39 = vld [vmem:[#allocation4 + $0xe54] sm:$0xf] }
 0x1a0   :  { %5150 = vmatpush.bf16.msrb.mxu1 %v7583_v38  ;;  %5189 = vmatpush.bf16.msra.mxu0 %v8735_v53  ;;  %v8111_v38 = vor.u32 %v10466_v27, %v8110_v25  ;;  %v9214_v53 = vld [vmem:[#allocation4 + $0xdf0] sm:$0xf]  ;;  %v10418_v27 = vld [vmem:[#allocation4 + $0x3fc] sm:$0xf0]  ;;  %v10568_v9 = vld [vmem:[#allocation4 + $0x8b4] sm:$0xf] }
 0x1a1   :  { %5180 = vmatmul.bf16.vlgmr.msra.gmra.mxu3 %v11240_v32  ;;  %v7918_v25 = vld [vmem:[#allocation4 + $0x3d0] sm:$0xf] }
 0x1a2   :  { %5112 = vmatpush.bf16.msra.mxu2 %v8683_v45  ;;  %5224 = vmatpush.bf16.msrb.mxu3 %v7779_v47  ;;  %v10454_v45 = vld [vmem:[#allocation4 + $0x51c] sm:$0xf0]  ;;  %v8163_v47 = vor.u32 %v10472_v31, %v8160_v55  ;;  %v9070_v55 = vld [vmem:[#allocation4 + $0xcd0] sm:$0xf]  ;;  %v7919_v36 = vor.u32 %v10418_v27, %v7918_v25  ;;  %v10856_v25 = vld [vmem:[#allocation4 + $0x11b4] sm:$0xf] }
 0x1a3   :  { %v8063_v56 = vor.u32 %v10454_v45, %v8062_v44 }
 0x1a4   :  { %5151 = vmatpush.bf16.msrb.mxu1 %v7535_v54  ;;  %5190 = vmatpush.bf16.msra.mxu0 %v8687_v3  ;;  %v10742_v54 = vld [vmem:[#allocation4 + $0xe1c] sm:$0xf0]  ;;  %v4936_v3 = vpop.f32.mrf.mxu0 }
 0x1a5   :  { %v9215_v63 = vor.u32 %v10742_v54, %v9214_v53 }
 0x1a6   :  { %5113 = vmatpush.bf16.msra.mxu2 %v8635_v61  ;;  %5225 = vmatpush.bf16.msrb.mxu3 %v7731_v62  ;;  %v10442_v61 = vld [vmem:[#allocation4 + $0x4bc] sm:$0xf0]  ;;  %v8115_v62 = vor.u32 %v10460_v49, %v8112_v52  ;;  %v7920_v49 = vld [vmem:[#allocation4 + $0x400] sm:$0xf0] }
 0x1a7   :  { %v10694_v52 = vld [vmem:[#allocation4 + $0xc9c] sm:$0xf0] }
 0x1a8   :  { %5152 = vmatpush.bf16.msrb.mxu1 %v7487_v7  ;;  %5191 = vmatpush.bf16.msra.mxu0 %v8639_v22  ;;  %v8015_v7 = vor.u32 %v10442_v61, %v8014_v60  ;;  %v10292_v22 = vld [vmem:[#allocation4 + $0x14] sm:$0xf]  ;;  %v9216_v60 = vld [vmem:[#allocation4 + $0xe20] sm:$0xf0] }
 0x1a9   :  { %v9219_v8 = vor.u32 %v10736_v58, %v9216_v60  ;;  %v10532_v58 = vld [vmem:[#allocation4 + $0x794] sm:$0xf]  ;;  %v8400_v60 = vld [vmem:[#allocation4 + $0x7c0] sm:$0xf0] }
 0x1aa   :  { %5114 = vmatpush.bf16.msra.mxu2 %v8587_v12  ;;  %5226 = vmatpush.bf16.msrb.mxu3 %v7683_v17  ;;  %v10436_v12 = vld [vmem:[#allocation4 + $0x494] sm:$0xf] }
 0x1ab   :  { %v8019_v0 = vor.u32 %v10436_v12, %v8016_v20  ;;  %v9646_v20 = vld [vmem:[#allocation4 + $0x1150] sm:$0xf] }
 0x1ac   :  { %5153 = vmatpush.bf16.msrb.mxu1 %v7439_v26  ;;  %5192 = vmatpush.bf16.msra.mxu0 %v8591_v43  ;;  %v4895_v13 = vpop.f32.mrf.mxu1  ;;  %v7440_v26 = vld [vmem:[#allocation4 + $0x40] sm:$0xf0] }
 0x1ad   :  { %5115 = vmatmul.bf16.vlgmr.msra.gmra.mxu2 %v11243_v19  ;;  %v11296_v17 = vadd.f32 %v4895_v13, %v11286_v33  ;;  %v7443_v33 = vor.u32 %v10292_v22, %v7440_v26  ;;  %v9264_v43 = vld [vmem:[#allocation4 + $0xe80] sm:$0xf0]  ;;  %v10724_v13 = vld [vmem:[#allocation4 + $0xd94] sm:$0xf] }
 0x1ae   :  { %5159 = vmatpush.bf16.msrb.mxu2 %v8159_v30  ;;  %5227 = vmatpush.bf16.msrb.mxu3 %v7635_v59  ;;  %v9118_v30 = vld [vmem:[#allocation4 + $0xd30] sm:$0xf]  ;;  %v7968_v59 = vld [vmem:[#allocation4 + $0x460] sm:$0xf0]  ;;  %v9267_v54 = vor.u32 %v10748_v39, %v9264_v43  ;;  %v10388_v22 = vld [vmem:[#allocation4 + $0x314] sm:$0xf] }
 0x1af   :  { %5154 = vmatmul.bf16.vlgmr.msrb.gmra.mxu1 %v11228_v14  ;;  %5193 = vmatmul.bf16.vlgmr.msra.gmra.mxu0 %v11243_v19  ;;  %v9119_v31 = vor.u32 %v10718_v23, %v9118_v30  ;;  %v7971_v45 = vor.u32 %v10424_v46, %v7968_v59  ;;  %v10850_v30 = vld [vmem:[#allocation4 + $0x117c] sm:$0xf0]  ;;  %v7824_v26 = vld [vmem:[#allocation4 + $0x340] sm:$0xf0]  ;;  %v10712_v46 = vld [vmem:[#allocation4 + $0xd34] sm:$0xf] }
 0x1b0   :  { %5198 = vmatpush.bf16.msra.mxu1 %v9311_v28  ;;  %5237 = vmatpush.bf16.msrb.mxu0 %v8163_v47  ;;  %v10760_v28 = vld [vmem:[#allocation4 + $0xeb4] sm:$0xf]  ;;  %v9071_v47 = vor.u32 %v10706_v34, %v9070_v55  ;;  %v7827_v59 = vor.u32 %v10388_v22, %v7824_v26  ;;  %v9598_v55 = vld [vmem:[#allocation4 + $0x10f0] sm:$0xf]  ;;  %v8448_v43 = vld [vmem:[#allocation4 + $0x820] sm:$0xf0] }
 0x1b1   :  { %v9315_v37 = vor.u32 %v10760_v28, %v9312_v29  ;;  %v9696_v28 = vld [vmem:[#allocation4 + $0x11e0] sm:$0xf0]  ;;  %v10556_v29 = vld [vmem:[#allocation4 + $0x854] sm:$0xf] }
 0x1b2   :  { %5160 = vmatpush.bf16.msrb.mxu2 %v8111_v38  ;;  %5228 = vmatpush.bf16.msrb.mxu3 %v7587_v50  ;;  %v11298_v35 = vpop.f32.mrf.mxu3  ;;  %v7870_v38 = vld [vmem:[#allocation4 + $0x370] sm:$0xf]  ;;  %v9699_v34 = vor.u32 %v10856_v25, %v9696_v28  ;;  %v10544_v39 = vld [vmem:[#allocation4 + $0x7f4] sm:$0xf] }
 0x1b3   :  { %v9022_v50 = vld [vmem:[#allocation4 + $0xc70] sm:$0xf]  ;;  %v7871_v53 = vor.u32 %v10406_v40, %v7870_v38  ;;  %v9648_v40 = vld [vmem:[#allocation4 + $0x1180] sm:$0xf0] }
 0x1b4   :  { %5199 = vmatpush.bf16.msra.mxu1 %v9263_v48  ;;  %5238 = vmatpush.bf16.msrb.mxu0 %v8115_v62  ;;  %v4897_v44 = vpop.f32.mrf.mxu1  ;;  %v10412_v48 = vld [vmem:[#allocation4 + $0x3d4] sm:$0xf]  ;;  %v9023_v62 = vor.u32 %v10694_v52, %v9022_v50  ;;  %v10826_v50 = vld [vmem:[#allocation4 + $0x10bc] sm:$0xf0] }
 0x1b5   :  { %v7923_v61 = vor.u32 %v10412_v48, %v7920_v49  ;;  %v9550_v49 = vld [vmem:[#allocation4 + $0x1090] sm:$0xf] }
 0x1b6   :  { %5161 = vmatpush.bf16.msrb.mxu2 %v8063_v56  ;;  %5229 = vmatpush.bf16.msrb.mxu3 %v7539_v51  ;;  %v7822_v56 = vld [vmem:[#allocation4 + $0x310] sm:$0xf]  ;;  %v10400_v51 = vld [vmem:[#allocation4 + $0x374] sm:$0xf] }
 0x1b7   :  { %v7875_v12 = vor.u32 %v10400_v51, %v7872_v4  ;;  %v9502_v4 = vld [vmem:[#allocation4 + $0x1030] sm:$0xf] }
 0x1b8   :  { %5200 = vmatpush.bf16.msra.mxu1 %v9215_v63  ;;  %5239 = vmatpush.bf16.msrb.mxu0 %v8067_v15  ;;  %v9694_v63 = vld [vmem:[#allocation4 + $0x11b0] sm:$0xf]  ;;  %v9168_v15 = vld [vmem:[#allocation4 + $0xdc0] sm:$0xf0] }
 0x1b9   :  { %v9695_v11 = vor.u32 %v10862_v1, %v9694_v63  ;;  %v9171_v27 = vor.u32 %v10724_v13, %v9168_v15  ;;  %v10688_v63 = vld [vmem:[#allocation4 + $0xc74] sm:$0xf]  ;;  %v9024_v1 = vld [vmem:[#allocation4 + $0xca0] sm:$0xf0] }
 0x1ba   :  { %5162 = vmatpush.bf16.msrb.mxu2 %v8015_v7  ;;  %5230 = vmatpush.bf16.msrb.mxu3 %v7491_v18  ;;  %v4975_v3 = vpop.f32.mrf.mxu3  ;;  %v7823_v7 = vor.u32 %v10394_v57, %v7822_v56  ;;  %v8975_v18 = vor.u32 %v10682_v6, %v8974_v5  ;;  %v9600_v57 = vld [vmem:[#allocation4 + $0x1120] sm:$0xf0]  ;;  %v10814_v5 = vld [vmem:[#allocation4 + $0x105c] sm:$0xf0]  ;;  %v10676_v15 = vld [vmem:[#allocation4 + $0xc14] sm:$0xf] }
 0x1bb   :  { %v8403_v3 = vor.u32 %v10532_v58, %v8400_v60  ;;  %v9503_v13 = vor.u32 %v10814_v5, %v9502_v4  ;;  %v10664_v60 = vld [vmem:[#allocation4 + $0xbb4] sm:$0xf]  ;;  %v8208_v5 = vld [vmem:[#allocation4 + $0x640] sm:$0xf0] }
 0x1bc   :  { %5201 = vmatpush.bf16.msra.mxu1 %v9167_v16  ;;  %5240 = vmatpush.bf16.msrb.mxu0 %v8019_v0  ;;  %v4947_v16 = vpop.f32.mrf.mxu1  ;;  %v8496_v0 = vld [vmem:[#allocation4 + $0x880] sm:$0xf0]  ;;  %v10484_v4 = vld [vmem:[#allocation4 + $0x614] sm:$0xf] }
 0x1bd   :  { %v11302_v23 = vadd.f32 %v4947_v16, %v11290_v42  ;;  %v10838_v42 = vld [vmem:[#allocation4 + $0x111c] sm:$0xf0]  ;;  %v8976_v16 = vld [vmem:[#allocation4 + $0xc40] sm:$0xf0] }
 0x1be   :  { %5163 = vmatpush.bf16.msrb.mxu2 %v7967_v24  ;;  %5231 = vmatpush.bf16.msrb.mxu3 %v7443_v33  ;;  %v8547_v24 = vor.u32 %v10568_v9, %v8544_v10  ;;  %v9120_v33 = vld [vmem:[#allocation4 + $0xd60] sm:$0xf0]  ;;  %v9599_v44 = vor.u32 %v10838_v42, %v9598_v55  ;;  %v10520_v10 = vld [vmem:[#allocation4 + $0x734] sm:$0xf]  ;;  %v9406_v42 = vld [vmem:[#allocation4 + $0xf70] sm:$0xf] }
 0x1bf   :  { %v9123_v38 = vor.u32 %v10712_v46, %v9120_v33  ;;  %v9552_v9 = vld [vmem:[#allocation4 + $0x10c0] sm:$0xf0] }
 0x1c0   :  { %5202 = vmatpush.bf16.msra.mxu1 %v9119_v31  ;;  %5241 = vmatpush.bf16.msrb.mxu0 %v7971_v45  ;;  %v9647_v31 = vor.u32 %v10850_v30, %v9646_v20  ;;  %v10700_v45 = vld [vmem:[#allocation4 + $0xcd4] sm:$0xf]  ;;  %v10802_v20 = vld [vmem:[#allocation4 + $0xffc] sm:$0xf0]  ;;  %v8550_v30 = vld [vmem:[#allocation4 + $0x8b8] sm:$0xf] }
 0x1c1   :  { %5232 = vmatmul.bf16.vlgmr.msrb.gmra.mxu3 %v11228_v14  ;;  %v8304_v46 = vld [vmem:[#allocation4 + $0x700] sm:$0xf0] }
 0x1c2   :  { %5164 = vmatpush.bf16.msrb.mxu2 %v7919_v36  ;;  %5276 = vmatpush.bf16.msra.mxu3 %v9315_v37  ;;  %v8499_v36 = vor.u32 %v10556_v29, %v8496_v0  ;;  %v10844_v37 = vld [vmem:[#allocation4 + $0x1154] sm:$0xf]  ;;  %v8979_v29 = vor.u32 %v10676_v15, %v8976_v16  ;;  %v9504_v0 = vld [vmem:[#allocation4 + $0x1060] sm:$0xf0]  ;;  %v8211_v16 = vor.u32 %v10484_v4, %v8208_v5  ;;  %v10503_v4 = vld [vmem:[#allocation4 + $0x6a4] sm:$0xf0] }
 0x1c3   :  { %v9651_v52 = vor.u32 %v10844_v37, %v9648_v40  ;;  %v8502_v37 = vld [vmem:[#allocation4 + $0x858] sm:$0xf] }
 0x1c4   :  { %5203 = vmatpush.bf16.msra.mxu1 %v9071_v47  ;;  %5242 = vmatpush.bf16.msrb.mxu0 %v7923_v61  ;;  %v9072_v47 = vld [vmem:[#allocation4 + $0xd00] sm:$0xf0]  ;;  %v4949_v48 = vpop.f32.mrf.mxu1 }
 0x1c5   :  { %v9075_v56 = vor.u32 %v10700_v45, %v9072_v47  ;;  %v11307_v61 = vpop.f32.mrf.mxu3  ;;  %v8256_v45 = vld [vmem:[#allocation4 + $0x6a0] sm:$0xf0] }
 0x1c6   :  { %5165 = vmatpush.bf16.msrb.mxu2 %v7871_v53  ;;  %5277 = vmatpush.bf16.msra.mxu3 %v9267_v54  ;;  %v8451_v53 = vor.u32 %v10544_v39, %v8448_v43  ;;  %v10832_v54 = vld [vmem:[#allocation4 + $0x10f4] sm:$0xf]  ;;  %v9456_v43 = vld [vmem:[#allocation4 + $0x1000] sm:$0xf0] }
 0x1c7   :  { %v9603_v6 = vor.u32 %v10832_v54, %v9600_v57  ;;  %v10551_v54 = vld [vmem:[#allocation4 + $0x824] sm:$0xf0] }
 0x1c8   :  { %5204 = vmatpush.bf16.msra.mxu1 %v9023_v62  ;;  %5243 = vmatpush.bf16.msrb.mxu0 %v7875_v12  ;;  %v9551_v62 = vor.u32 %v10826_v50, %v9550_v49  ;;  %v9454_v12 = vld [vmem:[#allocation4 + $0xfd0] sm:$0xf] }
 0x1c9   :  { %v9358_v49 = vld [vmem:[#allocation4 + $0xf10] sm:$0xf] }
 0x1ca   :  { %5166 = vmatpush.bf16.msrb.mxu2 %v7823_v7  ;;  %5278 = vmatpush.bf16.msra.mxu3 %v9219_v8  ;;  %v11309_v51 = vpop.f32.mrf.mxu0  ;;  %v10820_v7 = vld [vmem:[#allocation4 + $0x1094] sm:$0xf]  ;;  %v9027_v8 = vor.u32 %v10688_v63, %v9024_v1  ;;  %v9408_v1 = vld [vmem:[#allocation4 + $0xfa0] sm:$0xf0] }
 0x1cb   :  { %v9555_v26 = vor.u32 %v10820_v7, %v9552_v9  ;;  %v10784_v63 = vld [vmem:[#allocation4 + $0xf74] sm:$0xf]  ;;  %v7782_v7 = vld [vmem:[#allocation4 + $0x2b8] sm:$0xf] }
 0x1cc   :  { %5205 = vmatpush.bf16.msra.mxu1 %v8975_v18  ;;  %5244 = vmatpush.bf16.msrb.mxu0 %v7827_v59  ;;  %v11311_v18 = vpop.f32.mrf.mxu1  ;;  %v9455_v59 = vor.u32 %v10802_v20, %v9454_v12  ;;  %v9411_v15 = vor.u32 %v10784_v63, %v9408_v1  ;;  %v10652_v12 = vld [vmem:[#allocation4 + $0xb54] sm:$0xf]  ;;  %v8880_v20 = vld [vmem:[#allocation4 + $0xb80] sm:$0xf0]  ;;  %v8262_v1 = vld [vmem:[#allocation4 + $0x678] sm:$0xf] }
 0x1cd   :  { %5167 = vmatmul.bf16.vlgmr.msrb.gmra.mxu2 %v11232_v21  ;;  %v5027_v33 = vpop.f32.mrf.mxu3 }
 0x1ce   :  { %5211 = vmatpush.bf16.msra.mxu2 %v9695_v11  ;;  %5279 = vmatpush.bf16.msra.mxu3 %v9171_v27  ;;  %v8352_v11 = vld [vmem:[#allocation4 + $0x760] sm:$0xf0]  ;;  %v10808_v27 = vld [vmem:[#allocation4 + $0x1034] sm:$0xf]  ;;  %v10527_v33 = vld [vmem:[#allocation4 + $0x764] sm:$0xf0] }
 0x1cf   :  { %5206 = vmatmul.bf16.vlgmr.msra.gmra.mxu1 %v11251_v41  ;;  %5245 = vmatmul.bf16.vlgmr.msrb.gmra.mxu0 %v11232_v21  ;;  %v8355_v25 = vor.u32 %v10520_v10, %v8352_v11  ;;  %v9507_v40 = vor.u32 %v10808_v27, %v9504_v0  ;;  %v8406_v11 = vld [vmem:[#allocation4 + $0x798] sm:$0xf]  ;;  %v10671_v27 = vld [vmem:[#allocation4 + $0xbe4] sm:$0xf0] }
 0x1d0   :  { %5250 = vmatpush.bf16.msrb.mxu1 %v8547_v24  ;;  %5289 = vmatpush.bf16.msra.mxu0 %v9699_v34  ;;  %v10575_v24 = vld [vmem:[#allocation4 + $0x8e4] sm:$0xf0]  ;;  %v4908_v22 = vpop.f32.mrf.mxu2 }
 0x1d1   :  { %v11314_v28 = vadd.f32 %v4908_v22, %v11296_v17  ;;  %v8551_v55 = vor.u32 %v10575_v24, %v8550_v30  ;;  %v10796_v17 = vld [vmem:[#allocation4 + $0xfd4] sm:$0xf]  ;;  %v9360_v22 = vld [vmem:[#allocation4 + $0xf40] sm:$0xf0]  ;;  %v10371_v0 = vld [vmem:[#allocation4 + $0x284] sm:$0xf0] }
 0x1d2   :  { %5212 = vmatpush.bf16.msra.mxu2 %v9647_v31  ;;  %5280 = vmatpush.bf16.msra.mxu3 %v9123_v38  ;;  %v10508_v31 = vld [vmem:[#allocation4 + $0x6d4] sm:$0xf]  ;;  %v4988_v34 = vpop.f32.mrf.mxu0  ;;  %v10563_v38 = vld [vmem:[#allocation4 + $0x884] sm:$0xf0]  ;;  %v9459_v57 = vor.u32 %v10796_v17, %v9456_v43  ;;  %v7686_v43 = vld [vmem:[#allocation4 + $0x1f8] sm:$0xf] }
 0x1d3   :  { %v8307_v39 = vor.u32 %v10508_v31, %v8304_v46  ;;  %v8503_v48 = vor.u32 %v10563_v38, %v8502_v37  ;;  %v10772_v24 = vld [vmem:[#allocation4 + $0xf14] sm:$0xf]  ;;  %v8883_v31 = vor.u32 %v10652_v12, %v8880_v20  ;;  %v8358_v46 = vld [vmem:[#allocation4 + $0x738] sm:$0xf]  ;;  %v8832_v34 = vld [vmem:[#allocation4 + $0xb20] sm:$0xf0] }
 0x1d4   :  { %5251 = vmatpush.bf16.msrb.mxu1 %v8499_v36  ;;  %5290 = vmatpush.bf16.msra.mxu0 %v9651_v52  ;;  %v10790_v36 = vld [vmem:[#allocation4 + $0xf9c] sm:$0xf0]  ;;  %v5001_v50 = vpop.f32.mrf.mxu1  ;;  %v10659_v17 = vld [vmem:[#allocation4 + $0xb84] sm:$0xf0]  ;;  %v7590_v20 = vld [vmem:[#allocation4 + $0x138] sm:$0xf] }
 0x1d5   :  { %v9407_v47 = vor.u32 %v10790_v36, %v9406_v42  ;;  %v10778_v52 = vld [vmem:[#allocation4 + $0xf3c] sm:$0xf0]  ;;  %v10640_v42 = vld [vmem:[#allocation4 + $0xaf4] sm:$0xf]  ;;  %v10635_v12 = vld [vmem:[#allocation4 + $0xac4] sm:$0xf0] }
 0x1d6   :  { %5213 = vmatpush.bf16.msra.mxu2 %v9599_v44  ;;  %5281 = vmatpush.bf16.msra.mxu3 %v9075_v56  ;;  %v10496_v44 = vld [vmem:[#allocation4 + $0x674] sm:$0xf] }
 0x1d7   :  { %v8259_v58 = vor.u32 %v10496_v44, %v8256_v45  ;;  %v10359_v44 = vld [vmem:[#allocation4 + $0x224] sm:$0xf0]  ;;  %v10628_v50 = vld [vmem:[#allocation4 + $0xa94] sm:$0xf] }
 0x1d8   :  { %5252 = vmatpush.bf16.msrb.mxu1 %v8451_v53  ;;  %5291 = vmatpush.bf16.msra.mxu0 %v9603_v6  ;;  %v8454_v53 = vld [vmem:[#allocation4 + $0x7f8] sm:$0xf]  ;;  %v4910_v56 = vpop.f32.mrf.mxu2  ;;  %v9359_v6 = vor.u32 %v10778_v52, %v9358_v49  ;;  %v8784_v52 = vld [vmem:[#allocation4 + $0xac0] sm:$0xf0] }
 0x1d9   :  { %v8310_v49 = vld [vmem:[#allocation4 + $0x6d8] sm:$0xf]  ;;  %v7687_v56 = vor.u32 %v10359_v44, %v7686_v43  ;;  %v8787_v63 = vor.u32 %v10628_v50, %v8784_v52 }
 0x1da   :  { %5214 = vmatpush.bf16.msra.mxu2 %v9551_v62  ;;  %5282 = vmatpush.bf16.msra.mxu3 %v9027_v8  ;;  %v8928_v62 = vld [vmem:[#allocation4 + $0xbe0] sm:$0xf0]  ;;  %v10383_v8 = vld [vmem:[#allocation4 + $0x2e4] sm:$0xf0]  ;;  %v11317_v9 = vpop.f32.mrf.mxu0 }
 0x1db   :  { %v8931_v10 = vor.u32 %v10664_v60, %v8928_v62  ;;  %v7783_v30 = vor.u32 %v10383_v8, %v7782_v7  ;;  %v7638_v60 = vld [vmem:[#allocation4 + $0x198] sm:$0xf]  ;;  %v10347_v62 = vld [vmem:[#allocation4 + $0x1c4] sm:$0xf0] }
 0x1dc   :  { %5253 = vmatpush.bf16.msrb.mxu1 %v8403_v3  ;;  %5292 = vmatpush.bf16.msra.mxu0 %v9555_v26  ;;  %v8455_v3 = vor.u32 %v10551_v54, %v8454_v53  ;;  %v8934_v26 = vld [vmem:[#allocation4 + $0xbb8] sm:$0xf]  ;;  %v11327_v7 = vld [vmem:[#allocation9 + $0x6] sm:$0xff] }
 0x1dd   :  { %v8935_v37 = vor.u32 %v10671_v27, %v8934_v26  ;;  %v1932_v8 = vperm.slane %v11327_v7, 2  ;;  %v10491_v26 = vld [vmem:[#allocation4 + $0x644] sm:$0xf0] }
 0x1de   :  { %5215 = vmatpush.bf16.msra.mxu2 %v9503_v13  ;;  %5283 = vmatpush.bf16.msra.mxu3 %v8979_v29  ;;  %v10539_v13 = vld [vmem:[#allocation4 + $0x7c4] sm:$0xf0]  ;;  %v7734_v29 = vld [vmem:[#allocation4 + $0x258] sm:$0xf] }
 0x1df   :  { %v7735_v38 = vor.u32 %v10371_v0, %v7734_v29  ;;  %v8688_v29 = vld [vmem:[#allocation4 + $0xa00] sm:$0xf0]  ;;  %v10377_v0 = vld [vmem:[#allocation4 + $0x2bc] sm:$0xf] }
 0x1e0   :  { %5254 = vmatpush.bf16.msrb.mxu1 %v8355_v25  ;;  %5293 = vmatpush.bf16.msra.mxu0 %v9507_v40  ;;  %v8407_v25 = vor.u32 %v10539_v13, %v8406_v11  ;;  %v8886_v40 = vld [vmem:[#allocation4 + $0xb58] sm:$0xf]  ;;  %v7639_v13 = vor.u32 %v10347_v62, %v7638_v60  ;;  %v10580_v62 = vld [vmem:[#allocation4 + $0x914] sm:$0xf] }
 0x1e1   :  { %5284 = vmatmul.bf16.vlgmr.msra.gmra.mxu3 %v11251_v41  ;;  %v8887_v54 = vor.u32 %v10659_v17, %v8886_v40  ;;  %v5000_v17 = vadd.f32 %v11311_v18, %v1932_v8  ;;  %v8166_v8 = vld [vmem:[#allocation4 + $0x5b8] sm:$0xf] }
 0x1e2   :  { %5216 = vmatpush.bf16.msra.mxu2 %v9455_v59  ;;  %5328 = vmatpush.bf16.msrb.mxu3 %v8551_v55  ;;  %v4960_v59 = vpop.f32.mrf.mxu2  ;;  %v9363_v55 = vor.u32 %v10772_v24, %v9360_v22  ;;  %v8214_v22 = vld [vmem:[#allocation4 + $0x618] sm:$0xf] }
 0x1e3   :  { %v4961_v36 = vadd.f32 %v4960_v59, %v11302_v23  ;;  %v10515_v23 = vld [vmem:[#allocation4 + $0x704] sm:$0xf0]  ;;  %v8742_v59 = vld [vmem:[#allocation4 + $0xa38] sm:$0xf] }
 0x1e4   :  { %5255 = vmatpush.bf16.msrb.mxu1 %v8307_v39  ;;  %5294 = vmatpush.bf16.msra.mxu0 %v9459_v57  ;;  %v8359_v39 = vor.u32 %v10527_v33, %v8358_v46  ;;  %v8838_v57 = vld [vmem:[#allocation4 + $0xaf8] sm:$0xf]  ;;  %v5077_v5 = vpop.f32.mrf.mxu3 }
 0x1e5   :  { %v4974_v45 = vadd.f32 %v11298_v35, %v4961_v36  ;;  %v8311_v35 = vor.u32 %v10515_v23, %v8310_v49  ;;  %v10323_v36 = vld [vmem:[#allocation4 + $0x104] sm:$0xf0] }
 0x1e6   :  { %5217 = vmatpush.bf16.msra.mxu2 %v9407_v47  ;;  %5329 = vmatpush.bf16.msrb.mxu3 %v8503_v48  ;;  %v5040_v47 = vpop.f32.mrf.mxu0  ;;  %v8835_v48 = vor.u32 %v10640_v42, %v8832_v34  ;;  %v10623_v42 = vld [vmem:[#allocation4 + $0xa64] sm:$0xf0]  ;;  %v7542_v34 = vld [vmem:[#allocation4 + $0xd8] sm:$0xf] }
 0x1e7   :  { %v11324_v53 = vadd.f32 %v11309_v51, %v4974_v45  ;;  %v10616_v51 = vld [vmem:[#allocation4 + $0xa34] sm:$0xf]  ;;  %v8640_v45 = vld [vmem:[#allocation4 + $0x9a0] sm:$0xf0]  ;;  %v10365_v47 = vld [vmem:[#allocation4 + $0x25c] sm:$0xf]  ;;  %v8743_v50 = vor.u32 %v10623_v42, %v8742_v59  ;;  %v7543_v52 = vor.u32 %v10323_v36, %v7542_v34 }
 0x1e8   :  { %5256 = vmatpush.bf16.msrb.mxu1 %v8259_v58  ;;  %5295 = vmatpush.bf16.msra.mxu0 %v9411_v15  ;;  %v10647_v58 = vld [vmem:[#allocation4 + $0xb24] sm:$0xf0]  ;;  %v8790_v15 = vld [vmem:[#allocation4 + $0xa98] sm:$0xf]  ;;  %v10473_v36 = vld [vmem:[#allocation4 + $0x5bc] sm:$0xf] }
 0x1e9   :  { %v8839_v11 = vor.u32 %v10647_v58, %v8838_v57  ;;  %v8791_v46 = vor.u32 %v10635_v12, %v8790_v15  ;;  %v10611_v57 = vld [vmem:[#allocation4 + $0xa04] sm:$0xf0]  ;;  %v7446_v15 = vld [vmem:[#allocation4 + $0x18] sm:$0xf] }
 0x1ea   :  { %5218 = vmatpush.bf16.msra.mxu2 %v9359_v6  ;;  %5330 = vmatpush.bf16.msrb.mxu3 %v8455_v3  ;;  %v4962_v6 = vpop.f32.mrf.mxu2  ;;  %v8736_v3 = vld [vmem:[#allocation4 + $0xa60] sm:$0xf0]  ;;  %v10311_v58 = vld [vmem:[#allocation4 + $0xa4] sm:$0xf0]  ;;  %v8118_v59 = vld [vmem:[#allocation4 + $0x558] sm:$0xf] }
 0x1eb   :  { %v8739_v24 = vor.u32 %v10616_v51, %v8736_v3  ;;  %v7688_v6 = vld [vmem:[#allocation4 + $0x228] sm:$0xf0]  ;;  %v8598_v42 = vld [vmem:[#allocation4 + $0x918] sm:$0xf]  ;;  %v10587_v34 = vld [vmem:[#allocation4 + $0x944] sm:$0xf0] }
 0x1ec   :  { %5257 = vmatpush.bf16.msrb.mxu1 %v8211_v16  ;;  %5296 = vmatpush.bf16.msra.mxu0 %v9363_v55  ;;  %v8263_v16 = vor.u32 %v10503_v4, %v8262_v1  ;;  %v11331_v27 = vpop.f32.mrf.mxu1  ;;  %v8215_v55 = vor.u32 %v10491_v26, %v8214_v22  ;;  %v5079_v43 = vpop.f32.mrf.mxu3  ;;  %v8592_v4 = vld [vmem:[#allocation4 + $0x940] sm:$0xf0] }
 0x1ed   :  { %5219 = vmatmul.bf16.vlgmr.msra.gmra.mxu2 %v11262_v2  ;;  %v7592_v43 = vld [vmem:[#allocation4 + $0x168] sm:$0xf0] }
 0x1ee   :  { %5263 = vmatpush.bf16.msrb.mxu2 %v8931_v10  ;;  %5331 = vmatpush.bf16.msrb.mxu3 %v8407_v25  ;;  %v1933_v10 = vperm.slane %v11327_v7, 3  ;;  %v10604_v25 = vld [vmem:[#allocation4 + $0x9d4] sm:$0xf]  ;;  %v5090_v44 = vpop.f32.mrf.mxu0 }
 0x1ef   :  { %5258 = vmatmul.bf16.vlgmr.msrb.gmra.mxu1 %v11240_v32  ;;  %5297 = vmatmul.bf16.vlgmr.msra.gmra.mxu0 %v11262_v2 }
 0x1f0   :  { %5302 = vmatpush.bf16.msra.mxu1 %v7783_v30  ;;  %5341 = vmatpush.bf16.msrb.mxu0 %v8935_v37  ;;  %v10335_v30 = vld [vmem:[#allocation4 + $0x164] sm:$0xf0]  ;;  %v5078_v37 = vadd.f32 %v5077_v5, %v1933_v10  ;;  %v10353_v5 = vld [vmem:[#allocation4 + $0x1fc] sm:$0xf] }
 0x1f1   :  { %v7591_v33 = vor.u32 %v10335_v30, %v7590_v20  ;;  %v10479_v10 = vld [vmem:[#allocation4 + $0x5e4] sm:$0xf0]  ;;  %v7691_v20 = vor.u32 %v10353_v5, %v7688_v6  ;;  %v9318_v30 = vld [vmem:[#allocation4 + $0xeb8] sm:$0xf]  ;;  %v8072_v6 = vld [vmem:[#allocation4 + $0x528] sm:$0xf0] }
 0x1f2   :  { %5264 = vmatpush.bf16.msrb.mxu2 %v8883_v31  ;;  %5332 = vmatpush.bf16.msrb.mxu3 %v8359_v39  ;;  %v7784_v31 = vld [vmem:[#allocation4 + $0x2e8] sm:$0xf0]  ;;  %v10592_v39 = vld [vmem:[#allocation4 + $0x974] sm:$0xf]  ;;  %v11334_v49 = vadd.f32 %v5090_v44, %v5078_v37  ;;  %v5012_v23 = vpop.f32.mrf.mxu2  ;;  %v8167_v26 = vor.u32 %v10479_v10, %v8166_v8  ;;  %v8599_v44 = vor.u32 %v10587_v34, %v8598_v42  ;;  %v10305_v10 = vld [vmem:[#allocation4 + $0x7c] sm:$0xf] }
 0x1f3   :  { %v7787_v40 = vor.u32 %v10377_v0, %v7784_v31  ;;  %v8643_v18 = vor.u32 %v10592_v39, %v8640_v45  ;;  %v10755_v39 = vld [vmem:[#allocation4 + $0xe84] sm:$0xf0]  ;;  %v8070_v45 = vld [vmem:[#allocation4 + $0x4f8] sm:$0xf] }
 0x1f4   :  { %5303 = vmatpush.bf16.msra.mxu1 %v7735_v38  ;;  %5342 = vmatpush.bf16.msrb.mxu0 %v8887_v54  ;;  %v8691_v38 = vor.u32 %v10604_v25, %v8688_v29  ;;  %v8694_v54 = vld [vmem:[#allocation4 + $0x9d8] sm:$0xf]  ;;  %v5053_v1 = vpop.f32.mrf.mxu1  ;;  %v10341_v25 = vld [vmem:[#allocation4 + $0x19c] sm:$0xf]  ;;  %v7640_v29 = vld [vmem:[#allocation4 + $0x1c8] sm:$0xf0] }
 0x1f5   :  { %v8695_v51 = vor.u32 %v10611_v57, %v8694_v54  ;;  %v7643_v37 = vor.u32 %v10341_v25, %v7640_v29  ;;  %v8120_v54 = vld [vmem:[#allocation4 + $0x588] sm:$0xf0]  ;;  %v10743_v57 = vld [vmem:[#allocation4 + $0xe24] sm:$0xf0]  ;;  %v10293_v29 = vld [vmem:[#allocation4 + $0x1c] sm:$0xf] }
 0x1f6   :  { %5265 = vmatpush.bf16.msrb.mxu2 %v8835_v48  ;;  %5333 = vmatpush.bf16.msrb.mxu3 %v8311_v35  ;;  %v7736_v48 = vld [vmem:[#allocation4 + $0x288] sm:$0xf0]  ;;  %v7494_v35 = vld [vmem:[#allocation4 + $0x78] sm:$0xf]  ;;  %v5092_v22 = vpop.f32.mrf.mxu0 }
 0x1f7   :  { %v7739_v60 = vor.u32 %v10365_v47, %v7736_v48  ;;  %v7495_v3 = vor.u32 %v10311_v58, %v7494_v35  ;;  %v10455_v47 = vld [vmem:[#allocation4 + $0x524] sm:$0xf0]  ;;  %v10317_v58 = vld [vmem:[#allocation4 + $0xdc] sm:$0xf]  ;;  %v9126_v22 = vld [vmem:[#allocation4 + $0xd38] sm:$0xf] }
 0x1f8   :  { %5304 = vmatpush.bf16.msra.mxu1 %v7687_v56  ;;  %5343 = vmatpush.bf16.msrb.mxu0 %v8839_v11  ;;  %v5013_v56 = vadd.f32 %v5012_v23, %v5000_v17  ;;  %v8646_v11 = vld [vmem:[#allocation4 + $0x978] sm:$0xf]  ;;  %v10329_v17 = vld [vmem:[#allocation4 + $0x13c] sm:$0xf]  ;;  %v8071_v35 = vor.u32 %v10455_v47, %v8070_v45 }
 0x1fa   :  { %5266 = vmatpush.bf16.msrb.mxu2 %v8787_v63  ;;  %5334 = vmatpush.bf16.msrb.mxu3 %v8263_v16  ;;  %v5026_v63 = vadd.f32 %v11307_v61, %v5013_v56  ;;  %v10299_v16 = vld [vmem:[#allocation4 + $0x44] sm:$0xf0]  ;;  %v8595_v61 = vor.u32 %v10580_v62, %v8592_v4  ;;  %v5014_v31 = vpop.f32.mrf.mxu2  ;;  %v9222_v56 = vld [vmem:[#allocation4 + $0xdf8] sm:$0xf]  ;;  %v10449_v4 = vld [vmem:[#allocation4 + $0x4fc] sm:$0xf] }
 0x1fb   :  { %v10443_v62 = vld [vmem:[#allocation4 + $0x4c4] sm:$0xf0]  ;;  %v9223_v1 = vor.u32 %v10743_v57, %v9222_v56  ;;  %v7448_v31 = vld [vmem:[#allocation4 + $0x48] sm:$0xf0]  ;;  %v10413_v56 = vld [vmem:[#allocation4 + $0x3dc] sm:$0xf] }
 0x1fc   :  { %5305 = vmatpush.bf16.msra.mxu1 %v7639_v13  ;;  %5344 = vmatpush.bf16.msrb.mxu0 %v8791_v46  ;;  %v10599_v13 = vld [vmem:[#allocation4 + $0x9a4] sm:$0xf0]  ;;  %v5039_v12 = vadd.f32 %v11317_v9, %v5026_v63 }
 0x1fd   :  { %v8647_v46 = vor.u32 %v10599_v13, %v8646_v11  ;;  %v10467_v9 = vld [vmem:[#allocation4 + $0x584] sm:$0xf0]  ;;  %v7496_v11 = vld [vmem:[#allocation4 + $0xa8] sm:$0xf0] }
 0x1fe   :  { %5267 = vmatpush.bf16.msrb.mxu2 %v8739_v24  ;;  %5335 = vmatpush.bf16.msrb.mxu3 %v8215_v55  ;;  %v10767_v24 = vld [vmem:[#allocation4 + $0xee4] sm:$0xf0]  ;;  %v11340_v0 = vadd.f32 %v11331_v27, %v5039_v12  ;;  %v8119_v27 = vor.u32 %v10467_v9, %v8118_v59  ;;  %v8075_v12 = vor.u32 %v10449_v4, %v8072_v6  ;;  %v10761_v9 = vld [vmem:[#allocation4 + $0xebc] sm:$0xf]  ;;  %v9224_v6 = vld [vmem:[#allocation4 + $0xe28] sm:$0xf0] }
 0x1ff   :  { %v9319_v55 = vor.u32 %v10767_v24, %v9318_v30  ;;  %v7499_v30 = vor.u32 %v10305_v10, %v7496_v11  ;;  %v8024_v24 = vld [vmem:[#allocation4 + $0x4c8] sm:$0xf0]  ;;  %v10419_v59 = vld [vmem:[#allocation4 + $0x404] sm:$0xf0]  ;;  %v10401_v10 = vld [vmem:[#allocation4 + $0x37c] sm:$0xf] }
 0x200   :  { %5306 = vmatpush.bf16.msra.mxu1 %v7591_v33  ;;  %5345 = vmatpush.bf16.msrb.mxu0 %v8743_v50  ;;  %v7447_v33 = vor.u32 %v10299_v16, %v7446_v15  ;;  %v10461_v50 = vld [vmem:[#allocation4 + $0x55c] sm:$0xf]  ;;  %v7974_v15 = vld [vmem:[#allocation4 + $0x438] sm:$0xf]  ;;  %v10431_v16 = vld [vmem:[#allocation4 + $0x464] sm:$0xf0] }
 0x201   :  { %5336 = vmatmul.bf16.vlgmr.msrb.gmra.mxu3 %v11240_v32  ;;  %v8123_v63 = vor.u32 %v10461_v50, %v8120_v54  ;;  %v7975_v25 = vor.u32 %v10431_v16, %v7974_v15  ;;  %v10395_v4 = vld [vmem:[#allocation4 + $0x344] sm:$0xf0]  ;;  %v7880_v11 = vld [vmem:[#allocation4 + $0x3a8] sm:$0xf0]  ;;  %v8982_v15 = vld [vmem:[#allocation4 + $0xc18] sm:$0xf] }
 0x202   :  { %5268 = vmatpush.bf16.msrb.mxu2 %v8691_v38  ;;  %5380 = vmatpush.bf16.msra.mxu3 %v7787_v40  ;;  %v8168_v38 = vld [vmem:[#allocation4 + $0x5e8] sm:$0xf0]  ;;  %v9270_v40 = vld [vmem:[#allocation4 + $0xe58] sm:$0xf]  ;;  %v10683_v16 = vld [vmem:[#allocation4 + $0xc44] sm:$0xf0] }
 0x203   :  { %v8171_v48 = vor.u32 %v10473_v36, %v8168_v38  ;;  %v9271_v23 = vor.u32 %v10755_v39, %v9270_v40  ;;  %v7451_v38 = vor.u32 %v10293_v29, %v7448_v31  ;;  %v7976_v40 = vld [vmem:[#allocation4 + $0x468] sm:$0xf0]  ;;  %v9078_v39 = vld [vmem:[#allocation4 + $0xcd8] sm:$0xf]  ;;  %v7883_v31 = vor.u32 %v10401_v10, %v7880_v11  ;;  %v10689_v10 = vld [vmem:[#allocation4 + $0xc7c] sm:$0xf] }
 0x204   :  { %5307 = vmatpush.bf16.msra.mxu1 %v7543_v52  ;;  %5346 = vmatpush.bf16.msrb.mxu0 %v8695_v51  ;;  %v7595_v52 = vor.u32 %v10329_v17, %v7592_v43  ;;  %v9174_v51 = vld [vmem:[#allocation4 + $0xd98] sm:$0xf]  ;;  %v11345_v13 = vpop.f32.mrf.mxu3  ;;  %v9032_v11 = vld [vmem:[#allocation4 + $0xca8] sm:$0xf0] }
 0x206   :  { %5269 = vmatpush.bf16.msrb.mxu2 %v8643_v18  ;;  %5381 = vmatpush.bf16.msra.mxu3 %v7739_v60  ;;  %v7544_v18 = vld [vmem:[#allocation4 + $0x108] sm:$0xf0]  ;;  %v8022_v60 = vld [vmem:[#allocation4 + $0x498] sm:$0xf] }
 0x207   :  { %v7547_v5 = vor.u32 %v10317_v58, %v7544_v18  ;;  %v8023_v8 = vor.u32 %v10443_v62, %v8022_v60  ;;  %v9030_v58 = vld [vmem:[#allocation4 + $0xc78] sm:$0xf]  ;;  %v10695_v18 = vld [vmem:[#allocation4 + $0xca4] sm:$0xf0] }
 0x208   :  { %5308 = vmatpush.bf16.msra.mxu1 %v7495_v3  ;;  %5347 = vmatpush.bf16.msrb.mxu0 %v8647_v46  ;;  %v10731_v3 = vld [vmem:[#allocation4 + $0xdc4] sm:$0xf0]  ;;  %v7926_v46 = vld [vmem:[#allocation4 + $0x3d8] sm:$0xf] }
 0x209   :  { %v7927_v17 = vor.u32 %v10419_v59, %v7926_v46  ;;  %v8983_v46 = vor.u32 %v10683_v16, %v8982_v15  ;;  %v10851_v59 = vld [vmem:[#allocation4 + $0x1184] sm:$0xf0]  ;;  %v9510_v16 = vld [vmem:[#allocation4 + $0x1038] sm:$0xf] }
 0x20a   :  { %5270 = vmatpush.bf16.msrb.mxu2 %v8595_v61  ;;  %5382 = vmatpush.bf16.msra.mxu3 %v7691_v20  ;;  %v9175_v61 = vor.u32 %v10731_v3, %v9174_v51  ;;  %v10437_v20 = vld [vmem:[#allocation4 + $0x49c] sm:$0xf]  ;;  %v9031_v3 = vor.u32 %v10695_v18, %v9030_v58 }
 0x20b   :  { %v8027_v34 = vor.u32 %v10437_v20, %v8024_v24  ;;  %v10569_v20 = vld [vmem:[#allocation4 + $0x8bc] sm:$0xf] }
 0x20c   :  { %5309 = vmatpush.bf16.msra.mxu1 %v7447_v33  ;;  %5348 = vmatpush.bf16.msrb.mxu0 %v8599_v44  ;;  %v5103_v33 = vpop.f32.mrf.mxu1  ;;  %v7878_v44 = vld [vmem:[#allocation4 + $0x378] sm:$0xf]  ;;  %v5131_v45 = vpop.f32.mrf.mxu3  ;;  %v10701_v18 = vld [vmem:[#allocation4 + $0xcdc] sm:$0xf] }
 0x20d   :  { %5271 = vmatmul.bf16.vlgmr.msrb.gmra.mxu2 %v11243_v19  ;;  %v11348_v42 = vadd.f32 %v5103_v33, %v11334_v49  ;;  %v11350_v47 = vpop.f32.mrf.mxu0  ;;  %v10749_v49 = vld [vmem:[#allocation4 + $0xe5c] sm:$0xf]  ;;  %v9654_v33 = vld [vmem:[#allocation4 + $0x1158] sm:$0xf] }
 0x20e   :  { %5315 = vmatpush.bf16.msra.mxu2 %v8167_v26  ;;  %5383 = vmatpush.bf16.msra.mxu3 %v7643_v37  ;;  %v10719_v26 = vld [vmem:[#allocation4 + $0xd64] sm:$0xf0]  ;;  %v10425_v37 = vld [vmem:[#allocation4 + $0x43c] sm:$0xf]  ;;  %v9606_v45 = vld [vmem:[#allocation4 + $0x10f8] sm:$0xf] }
 0x20f   :  { %5310 = vmatmul.bf16.vlgmr.msra.gmra.mxu1 %v11228_v14  ;;  %5349 = vmatmul.bf16.vlgmr.msrb.gmra.mxu0 %v11243_v19  ;;  %v9127_v36 = vor.u32 %v10719_v26, %v9126_v22  ;;  %v10725_v26 = vld [vmem:[#allocation4 + $0xd9c] sm:$0xf] }
 0x210   :  { %5354 = vmatpush.bf16.msrb.mxu1 %v9319_v55  ;;  %5393 = vmatpush.bf16.msra.mxu0 %v8171_v48  ;;  %v9320_v55 = vld [vmem:[#allocation4 + $0xee8] sm:$0xf0]  ;;  %v10407_v48 = vld [vmem:[#allocation4 + $0x3a4] sm:$0xf0]  ;;  %v5064_v50 = vpop.f32.mrf.mxu2 }
 0x211   :  { %v9323_v43 = vor.u32 %v10761_v9, %v9320_v55  ;;  %v11353_v57 = vadd.f32 %v5064_v50, %v11340_v0  ;;  %v7879_v60 = vor.u32 %v10407_v48, %v7878_v44  ;;  %v10863_v0 = vld [vmem:[#allocation4 + $0x11e4] sm:$0xf0]  ;;  %v10389_v55 = vld [vmem:[#allocation4 + $0x31c] sm:$0xf] }
 0x212   :  { %5316 = vmatpush.bf16.msra.mxu2 %v8119_v27  ;;  %5384 = vmatpush.bf16.msra.mxu3 %v7595_v52  ;;  %v10707_v27 = vld [vmem:[#allocation4 + $0xd04] sm:$0xf0]  ;;  %v7979_v52 = vor.u32 %v10425_v37, %v7976_v40  ;;  %v10557_v40 = vld [vmem:[#allocation4 + $0x85c] sm:$0xf] }
 0x213   :  { %v9079_v54 = vor.u32 %v10707_v27, %v9078_v39  ;;  %v8504_v39 = vld [vmem:[#allocation4 + $0x888] sm:$0xf0]  ;;  %v9655_v27 = vor.u32 %v10851_v59, %v9654_v33  ;;  %v10839_v48 = vld [vmem:[#allocation4 + $0x1124] sm:$0xf0]  ;;  %v10845_v50 = vld [vmem:[#allocation4 + $0x115c] sm:$0xf] }
 0x214   :  { %5355 = vmatpush.bf16.msrb.mxu1 %v9271_v23  ;;  %5394 = vmatpush.bf16.msra.mxu0 %v8123_v63  ;;  %v9272_v23 = vld [vmem:[#allocation4 + $0xe88] sm:$0xf0]  ;;  %v7830_v63 = vld [vmem:[#allocation4 + $0x318] sm:$0xf]  ;;  %v9607_v58 = vor.u32 %v10839_v48, %v9606_v45 }
 0x215   :  { %v9275_v62 = vor.u32 %v10749_v49, %v9272_v23  ;;  %v5144_v24 = vpop.f32.mrf.mxu0  ;;  %v8507_v23 = vor.u32 %v10557_v40, %v8504_v39  ;;  %v9462_v33 = vld [vmem:[#allocation4 + $0xfd8] sm:$0xf]  ;;  %v9512_v39 = vld [vmem:[#allocation4 + $0x1068] sm:$0xf0] }
 0x216   :  { %5317 = vmatpush.bf16.msra.mxu2 %v8071_v35  ;;  %5385 = vmatpush.bf16.msra.mxu3 %v7547_v5  ;;  %v7928_v35 = vld [vmem:[#allocation4 + $0x408] sm:$0xf0]  ;;  %v10737_v5 = vld [vmem:[#allocation4 + $0xdfc] sm:$0xf]  ;;  %v9035_v24 = vor.u32 %v10689_v10, %v9032_v11  ;;  %v9414_v45 = vld [vmem:[#allocation4 + $0xf78] sm:$0xf] }
 0x217   :  { %v7931_v51 = vor.u32 %v10413_v56, %v7928_v35  ;;  %v10545_v56 = vld [vmem:[#allocation4 + $0x7fc] sm:$0xf]  ;;  %v8456_v35 = vld [vmem:[#allocation4 + $0x828] sm:$0xf0] }
 0x218   :  { %5356 = vmatpush.bf16.msrb.mxu1 %v9223_v1  ;;  %5395 = vmatpush.bf16.msra.mxu0 %v8075_v12  ;;  %v5105_v1 = vpop.f32.mrf.mxu1  ;;  %v7831_v12 = vor.u32 %v10395_v4, %v7830_v63  ;;  %v5066_v29 = vpop.f32.mrf.mxu2  ;;  %v10827_v63 = vld [vmem:[#allocation4 + $0x10c4] sm:$0xf0]  ;;  %v8459_v4 = vor.u32 %v10545_v56, %v8456_v35 }
 0x21a   :  { %5318 = vmatpush.bf16.msra.mxu2 %v8023_v8  ;;  %5386 = vmatpush.bf16.msra.mxu3 %v7499_v30  ;;  %v9702_v8 = vld [vmem:[#allocation4 + $0x11b8] sm:$0xf]  ;;  %v8552_v30 = vld [vmem:[#allocation4 + $0x8e8] sm:$0xf0] }
 0x21b   :  { %v9703_v22 = vor.u32 %v10863_v0, %v9702_v8  ;;  %v8555_v9 = vor.u32 %v10569_v20, %v8552_v30  ;;  %v8408_v8 = vld [vmem:[#allocation4 + $0x7c8] sm:$0xf0]  ;;  %v10821_v30 = vld [vmem:[#allocation4 + $0x109c] sm:$0xf] }
 0x21c   :  { %5357 = vmatpush.bf16.msrb.mxu1 %v9175_v61  ;;  %5396 = vmatpush.bf16.msra.mxu0 %v8027_v34  ;;  %v9227_v61 = vor.u32 %v10737_v5, %v9224_v6  ;;  %v7832_v34 = vld [vmem:[#allocation4 + $0x348] sm:$0xf0]  ;;  %v10833_v5 = vld [vmem:[#allocation4 + $0x10fc] sm:$0xf] }
 0x21d   :  { %v7835_v44 = vor.u32 %v10389_v55, %v7832_v34  ;;  %v8558_v55 = vld [vmem:[#allocation4 + $0x8c0] sm:$0xf]  ;;  %v10576_v34 = vld [vmem:[#allocation4 + $0x8ec] sm:$0xf0] }
 0x21e   :  { %5319 = vmatpush.bf16.msra.mxu2 %v7975_v25  ;;  %5387 = vmatpush.bf16.msra.mxu3 %v7451_v38  ;;  %v9176_v25 = vld [vmem:[#allocation4 + $0xdc8] sm:$0xf0] }
 0x21f   :  { %v9179_v37 = vor.u32 %v10725_v26, %v9176_v25  ;;  %v9704_v38 = vld [vmem:[#allocation4 + $0x11e8] sm:$0xf0]  ;;  %v10521_v26 = vld [vmem:[#allocation4 + $0x73c] sm:$0xf] }
 0x220   :  { %5358 = vmatpush.bf16.msrb.mxu1 %v9127_v36  ;;  %5397 = vmatpush.bf16.msra.mxu0 %v7979_v52  ;;  %v10857_v36 = vld [vmem:[#allocation4 + $0x11bc] sm:$0xf]  ;;  %v8360_v25 = vld [vmem:[#allocation4 + $0x768] sm:$0xf0] }
 0x221   :  { %5388 = vmatmul.bf16.vlgmr.msra.gmra.mxu3 %v11228_v14  ;;  %v9707_v49 = vor.u32 %v10857_v36, %v9704_v38  ;;  %v10809_v38 = vld [vmem:[#allocation4 + $0x103c] sm:$0xf] }
 0x222   :  { %5320 = vmatpush.bf16.msra.mxu2 %v7927_v17  ;;  %5432 = vmatpush.bf16.msrb.mxu3 %v9323_v43  ;;  %v10713_v17 = vld [vmem:[#allocation4 + $0xd3c] sm:$0xf]  ;;  %v9128_v43 = vld [vmem:[#allocation4 + $0xd68] sm:$0xf0]  ;;  %v9515_v56 = vor.u32 %v10809_v38, %v9512_v39  ;;  %v8942_v39 = vld [vmem:[#allocation4 + $0xbc0] sm:$0xf] }
 0x223   :  { %v9131_v52 = vor.u32 %v10713_v17, %v9128_v43  ;;  %v8312_v17 = vld [vmem:[#allocation4 + $0x708] sm:$0xf0]  ;;  %v10773_v38 = vld [vmem:[#allocation4 + $0xf1c] sm:$0xf] }
 0x224   :  { %5359 = vmatpush.bf16.msrb.mxu1 %v9079_v54  ;;  %5398 = vmatpush.bf16.msra.mxu0 %v7931_v51  ;;  %v9656_v54 = vld [vmem:[#allocation4 + $0x1188] sm:$0xf0]  ;;  %v11359_v15 = vpop.f32.mrf.mxu3 }
 0x225   :  { %v9659_v1 = vor.u32 %v10845_v50, %v9656_v54  ;;  %v9608_v51 = vld [vmem:[#allocation4 + $0x1128] sm:$0xf0]  ;;  %v8510_v50 = vld [vmem:[#allocation4 + $0x860] sm:$0xf] }
 0x226   :  { %5321 = vmatpush.bf16.msra.mxu2 %v7879_v60  ;;  %5433 = vmatpush.bf16.msrb.mxu3 %v9275_v62  ;;  %v9080_v60 = vld [vmem:[#allocation4 + $0xd08] sm:$0xf0]  ;;  %v9558_v62 = vld [vmem:[#allocation4 + $0x1098] sm:$0xf] }
 0x227   :  { %v9083_v6 = vor.u32 %v10701_v18, %v9080_v60  ;;  %v9559_v0 = vor.u32 %v10827_v63, %v9558_v62  ;;  %v9464_v60 = vld [vmem:[#allocation4 + $0x1008] sm:$0xf0]  ;;  %v10497_v62 = vld [vmem:[#allocation4 + $0x67c] sm:$0xf] }
 0x228   :  { %5360 = vmatpush.bf16.msrb.mxu1 %v9031_v3  ;;  %5399 = vmatpush.bf16.msra.mxu0 %v7883_v31  ;;  %v10533_v3 = vld [vmem:[#allocation4 + $0x79c] sm:$0xf]  ;;  %v8264_v63 = vld [vmem:[#allocation4 + $0x6a8] sm:$0xf0] }
 0x229   :  { %v8411_v20 = vor.u32 %v10533_v3, %v8408_v8  ;;  %v10677_v31 = vld [vmem:[#allocation4 + $0xc1c] sm:$0xf]  ;;  %v10779_v3 = vld [vmem:[#allocation4 + $0xf44] sm:$0xf0]  ;;  %v8462_v8 = vld [vmem:[#allocation4 + $0x800] sm:$0xf]  ;;  %v8267_v11 = vor.u32 %v10497_v62, %v8264_v63 }
 0x22a   :  { %5322 = vmatpush.bf16.msra.mxu2 %v7831_v12  ;;  %5434 = vmatpush.bf16.msrb.mxu3 %v9227_v61  ;;  %v10815_v12 = vld [vmem:[#allocation4 + $0x1064] sm:$0xf0]  ;;  %v9611_v61 = vor.u32 %v10833_v5, %v9608_v51  ;;  %v9366_v5 = vld [vmem:[#allocation4 + $0xf18] sm:$0xf]  ;;  %v7694_v62 = vld [vmem:[#allocation4 + $0x200] sm:$0xf] }
 0x22b   :  { %v9511_v29 = vor.u32 %v10815_v12, %v9510_v16  ;;  %v8936_v16 = vld [vmem:[#allocation4 + $0xbe8] sm:$0xf0]  ;;  %v10785_v12 = vld [vmem:[#allocation4 + $0xf7c] sm:$0xf]  ;;  %v10360_v63 = vld [vmem:[#allocation4 + $0x22c] sm:$0xf0] }
 0x22c   :  { %5361 = vmatpush.bf16.msrb.mxu1 %v8983_v46  ;;  %5400 = vmatpush.bf16.msra.mxu0 %v7835_v44  ;;  %v8984_v46 = vld [vmem:[#allocation4 + $0xc48] sm:$0xf0]  ;;  %v11361_v59 = vpop.f32.mrf.mxu1  ;;  %v8559_v44 = vor.u32 %v10576_v34, %v8558_v55  ;;  %v5183_v48 = vpop.f32.mrf.mxu3  ;;  %v10653_v34 = vld [vmem:[#allocation4 + $0xb5c] sm:$0xf] }
 0x22d   :  { %5323 = vmatmul.bf16.vlgmr.msra.gmra.mxu2 %v11232_v21  ;;  %v8987_v40 = vor.u32 %v10677_v31, %v8984_v46  ;;  %v8414_v46 = vld [vmem:[#allocation4 + $0x7a0] sm:$0xf] }
 0x22e   :  { %5367 = vmatpush.bf16.msrb.mxu2 %v9703_v22  ;;  %5435 = vmatpush.bf16.msrb.mxu3 %v9179_v37  ;;  %v9560_v22 = vld [vmem:[#allocation4 + $0x10c8] sm:$0xf0]  ;;  %v8363_v37 = vor.u32 %v10521_v26, %v8360_v25  ;;  %v7790_v26 = vld [vmem:[#allocation4 + $0x2c0] sm:$0xf]  ;;  %v10384_v25 = vld [vmem:[#allocation4 + $0x2ec] sm:$0xf0] }
 0x22f   :  { %5362 = vmatmul.bf16.vlgmr.msrb.gmra.mxu1 %v11251_v41  ;;  %5401 = vmatmul.bf16.vlgmr.msra.gmra.mxu0 %v11232_v21  ;;  %v9563_v36 = vor.u32 %v10821_v30, %v9560_v22  ;;  %v10485_v30 = vld [vmem:[#allocation4 + $0x61c] sm:$0xf]  ;;  %v8366_v48 = vld [vmem:[#allocation4 + $0x740] sm:$0xf] }
 0x230   :  { %5406 = vmatpush.bf16.msra.mxu1 %v8555_v9  ;;  %5445 = vmatpush.bf16.msrb.mxu0 %v9707_v49  ;;  %v10803_v9 = vld [vmem:[#allocation4 + $0x1004] sm:$0xf0]  ;;  %v11363_v49 = vpop.f32.mrf.mxu0  ;;  %v5116_v54 = vpop.f32.mrf.mxu2 }
 0x231   :  { %v9463_v43 = vor.u32 %v10803_v9, %v9462_v33  ;;  %v5117_v18 = vadd.f32 %v5116_v54, %v11348_v42  ;;  %v10665_v42 = vld [vmem:[#allocation4 + $0xbbc] sm:$0xf]  ;;  %v10540_v33 = vld [vmem:[#allocation4 + $0x7cc] sm:$0xf0]  ;;  %v8840_v54 = vld [vmem:[#allocation4 + $0xb28] sm:$0xf0] }
 0x232   :  { %5368 = vmatpush.bf16.msrb.mxu2 %v9655_v27  ;;  %5436 = vmatpush.bf16.msrb.mxu3 %v9131_v52  ;;  %v10509_v27 = vld [vmem:[#allocation4 + $0x6dc] sm:$0xf]  ;;  %v10564_v52 = vld [vmem:[#allocation4 + $0x88c] sm:$0xf0]  ;;  %v8939_v31 = vor.u32 %v10665_v42, %v8936_v16  ;;  %v7646_v42 = vld [vmem:[#allocation4 + $0x1a0] sm:$0xf] }
 0x233   :  { %v8315_v35 = vor.u32 %v10509_v27, %v8312_v17  ;;  %v8415_v27 = vor.u32 %v10540_v33, %v8414_v46  ;;  %v10672_v17 = vld [vmem:[#allocation4 + $0xbec] sm:$0xf0]  ;;  %v8798_v46 = vld [vmem:[#allocation4 + $0xaa0] sm:$0xf] }
 0x234   :  { %5407 = vmatpush.bf16.msra.mxu1 %v8507_v23  ;;  %5446 = vmatpush.bf16.msrb.mxu0 %v9659_v1  ;;  %v10791_v23 = vld [vmem:[#allocation4 + $0xfa4] sm:$0xf0]  ;;  %v5157_v51 = vpop.f32.mrf.mxu1  ;;  %v10348_v16 = vld [vmem:[#allocation4 + $0x1cc] sm:$0xf0] }
 0x235   :  { %v9415_v1 = vor.u32 %v10791_v23, %v9414_v45  ;;  %v10528_v23 = vld [vmem:[#allocation4 + $0x76c] sm:$0xf0]  ;;  %v8792_v51 = vld [vmem:[#allocation4 + $0xac8] sm:$0xf0] }
 0x236   :  { %5369 = vmatpush.bf16.msrb.mxu2 %v9607_v58  ;;  %5437 = vmatpush.bf16.msrb.mxu3 %v9083_v6  ;;  %v10797_v58 = vld [vmem:[#allocation4 + $0xfdc] sm:$0xf]  ;;  %v5130_v6 = vadd.f32 %v11345_v13, %v5117_v18  ;;  %v9367_v13 = vor.u32 %v10779_v3, %v9366_v5  ;;  %v8367_v18 = vor.u32 %v10528_v23, %v8366_v48  ;;  %v10516_v5 = vld [vmem:[#allocation4 + $0x70c] sm:$0xf0]  ;;  %v7550_v23 = vld [vmem:[#allocation4 + $0xe0] sm:$0xf] }
 0x237   :  { %v9467_v10 = vor.u32 %v10797_v58, %v9464_v60  ;;  %v8894_v58 = vld [vmem:[#allocation4 + $0xb60] sm:$0xf]  ;;  %v10660_v60 = vld [vmem:[#allocation4 + $0xb8c] sm:$0xf0] }
 0x238   :  { %5408 = vmatpush.bf16.msra.mxu1 %v8459_v4  ;;  %5447 = vmatpush.bf16.msrb.mxu0 %v9611_v61  ;;  %v8511_v4 = vor.u32 %v10564_v52, %v8510_v50  ;;  %v11368_v61 = vadd.f32 %v11350_v47, %v5130_v6  ;;  %v5118_v9 = vpop.f32.mrf.mxu2  ;;  %v10641_v52 = vld [vmem:[#allocation4 + $0xafc] sm:$0xf]  ;;  %v8895_v3 = vor.u32 %v10660_v60, %v8894_v58  ;;  %v10624_v48 = vld [vmem:[#allocation4 + $0xa6c] sm:$0xf0] }
 0x239   :  { %v10629_v6 = vld [vmem:[#allocation4 + $0xa9c] sm:$0xf]  ;;  %v10636_v9 = vld [vmem:[#allocation4 + $0xacc] sm:$0xf0] }
 0x23a   :  { %5370 = vmatpush.bf16.msrb.mxu2 %v9559_v0  ;;  %5438 = vmatpush.bf16.msrb.mxu3 %v9035_v24  ;;  %v10552_v0 = vld [vmem:[#allocation4 + $0x82c] sm:$0xf0]  ;;  %v8216_v24 = vld [vmem:[#allocation4 + $0x648] sm:$0xf0] }
 0x23b   :  { %v8463_v22 = vor.u32 %v10552_v0, %v8462_v8  ;;  %v8219_v55 = vor.u32 %v10485_v30, %v8216_v24  ;;  %v7695_v8 = vor.u32 %v10360_v63, %v7694_v62  ;;  %v8846_v0 = vld [vmem:[#allocation4 + $0xb00] sm:$0xf]  ;;  %v10504_v30 = vld [vmem:[#allocation4 + $0x6ac] sm:$0xf0]  ;;  %v8648_v62 = vld [vmem:[#allocation4 + $0x9a8] sm:$0xf0] }
 0x23c   :  { %5409 = vmatpush.bf16.msra.mxu1 %v8411_v20  ;;  %5448 = vmatpush.bf16.msrb.mxu0 %v9563_v36  ;;  %v9416_v20 = vld [vmem:[#allocation4 + $0xfa8] sm:$0xf0]  ;;  %v10366_v63 = vld [vmem:[#allocation4 + $0x264] sm:$0xf] }
 0x23d   :  { %v9419_v47 = vor.u32 %v10785_v12, %v9416_v20  ;;  %v8888_v36 = vld [vmem:[#allocation4 + $0xb88] sm:$0xf0]  ;;  %v8795_v12 = vor.u32 %v10629_v6, %v8792_v51  ;;  %v8270_v20 = vld [vmem:[#allocation4 + $0x680] sm:$0xf] }
 0x23e   :  { %5371 = vmatpush.bf16.msrb.mxu2 %v9511_v29  ;;  %5439 = vmatpush.bf16.msrb.mxu3 %v8987_v40  ;;  %v5196_v29 = vpop.f32.mrf.mxu0  ;;  %v9368_v40 = vld [vmem:[#allocation4 + $0xf48] sm:$0xf0]  ;;  %v8891_v45 = vor.u32 %v10653_v34, %v8888_v36  ;;  %v8271_v33 = vor.u32 %v10504_v30, %v8270_v20  ;;  %v8222_v36 = vld [vmem:[#allocation4 + $0x620] sm:$0xf] }
 0x23f   :  { %v9371_v50 = vor.u32 %v10773_v38, %v9368_v40  ;;  %v10605_v38 = vld [vmem:[#allocation4 + $0x9dc] sm:$0xf]  ;;  %v8600_v30 = vld [vmem:[#allocation4 + $0x948] sm:$0xf0] }
 0x240   :  { %5410 = vmatpush.bf16.msra.mxu1 %v8363_v37  ;;  %5449 = vmatpush.bf16.msrb.mxu0 %v9515_v56  ;;  %v7791_v37 = vor.u32 %v10384_v25, %v7790_v26  ;;  %v8943_v56 = vor.u32 %v10672_v17, %v8942_v39  ;;  %v1934_v26 = vperm.slane %v11327_v7, 4  ;;  %v1935_v25 = vperm.slane %v11327_v7, 5  ;;  %v8696_v39 = vld [vmem:[#allocation4 + $0xa08] sm:$0xf0]  ;;  %v7792_v7 = vld [vmem:[#allocation4 + $0x2f0] sm:$0xf0] }
 0x241   :  { %5440 = vmatmul.bf16.vlgmr.msrb.gmra.mxu3 %v11251_v41  ;;  %v8799_v17 = vor.u32 %v10636_v9, %v8798_v46  ;;  %v10600_v46 = vld [vmem:[#allocation4 + $0x9ac] sm:$0xf0] }
 0x242   :  { %5372 = vmatpush.bf16.msrb.mxu2 %v9463_v43  ;;  %5484 = vmatpush.bf16.msra.mxu3 %v8559_v44  ;;  %v7742_v43 = vld [vmem:[#allocation4 + $0x260] sm:$0xf]  ;;  %v10372_v44 = vld [vmem:[#allocation4 + $0x28c] sm:$0xf0]  ;;  %v5156_v58 = vadd.f32 %v11361_v59, %v1934_v26 }
 0x243   :  { %v10300_v9 = vld [vmem:[#allocation4 + $0x4c] sm:$0xf0] }
 0x244   :  { %5411 = vmatpush.bf16.msra.mxu1 %v8315_v35  ;;  %5450 = vmatpush.bf16.msrb.mxu0 %v9467_v10  ;;  %v7743_v35 = vor.u32 %v10372_v44, %v7742_v43  ;;  %v5233_v24 = vpop.f32.mrf.mxu3  ;;  %v8750_v44 = vld [vmem:[#allocation4 + $0xa40] sm:$0xf] }
 0x245   :  { %v8751_v6 = vor.u32 %v10624_v48, %v8750_v44 }
 0x246   :  { %5373 = vmatpush.bf16.msrb.mxu2 %v9415_v1  ;;  %5485 = vmatpush.bf16.msra.mxu3 %v8511_v4  ;;  %v8843_v1 = vor.u32 %v10641_v52, %v8840_v54  ;;  %v8318_v4 = vld [vmem:[#allocation4 + $0x6e0] sm:$0xf]  ;;  %v5234_v52 = vadd.f32 %v5233_v24, %v1935_v25  ;;  %v8699_v54 = vor.u32 %v10605_v38, %v8696_v39  ;;  %v10354_v24 = vld [vmem:[#allocation4 + $0x204] sm:$0xf] }
 0x247   :  { %v8319_v10 = vor.u32 %v10516_v5, %v8318_v4  ;;  %v8174_v25 = vld [vmem:[#allocation4 + $0x5c0] sm:$0xf]  ;;  %v10342_v39 = vld [vmem:[#allocation4 + $0x1a4] sm:$0xf] }
 0x248   :  { %5412 = vmatpush.bf16.msra.mxu1 %v8267_v11  ;;  %5451 = vmatpush.bf16.msrb.mxu0 %v9419_v47  ;;  %v10648_v11 = vld [vmem:[#allocation4 + $0xb2c] sm:$0xf0]  ;;  %v7598_v47 = vld [vmem:[#allocation4 + $0x140] sm:$0xf] }
 0x249   :  { %v8847_v29 = vor.u32 %v10648_v11, %v8846_v0  ;;  %v10612_v0 = vld [vmem:[#allocation4 + $0xa0c] sm:$0xf0] }
 0x24a   :  { %5374 = vmatpush.bf16.msrb.mxu2 %v9367_v13  ;;  %5486 = vmatpush.bf16.msra.mxu3 %v8463_v22  ;;  %v10617_v13 = vld [vmem:[#allocation4 + $0xa3c] sm:$0xf]  ;;  %v8744_v22 = vld [vmem:[#allocation4 + $0xa68] sm:$0xf0]  ;;  %v10312_v11 = vld [vmem:[#allocation4 + $0xac] sm:$0xf0] }
 0x24b   :  { %v8747_v34 = vor.u32 %v10617_v13, %v8744_v22  ;;  %v7696_v13 = vld [vmem:[#allocation4 + $0x230] sm:$0xf0] }
 0x24c   :  { %5413 = vmatpush.bf16.msra.mxu1 %v8219_v55  ;;  %5452 = vmatpush.bf16.msrb.mxu0 %v9371_v50  ;;  %v10336_v55 = vld [vmem:[#allocation4 + $0x16c] sm:$0xf0]  ;;  %v11376_v40 = vpop.f32.mrf.mxu1  ;;  %v5246_v60 = vpop.f32.mrf.mxu0 }
 0x24d   :  { %5375 = vmatmul.bf16.vlgmr.msrb.gmra.mxu2 %v11262_v2  ;;  %v7599_v43 = vor.u32 %v10336_v55, %v7598_v47  ;;  %v10324_v50 = vld [vmem:[#allocation4 + $0x10c] sm:$0xf0]  ;;  %v11379_v4 = vadd.f32 %v5246_v60, %v5234_v52  ;;  %v7699_v55 = vor.u32 %v10354_v24, %v7696_v13  ;;  %v10474_v52 = vld [vmem:[#allocation4 + $0x5c4] sm:$0xf]  ;;  %v7600_v60 = vld [vmem:[#allocation4 + $0x170] sm:$0xf0] }
 0x24e   :  { %5419 = vmatpush.bf16.msra.mxu2 %v8939_v31  ;;  %5487 = vmatpush.bf16.msra.mxu3 %v8415_v27  ;;  %v7647_v31 = vor.u32 %v10348_v16, %v7646_v42  ;;  %v10378_v27 = vld [vmem:[#allocation4 + $0x2c4] sm:$0xf]  ;;  %v7551_v51 = vor.u32 %v10324_v50, %v7550_v23  ;;  %v10581_v16 = vld [vmem:[#allocation4 + $0x91c] sm:$0xf]  ;;  %v8606_v23 = vld [vmem:[#allocation4 + $0x920] sm:$0xf] }
 0x24f   :  { %5414 = vmatmul.bf16.vlgmr.msra.gmra.mxu1 %v11240_v32  ;;  %5453 = vmatmul.bf16.vlgmr.msrb.gmra.mxu0 %v11262_v2  ;;  %v10588_v50 = vld [vmem:[#allocation4 + $0x94c] sm:$0xf0]  ;;  %v10450_v24 = vld [vmem:[#allocation4 + $0x504] sm:$0xf] }
 0x250   :  { %5458 = vmatpush.bf16.msrb.mxu1 %v7791_v37  ;;  %5497 = vmatpush.bf16.msra.mxu0 %v8943_v56  ;;  %v10492_v37 = vld [vmem:[#allocation4 + $0x64c] sm:$0xf0]  ;;  %v7795_v56 = vor.u32 %v10378_v27, %v7792_v7  ;;  %v5168_v5 = vpop.f32.mrf.mxu2  ;;  %v7648_v27 = vld [vmem:[#allocation4 + $0x1d0] sm:$0xf0] }
 0x252   :  { %5420 = vmatpush.bf16.msra.mxu2 %v8891_v45  ;;  %5488 = vmatpush.bf16.msra.mxu3 %v8367_v18  ;;  %v8223_v45 = vor.u32 %v10492_v37, %v8222_v36  ;;  %v5235_v18 = vpop.f32.mrf.mxu3  ;;  %v10768_v36 = vld [vmem:[#allocation4 + $0xeec] sm:$0xf0] }
 0x253   :  { %v10330_v18 = vld [vmem:[#allocation4 + $0x144] sm:$0xf] }
 0x254   :  { %5459 = vmatpush.bf16.msrb.mxu1 %v7743_v35  ;;  %5498 = vmatpush.bf16.msra.mxu0 %v8895_v3  ;;  %v10593_v35 = vld [vmem:[#allocation4 + $0x97c] sm:$0xf]  ;;  %v8702_v3 = vld [vmem:[#allocation4 + $0x9e0] sm:$0xf]  ;;  %v5209_v20 = vpop.f32.mrf.mxu1  ;;  %v5248_v37 = vpop.f32.mrf.mxu0 }
 0x255   :  { %v8651_v59 = vor.u32 %v10593_v35, %v8648_v62  ;;  %v8703_v22 = vor.u32 %v10612_v0, %v8702_v3  ;;  %v9278_v35 = vld [vmem:[#allocation4 + $0xe60] sm:$0xf]  ;;  %v8607_v62 = vor.u32 %v10588_v50, %v8606_v23  ;;  %v7603_v3 = vor.u32 %v10330_v18, %v7600_v60  ;;  %v8032_v37 = vld [vmem:[#allocation4 + $0x4d0] sm:$0xf0]  ;;  %v10708_v18 = vld [vmem:[#allocation4 + $0xd0c] sm:$0xf0] }
 0x256   :  { %5421 = vmatpush.bf16.msra.mxu2 %v8843_v1  ;;  %5489 = vmatpush.bf16.msra.mxu3 %v8319_v10  ;;  %v7744_v1 = vld [vmem:[#allocation4 + $0x290] sm:$0xf0]  ;;  %v7502_v10 = vld [vmem:[#allocation4 + $0x80] sm:$0xf] }
 0x257   :  { %v7747_v42 = vor.u32 %v10366_v63, %v7744_v1  ;;  %v7503_v26 = vor.u32 %v10312_v11, %v7502_v10  ;;  %v8078_v63 = vld [vmem:[#allocation4 + $0x500] sm:$0xf]  ;;  %v10456_v1 = vld [vmem:[#allocation4 + $0x52c] sm:$0xf0]  ;;  %v9328_v23 = vld [vmem:[#allocation4 + $0xef0] sm:$0xf0] }
 0x258   :  { %5460 = vmatpush.bf16.msrb.mxu1 %v7695_v8  ;;  %5499 = vmatpush.bf16.msra.mxu0 %v8847_v29  ;;  %v5169_v8 = vadd.f32 %v5168_v5, %v5156_v58  ;;  %v10480_v29 = vld [vmem:[#allocation4 + $0x5ec] sm:$0xf0]  ;;  %v9230_v0 = vld [vmem:[#allocation4 + $0xe00] sm:$0xf]  ;;  %v8079_v11 = vor.u32 %v10456_v1, %v8078_v63 }
 0x259   :  { %v8175_v38 = vor.u32 %v10480_v29, %v8174_v25  ;;  %v10756_v58 = vld [vmem:[#allocation4 + $0xe8c] sm:$0xf0]  ;;  %v7886_v63 = vld [vmem:[#allocation4 + $0x380] sm:$0xf] }
 0x25a   :  { %5422 = vmatpush.bf16.msra.mxu2 %v8795_v12  ;;  %5490 = vmatpush.bf16.msra.mxu3 %v8271_v33  ;;  %v5182_v12 = vadd.f32 %v11359_v15, %v5169_v8  ;;  %v7454_v33 = vld [vmem:[#allocation4 + $0x20] sm:$0xf]  ;;  %v8603_v15 = vor.u32 %v10581_v16, %v8600_v30  ;;  %v8128_v8 = vld [vmem:[#allocation4 + $0x590] sm:$0xf0]  ;;  %v10744_v10 = vld [vmem:[#allocation4 + $0xe2c] sm:$0xf0] }
 0x25b   :  { %v7455_v44 = vor.u32 %v10300_v9, %v7454_v33  ;;  %v8030_v16 = vld [vmem:[#allocation4 + $0x4a0] sm:$0xf]  ;;  %v9231_v30 = vor.u32 %v10744_v10, %v9230_v0  ;;  %v10732_v25 = vld [vmem:[#allocation4 + $0xdcc] sm:$0xf0]  ;;  %v10414_v10 = vld [vmem:[#allocation4 + $0x3e4] sm:$0xf] }
 0x25c   :  { %5461 = vmatpush.bf16.msrb.mxu1 %v7647_v31  ;;  %5500 = vmatpush.bf16.msra.mxu0 %v8799_v17  ;;  %v8654_v31 = vld [vmem:[#allocation4 + $0x980] sm:$0xf]  ;;  %v5195_v47 = vadd.f32 %v11363_v49, %v5182_v12  ;;  %v5170_v17 = vpop.f32.mrf.mxu2  ;;  %v10468_v49 = vld [vmem:[#allocation4 + $0x58c] sm:$0xf0] }
 0x25d   :  { %v10444_v12 = vld [vmem:[#allocation4 + $0x4cc] sm:$0xf0]  ;;  %v7982_v9 = vld [vmem:[#allocation4 + $0x440] sm:$0xf]  ;;  %v10294_v17 = vld [vmem:[#allocation4 + $0x24] sm:$0xf] }
 0x25e   :  { %5423 = vmatpush.bf16.msra.mxu2 %v8747_v34  ;;  %5491 = vmatpush.bf16.msra.mxu3 %v8223_v45  ;;  %v9326_v34 = vld [vmem:[#allocation4 + $0xec0] sm:$0xf]  ;;  %v11385_v7 = vadd.f32 %v11376_v40, %v5195_v47  ;;  %v8031_v29 = vor.u32 %v10444_v12, %v8030_v16  ;;  %v10432_v47 = vld [vmem:[#allocation4 + $0x46c] sm:$0xf0] }
 0x25f   :  { %v8126_v45 = vld [vmem:[#allocation4 + $0x560] sm:$0xf]  ;;  %v9327_v48 = vor.u32 %v10768_v36, %v9326_v34  ;;  %v10438_v34 = vld [vmem:[#allocation4 + $0x4a4] sm:$0xf]  ;;  %v10696_v16 = vld [vmem:[#allocation4 + $0xcac] sm:$0xf0] }
 0x260   :  { %5462 = vmatpush.bf16.msrb.mxu1 %v7599_v43  ;;  %5501 = vmatpush.bf16.msra.mxu0 %v8751_v6  ;;  %v8655_v43 = vor.u32 %v10600_v46, %v8654_v31  ;;  %v8127_v40 = vor.u32 %v10468_v49, %v8126_v45  ;;  %v9279_v6 = vor.u32 %v10756_v58, %v9278_v35  ;;  %v10306_v31 = vld [vmem:[#allocation4 + $0x84] sm:$0xf]  ;;  %v7504_v46 = vld [vmem:[#allocation4 + $0xb0] sm:$0xf0]  ;;  %v10420_v49 = vld [vmem:[#allocation4 + $0x40c] sm:$0xf0] }
 0x261   :  { %5492 = vmatmul.bf16.vlgmr.msra.gmra.mxu3 %v11240_v32  ;;  %v7507_v36 = vor.u32 %v10306_v31, %v7504_v46  ;;  %v7984_v58 = vld [vmem:[#allocation4 + $0x470] sm:$0xf0]  ;;  %v9710_v31 = vld [vmem:[#allocation4 + $0x11c0] sm:$0xf]  ;;  %v10402_v46 = vld [vmem:[#allocation4 + $0x384] sm:$0xf] }
 0x262   :  { %5424 = vmatpush.bf16.msra.mxu2 %v8699_v54  ;;  %5536 = vmatpush.bf16.msrb.mxu3 %v7795_v56  ;;  %v7651_v54 = vor.u32 %v10342_v39, %v7648_v27  ;;  %v8176_v56 = vld [vmem:[#allocation4 + $0x5f0] sm:$0xf0]  ;;  %v10720_v39 = vld [vmem:[#allocation4 + $0xd6c] sm:$0xf0]  ;;  %v7983_v27 = vor.u32 %v10432_v47, %v7982_v9  ;;  %v8990_v47 = vld [vmem:[#allocation4 + $0xc20] sm:$0xf] }
 0x263   :  { %v8179_v5 = vor.u32 %v10474_v52, %v8176_v56  ;;  %v8035_v52 = vor.u32 %v10438_v34, %v8032_v37  ;;  %v10426_v56 = vld [vmem:[#allocation4 + $0x444] sm:$0xf]  ;;  %v7888_v9 = vld [vmem:[#allocation4 + $0x3b0] sm:$0xf0] }
 0x264   :  { %5463 = vmatpush.bf16.msrb.mxu1 %v7551_v51  ;;  %5502 = vmatpush.bf16.msra.mxu0 %v8703_v22  ;;  %v10462_v51 = vld [vmem:[#allocation4 + $0x564] sm:$0xf]  ;;  %v8080_v22 = vld [vmem:[#allocation4 + $0x530] sm:$0xf0]  ;;  %v11390_v33 = vpop.f32.mrf.mxu3 }
 0x265   :  { %v8131_v20 = vor.u32 %v10462_v51, %v8128_v8  ;;  %v9280_v51 = vld [vmem:[#allocation4 + $0xe90] sm:$0xf0]  ;;  %v7987_v8 = vor.u32 %v10426_v56, %v7984_v58  ;;  %v10858_v56 = vld [vmem:[#allocation4 + $0x11c4] sm:$0xf] }
 0x266   :  { %5425 = vmatpush.bf16.msra.mxu2 %v8651_v59  ;;  %5537 = vmatpush.bf16.msrb.mxu3 %v7747_v42  ;;  %v10318_v59 = vld [vmem:[#allocation4 + $0xe4] sm:$0xf]  ;;  %v7552_v42 = vld [vmem:[#allocation4 + $0x110] sm:$0xf0] }
 0x267   :  { %v7555_v13 = vor.u32 %v10318_v59, %v7552_v42  ;;  %v7936_v59 = vld [vmem:[#allocation4 + $0x410] sm:$0xf0]  ;;  %v9038_v42 = vld [vmem:[#allocation4 + $0xc80] sm:$0xf] }
 0x268   :  { %5464 = vmatpush.bf16.msrb.mxu1 %v7503_v26  ;;  %5503 = vmatpush.bf16.msra.mxu0 %v8655_v43  ;;  %v9182_v26 = vld [vmem:[#allocation4 + $0xda0] sm:$0xf]  ;;  %v7456_v43 = vld [vmem:[#allocation4 + $0x50] sm:$0xf0] }
 0x269   :  { %v7459_v35 = vor.u32 %v10294_v17, %v7456_v43  ;;  %v8560_v37 = vld [vmem:[#allocation4 + $0x8f0] sm:$0xf0] }
 0x26a   :  { %5426 = vmatpush.bf16.msra.mxu2 %v8603_v15  ;;  %5538 = vmatpush.bf16.msrb.mxu3 %v7699_v55  ;;  %v8083_v15 = vor.u32 %v10450_v24, %v8080_v22  ;;  %v9183_v55 = vor.u32 %v10732_v25, %v9182_v26  ;;  %v10738_v22 = vld [vmem:[#allocation4 + $0xe04] sm:$0xf]  ;;  %v9232_v26 = vld [vmem:[#allocation4 + $0xe30] sm:$0xf0]  ;;  %v7939_v25 = vor.u32 %v10414_v10, %v7936_v59 }
 0x26b   :  { %v9235_v34 = vor.u32 %v10738_v22, %v9232_v26  ;;  %v9184_v17 = vld [vmem:[#allocation4 + $0xdd0] sm:$0xf0]  ;;  %v10546_v59 = vld [vmem:[#allocation4 + $0x804] sm:$0xf] }
 0x26c   :  { %5465 = vmatpush.bf16.msrb.mxu1 %v7455_v44  ;;  %5504 = vmatpush.bf16.msra.mxu0 %v8607_v62  ;;  %v7934_v44 = vld [vmem:[#allocation4 + $0x3e0] sm:$0xf]  ;;  %v5259_v45 = vpop.f32.mrf.mxu1  ;;  %v5287_v1 = vpop.f32.mrf.mxu3  ;;  %v9712_v58 = vld [vmem:[#allocation4 + $0x11f0] sm:$0xf0]  ;;  %v10834_v26 = vld [vmem:[#allocation4 + $0x1104] sm:$0xf] }
 0x26d   :  { %5427 = vmatmul.bf16.vlgmr.msra.gmra.mxu2 %v11243_v19  ;;  %v11393_v50 = vadd.f32 %v5259_v45, %v11379_v4  ;;  %v7935_v60 = vor.u32 %v10420_v49, %v7934_v44  ;;  %v10750_v4 = vld [vmem:[#allocation4 + $0xe64] sm:$0xf]  ;;  %v7891_v44 = vor.u32 %v10402_v46, %v7888_v9  ;;  %v9662_v49 = vld [vmem:[#allocation4 + $0x1160] sm:$0xf]  ;;  %v9664_v10 = vld [vmem:[#allocation4 + $0x1190] sm:$0xf0] }
 0x26e   :  { %5471 = vmatpush.bf16.msrb.mxu2 %v8175_v38  ;;  %5539 = vmatpush.bf16.msrb.mxu3 %v7651_v54  ;;  %v9134_v38 = vld [vmem:[#allocation4 + $0xd40] sm:$0xf]  ;;  %v10690_v9 = vld [vmem:[#allocation4 + $0xc84] sm:$0xf] }
 0x26f   :  { %5466 = vmatmul.bf16.vlgmr.msrb.gmra.mxu1 %v11228_v14  ;;  %5505 = vmatmul.bf16.vlgmr.msra.gmra.mxu0 %v11243_v19  ;;  %v9135_v54 = vor.u32 %v10720_v39, %v9134_v38 }
 0x270   :  { %5510 = vmatpush.bf16.msra.mxu1 %v9327_v48  ;;  %5549 = vmatpush.bf16.msrb.mxu0 %v8179_v5  ;;  %v10762_v48 = vld [vmem:[#allocation4 + $0xec4] sm:$0xf]  ;;  %v11395_v5 = vpop.f32.mrf.mxu0 }
 0x271   :  { %v9331_v62 = vor.u32 %v10762_v48, %v9328_v23  ;;  %v10852_v48 = vld [vmem:[#allocation4 + $0x118c] sm:$0xf0] }
 0x272   :  { %5472 = vmatpush.bf16.msrb.mxu2 %v8127_v40  ;;  %5540 = vmatpush.bf16.msrb.mxu3 %v7603_v3  ;;  %v9086_v40 = vld [vmem:[#allocation4 + $0xce0] sm:$0xf]  ;;  %v5220_v3 = vpop.f32.mrf.mxu2 }
 0x273   :  { %v9087_v0 = vor.u32 %v10708_v18, %v9086_v40  ;;  %v10558_v40 = vld [vmem:[#allocation4 + $0x864] sm:$0xf]  ;;  %v8512_v18 = vld [vmem:[#allocation4 + $0x890] sm:$0xf0] }
 0x274   :  { %5511 = vmatpush.bf16.msra.mxu1 %v9279_v6  ;;  %5550 = vmatpush.bf16.msrb.mxu0 %v8131_v20  ;;  %v10408_v6 = vld [vmem:[#allocation4 + $0x3ac] sm:$0xf0]  ;;  %v9283_v20 = vor.u32 %v10750_v4, %v9280_v51  ;;  %v5261_v24 = vpop.f32.mrf.mxu1  ;;  %v9715_v51 = vor.u32 %v10858_v56, %v9712_v58  ;;  %v10577_v56 = vld [vmem:[#allocation4 + $0x8f4] sm:$0xf0] }
 0x275   :  { %v7887_v12 = vor.u32 %v10408_v6, %v7886_v63  ;;  %v9136_v63 = vld [vmem:[#allocation4 + $0xd70] sm:$0xf0]  ;;  %v9614_v6 = vld [vmem:[#allocation4 + $0x1100] sm:$0xf]  ;;  %v10840_v4 = vld [vmem:[#allocation4 + $0x112c] sm:$0xf0] }
 0x276   :  { %5473 = vmatpush.bf16.msrb.mxu2 %v8079_v11  ;;  %5541 = vmatpush.bf16.msrb.mxu3 %v7555_v13  ;;  %v11398_v11 = vadd.f32 %v5220_v3, %v11385_v7  ;;  %v10396_v13 = vld [vmem:[#allocation4 + $0x34c] sm:$0xf0]  ;;  %v8515_v3 = vor.u32 %v10558_v40, %v8512_v18  ;;  %v10810_v40 = vld [vmem:[#allocation4 + $0x1044] sm:$0xf] }
 0x277   :  { %v10864_v7 = vld [vmem:[#allocation4 + $0x11ec] sm:$0xf0] }
 0x278   :  { %5512 = vmatpush.bf16.msra.mxu1 %v9231_v30  ;;  %5551 = vmatpush.bf16.msrb.mxu0 %v8083_v15  ;;  %v7838_v30 = vld [vmem:[#allocation4 + $0x320] sm:$0xf]  ;;  %v10684_v15 = vld [vmem:[#allocation4 + $0xc4c] sm:$0xf0]  ;;  %v5300_v38 = vpop.f32.mrf.mxu0  ;;  %v9711_v39 = vor.u32 %v10864_v7, %v9710_v31  ;;  %v10534_v31 = vld [vmem:[#allocation4 + $0x7a4] sm:$0xf] }
 0x279   :  { %v8991_v45 = vor.u32 %v10684_v15, %v8990_v47  ;;  %v10828_v24 = vld [vmem:[#allocation4 + $0x10cc] sm:$0xf0]  ;;  %v8416_v7 = vld [vmem:[#allocation4 + $0x7d0] sm:$0xf0]  ;;  %v10822_v38 = vld [vmem:[#allocation4 + $0x10a4] sm:$0xf] }
 0x27a   :  { %5474 = vmatpush.bf16.msrb.mxu2 %v8031_v29  ;;  %5542 = vmatpush.bf16.msrb.mxu3 %v7507_v36  ;;  %v9039_v29 = vor.u32 %v10696_v16, %v9038_v42  ;;  %v10570_v36 = vld [vmem:[#allocation4 + $0x8c4] sm:$0xf]  ;;  %v5222_v43 = vpop.f32.mrf.mxu2  ;;  %v8464_v42 = vld [vmem:[#allocation4 + $0x830] sm:$0xf0]  ;;  %v9615_v16 = vor.u32 %v10840_v4, %v9614_v6  ;;  %v9422_v4 = vld [vmem:[#allocation4 + $0xf80] sm:$0xf] }
 0x27b   :  { %v8563_v23 = vor.u32 %v10570_v36, %v8560_v37  ;;  %v8467_v22 = vor.u32 %v10546_v59, %v8464_v42  ;;  %v9040_v47 = vld [vmem:[#allocation4 + $0xcb0] sm:$0xf0]  ;;  %v8419_v37 = vor.u32 %v10534_v31, %v8416_v7  ;;  %v10780_v7 = vld [vmem:[#allocation4 + $0xf4c] sm:$0xf0] }
 0x27c   :  { %5513 = vmatpush.bf16.msra.mxu1 %v9183_v55  ;;  %5552 = vmatpush.bf16.msrb.mxu0 %v8035_v52  ;;  %v7839_v55 = vor.u32 %v10396_v13, %v7838_v30  ;;  %v10390_v52 = vld [vmem:[#allocation4 + $0x324] sm:$0xf]  ;;  %v9566_v30 = vld [vmem:[#allocation4 + $0x10a0] sm:$0xf]  ;;  %v8368_v43 = vld [vmem:[#allocation4 + $0x770] sm:$0xf0] }
 0x27d   :  { %v9567_v46 = vor.u32 %v10828_v24, %v9566_v30  ;;  %v9472_v30 = vld [vmem:[#allocation4 + $0x1010] sm:$0xf0]  ;;  %v10498_v24 = vld [vmem:[#allocation4 + $0x684] sm:$0xf] }
 0x27e   :  { %5475 = vmatpush.bf16.msrb.mxu2 %v7983_v27  ;;  %5543 = vmatpush.bf16.msrb.mxu3 %v7459_v35  ;;  %v10726_v27 = vld [vmem:[#allocation4 + $0xda4] sm:$0xf] }
 0x27f   :  { %v9187_v35 = vor.u32 %v10726_v27, %v9184_v17  ;;  %v9568_v27 = vld [vmem:[#allocation4 + $0x10d0] sm:$0xf0]  ;;  %v10522_v17 = vld [vmem:[#allocation4 + $0x744] sm:$0xf] }
 0x280   :  { %5514 = vmatpush.bf16.msra.mxu1 %v9135_v54  ;;  %5553 = vmatpush.bf16.msrb.mxu0 %v7987_v8  ;;  %v7840_v54 = vld [vmem:[#allocation4 + $0x350] sm:$0xf0]  ;;  %v10846_v8 = vld [vmem:[#allocation4 + $0x1164] sm:$0xf]  ;;  %v8371_v58 = vor.u32 %v10522_v17, %v8368_v43  ;;  %v7798_v43 = vld [vmem:[#allocation4 + $0x2c8] sm:$0xf] }
 0x281   :  { %5544 = vmatmul.bf16.vlgmr.msrb.gmra.mxu3 %v11228_v14  ;;  %v7843_v1 = vor.u32 %v10390_v52, %v7840_v54  ;;  %v9667_v13 = vor.u32 %v10846_v8, %v9664_v10  ;;  %v10804_v52 = vld [vmem:[#allocation4 + $0x100c] sm:$0xf0]  ;;  %v8566_v54 = vld [vmem:[#allocation4 + $0x8c8] sm:$0xf]  ;;  %v10565_v10 = vld [vmem:[#allocation4 + $0x894] sm:$0xf0] }
 0x282   :  { %5476 = vmatpush.bf16.msrb.mxu2 %v7935_v60  ;;  %5588 = vmatpush.bf16.msra.mxu3 %v9331_v62  ;;  %v9663_v60 = vor.u32 %v10852_v48, %v9662_v49  ;;  %v10714_v62 = vld [vmem:[#allocation4 + $0xd44] sm:$0xf]  ;;  %v8992_v49 = vld [vmem:[#allocation4 + $0xc50] sm:$0xf0]  ;;  %v9470_v48 = vld [vmem:[#allocation4 + $0xfe0] sm:$0xf]  ;;  %v8567_v6 = vor.u32 %v10577_v56, %v8566_v54 }
 0x283   :  { %v10792_v8 = vld [vmem:[#allocation4 + $0xfac] sm:$0xf0] }
 0x284   :  { %5515 = vmatpush.bf16.msra.mxu1 %v9087_v0  ;;  %5554 = vmatpush.bf16.msrb.mxu0 %v7939_v25  ;;  %v9139_v0 = vor.u32 %v10714_v62, %v9136_v63  ;;  %v11404_v15 = vpop.f32.mrf.mxu3  ;;  %v10510_v62 = vld [vmem:[#allocation4 + $0x6e4] sm:$0xf]  ;;  %v8320_v63 = vld [vmem:[#allocation4 + $0x710] sm:$0xf0] }
 0x286   :  { %5477 = vmatpush.bf16.msrb.mxu2 %v7887_v12  ;;  %5589 = vmatpush.bf16.msra.mxu3 %v9283_v20  ;;  %v10702_v12 = vld [vmem:[#allocation4 + $0xce4] sm:$0xf]  ;;  %v9088_v20 = vld [vmem:[#allocation4 + $0xd10] sm:$0xf0] }
 0x287   :  { %v9091_v25 = vor.u32 %v10702_v12, %v9088_v20  ;;  %v10798_v12 = vld [vmem:[#allocation4 + $0xfe4] sm:$0xf] }
 0x288   :  { %5516 = vmatpush.bf16.msra.mxu1 %v9039_v29  ;;  %5555 = vmatpush.bf16.msrb.mxu0 %v7891_v44  ;;  %v9616_v29 = vld [vmem:[#allocation4 + $0x1130] sm:$0xf0] }
 0x289   :  { %v9619_v36 = vor.u32 %v10834_v26, %v9616_v29 }
 0x28a   :  { %5478 = vmatpush.bf16.msrb.mxu2 %v7839_v55  ;;  %5590 = vmatpush.bf16.msra.mxu3 %v9235_v34  ;;  %v9518_v55 = vld [vmem:[#allocation4 + $0x1040] sm:$0xf]  ;;  %v10816_v34 = vld [vmem:[#allocation4 + $0x106c] sm:$0xf0] }
 0x28b   :  { %v9519_v44 = vor.u32 %v10816_v34, %v9518_v55  ;;  %v8944_v34 = vld [vmem:[#allocation4 + $0xbf0] sm:$0xf0] }
 0x28c   :  { %5517 = vmatpush.bf16.msra.mxu1 %v8991_v45  ;;  %5556 = vmatpush.bf16.msrb.mxu0 %v7843_v1  ;;  %v10678_v45 = vld [vmem:[#allocation4 + $0xc24] sm:$0xf]  ;;  %v9471_v1 = vor.u32 %v10804_v52, %v9470_v48  ;;  %v8422_v48 = vld [vmem:[#allocation4 + $0x7a8] sm:$0xf]  ;;  %v10541_v52 = vld [vmem:[#allocation4 + $0x7d4] sm:$0xf0] }
 0x28d   :  { %5479 = vmatmul.bf16.vlgmr.msrb.gmra.mxu2 %v11232_v21  ;;  %v8995_v18 = vor.u32 %v10678_v45, %v8992_v49 }
 0x28e   :  { %5523 = vmatpush.bf16.msra.mxu2 %v9711_v39  ;;  %5591 = vmatpush.bf16.msra.mxu3 %v9187_v35  ;;  %v9043_v39 = vor.u32 %v10690_v9, %v9040_v47  ;;  %v9571_v35 = vor.u32 %v10822_v38, %v9568_v27  ;;  %v10553_v9 = vld [vmem:[#allocation4 + $0x834] sm:$0xf0]  ;;  %v9475_v47 = vor.u32 %v10798_v12, %v9472_v30  ;;  %v9424_v38 = vld [vmem:[#allocation4 + $0xfb0] sm:$0xf0] }
 0x28f   :  { %5518 = vmatmul.bf16.vlgmr.msra.gmra.mxu1 %v11251_v41  ;;  %5557 = vmatmul.bf16.vlgmr.msrb.gmra.mxu0 %v11232_v21  ;;  %v8224_v27 = vld [vmem:[#allocation4 + $0x650] sm:$0xf0] }
 0x290   :  { %5562 = vmatpush.bf16.msrb.mxu1 %v8563_v23  ;;  %5601 = vmatpush.bf16.msra.mxu0 %v9715_v51  ;;  %v11406_v23 = vpop.f32.mrf.mxu1  ;;  %v5339_v51 = vpop.f32.mrf.mxu3 }
 0x291   :  { %v5272_v59 = vpop.f32.mrf.mxu2 }
 0x292   :  { %5524 = vmatpush.bf16.msra.mxu2 %v9663_v60  ;;  %5592 = vmatpush.bf16.msra.mxu3 %v9139_v0  ;;  %v9520_v60 = vld [vmem:[#allocation4 + $0x1070] sm:$0xf0]  ;;  %v8518_v0 = vld [vmem:[#allocation4 + $0x868] sm:$0xf]  ;;  %v5273_v20 = vadd.f32 %v5272_v59, %v11393_v50  ;;  %v10666_v50 = vld [vmem:[#allocation4 + $0xbc4] sm:$0xf] }
 0x293   :  { %v9523_v42 = vor.u32 %v10810_v40, %v9520_v60  ;;  %v8519_v26 = vor.u32 %v10565_v10, %v8518_v0  ;;  %v8947_v49 = vor.u32 %v10666_v50, %v8944_v34  ;;  %v9376_v60 = vld [vmem:[#allocation4 + $0xf50] sm:$0xf0]  ;;  %v10529_v0 = vld [vmem:[#allocation4 + $0x774] sm:$0xf0]  ;;  %v10642_v59 = vld [vmem:[#allocation4 + $0xb04] sm:$0xf] }
 0x294   :  { %5563 = vmatpush.bf16.msrb.mxu1 %v8515_v3  ;;  %5602 = vmatpush.bf16.msra.mxu0 %v9667_v13  ;;  %v11408_v3 = vpop.f32.mrf.mxu0  ;;  %v8272_v13 = vld [vmem:[#allocation4 + $0x6b0] sm:$0xf0]  ;;  %v5286_v29 = vadd.f32 %v11390_v33, %v5273_v20  ;;  %v8902_v20 = vld [vmem:[#allocation4 + $0xb68] sm:$0xf]  ;;  %v10649_v50 = vld [vmem:[#allocation4 + $0xb34] sm:$0xf0] }
 0x295   :  { %v8275_v55 = vor.u32 %v10498_v24, %v8272_v13  ;;  %v10661_v24 = vld [vmem:[#allocation4 + $0xb94] sm:$0xf0]  ;;  %v7702_v13 = vld [vmem:[#allocation4 + $0x208] sm:$0xf] }
 0x296   :  { %5525 = vmatpush.bf16.msra.mxu2 %v9615_v16  ;;  %5593 = vmatpush.bf16.msra.mxu3 %v9091_v25  ;;  %v8323_v16 = vor.u32 %v10510_v62, %v8320_v63  ;;  %v9374_v25 = vld [vmem:[#allocation4 + $0xf20] sm:$0xf]  ;;  %v8950_v62 = vld [vmem:[#allocation4 + $0xbc8] sm:$0xf]  ;;  %v8423_v63 = vor.u32 %v10541_v52, %v8422_v48 }
 0x297   :  { %v9375_v33 = vor.u32 %v10780_v7, %v9374_v25  ;;  %v8326_v25 = vld [vmem:[#allocation4 + $0x6e8] sm:$0xf]  ;;  %v8800_v7 = vld [vmem:[#allocation4 + $0xad0] sm:$0xf0] }
 0x298   :  { %5564 = vmatpush.bf16.msrb.mxu1 %v8467_v22  ;;  %5603 = vmatpush.bf16.msra.mxu0 %v9619_v36  ;;  %v9423_v22 = vor.u32 %v10792_v8, %v9422_v4  ;;  %v5313_v31 = vpop.f32.mrf.mxu1  ;;  %v10786_v36 = vld [vmem:[#allocation4 + $0xf84] sm:$0xf]  ;;  %v10373_v4 = vld [vmem:[#allocation4 + $0x294] sm:$0xf0]  ;;  %v8374_v8 = vld [vmem:[#allocation4 + $0x748] sm:$0xf] }
 0x299   :  { %v5274_v54 = vpop.f32.mrf.mxu2  ;;  %v8375_v30 = vor.u32 %v10529_v0, %v8374_v8  ;;  %v10630_v31 = vld [vmem:[#allocation4 + $0xaa4] sm:$0xf]  ;;  %v7654_v34 = vld [vmem:[#allocation4 + $0x1a8] sm:$0xf] }
 0x29a   :  { %5526 = vmatpush.bf16.msra.mxu2 %v9567_v46  ;;  %5594 = vmatpush.bf16.msra.mxu3 %v9043_v39  ;;  %v8470_v46 = vld [vmem:[#allocation4 + $0x808] sm:$0xf]  ;;  %v10486_v39 = vld [vmem:[#allocation4 + $0x624] sm:$0xf] }
 0x29b   :  { %v8471_v17 = vor.u32 %v10553_v9, %v8470_v46  ;;  %v8227_v56 = vor.u32 %v10486_v39, %v8224_v27  ;;  %v8903_v46 = vor.u32 %v10661_v24, %v8902_v20  ;;  %v8278_v39 = vld [vmem:[#allocation4 + $0x688] sm:$0xf]  ;;  %v10505_v27 = vld [vmem:[#allocation4 + $0x6b4] sm:$0xf0]  ;;  %v10594_v24 = vld [vmem:[#allocation4 + $0x984] sm:$0xf] }
 0x29c   :  { %5565 = vmatpush.bf16.msrb.mxu1 %v8419_v37  ;;  %5604 = vmatpush.bf16.msra.mxu0 %v9571_v35  ;;  %v11413_v37 = vadd.f32 %v11395_v5, %v5286_v29  ;;  %v5352_v45 = vpop.f32.mrf.mxu0  ;;  %v9427_v5 = vor.u32 %v10786_v36, %v9424_v38  ;;  %v10654_v35 = vld [vmem:[#allocation4 + $0xb64] sm:$0xf]  ;;  %v10517_v29 = vld [vmem:[#allocation4 + $0x714] sm:$0xf0]  ;;  %v8803_v38 = vor.u32 %v10630_v31, %v8800_v7  ;;  %v8806_v54 = vld [vmem:[#allocation4 + $0xaa8] sm:$0xf] }
 0x29d   :  { %v10349_v36 = vld [vmem:[#allocation4 + $0x1d4] sm:$0xf0]  ;;  %v8758_v0 = vld [vmem:[#allocation4 + $0xa48] sm:$0xf]  ;;  %v7752_v31 = vld [vmem:[#allocation4 + $0x298] sm:$0xf0] }
 0x29e   :  { %5527 = vmatpush.bf16.msra.mxu2 %v9519_v44  ;;  %5595 = vmatpush.bf16.msra.mxu3 %v8995_v18  ;;  %v10385_v44 = vld [vmem:[#allocation4 + $0x2f4] sm:$0xf0]  ;;  %v10774_v18 = vld [vmem:[#allocation4 + $0xf24] sm:$0xf]  ;;  %v7655_v52 = vor.u32 %v10349_v36, %v7654_v34  ;;  %v7510_v36 = vld [vmem:[#allocation4 + $0x88] sm:$0xf] }
 0x29f   :  { %v7799_v40 = vor.u32 %v10385_v44, %v7798_v43  ;;  %v9379_v10 = vor.u32 %v10774_v18, %v9376_v60  ;;  %v8752_v43 = vld [vmem:[#allocation4 + $0xa70] sm:$0xf0]  ;;  %v10984_v44 = vld [vmem:[#allocation9 + $0x6] sm:$0xff]  ;;  %v10493_v60 = vld [vmem:[#allocation4 + $0x654] sm:$0xf0] }
 0x2a0   :  { %5566 = vmatpush.bf16.msrb.mxu1 %v8371_v58  ;;  %5605 = vmatpush.bf16.msra.mxu0 %v9523_v42  ;;  %v8896_v58 = vld [vmem:[#allocation4 + $0xb90] sm:$0xf0]  ;;  %v1936_v45 = vperm.slane %v10984_v44, 6  ;;  %v8230_v18 = vld [vmem:[#allocation4 + $0x628] sm:$0xf] }
 0x2a1   :  { %5596 = vmatmul.bf16.vlgmr.msra.gmra.mxu3 %v11251_v41  ;;  %v8899_v51 = vor.u32 %v10654_v35, %v8896_v58  ;;  %v8848_v42 = vld [vmem:[#allocation4 + $0xb30] sm:$0xf0]  ;;  %v7606_v35 = vld [vmem:[#allocation4 + $0x148] sm:$0xf]  ;;  %v10337_v58 = vld [vmem:[#allocation4 + $0x174] sm:$0xf0] }
 0x2a2   :  { %5528 = vmatpush.bf16.msra.mxu2 %v9471_v1  ;;  %5640 = vmatpush.bf16.msrb.mxu3 %v8567_v6  ;;  %v10673_v1 = vld [vmem:[#allocation4 + $0xbf4] sm:$0xf0]  ;;  %v7750_v6 = vld [vmem:[#allocation4 + $0x268] sm:$0xf]  ;;  %v7607_v8 = vor.u32 %v10337_v58, %v7606_v35 }
 0x2a3   :  { %v7751_v12 = vor.u32 %v10373_v4, %v7750_v6  ;;  %v10379_v6 = vld [vmem:[#allocation4 + $0x2cc] sm:$0xf]  ;;  %v7800_v4 = vld [vmem:[#allocation4 + $0x2f8] sm:$0xf0]  ;;  %v10613_v34 = vld [vmem:[#allocation4 + $0xa14] sm:$0xf0] }
 0x2a4   :  { %5567 = vmatpush.bf16.msrb.mxu1 %v8323_v16  ;;  %5606 = vmatpush.bf16.msra.mxu0 %v9475_v47  ;;  %v8951_v16 = vor.u32 %v10673_v1, %v8950_v62  ;;  %v8854_v47 = vld [vmem:[#allocation4 + $0xb08] sm:$0xf]  ;;  %v10606_v62 = vld [vmem:[#allocation4 + $0x9e4] sm:$0xf]  ;;  %v8704_v1 = vld [vmem:[#allocation4 + $0xa10] sm:$0xf0] }
 0x2a5   :  { %v8855_v48 = vor.u32 %v10649_v50, %v8854_v47  ;;  %v8707_v20 = vor.u32 %v10606_v62, %v8704_v1  ;;  %v7462_v35 = vld [vmem:[#allocation4 + $0x28] sm:$0xf]  ;;  %v10301_v58 = vld [vmem:[#allocation4 + $0x54] sm:$0xf0] }
 0x2a6   :  { %5529 = vmatpush.bf16.msra.mxu2 %v9423_v22  ;;  %5641 = vmatpush.bf16.msrb.mxu3 %v8519_v26  ;;  %v10361_v22 = vld [vmem:[#allocation4 + $0x234] sm:$0xf0]  ;;  %v8851_v26 = vor.u32 %v10642_v59, %v8848_v42  ;;  %v7558_v42 = vld [vmem:[#allocation4 + $0xe8] sm:$0xf] }
 0x2a7   :  { %v7703_v9 = vor.u32 %v10361_v22, %v7702_v13  ;;  %v10625_v59 = vld [vmem:[#allocation4 + $0xa74] sm:$0xf0]  ;;  %v5312_v13 = vadd.f32 %v11406_v23, %v1936_v45  ;;  %v7704_v45 = vld [vmem:[#allocation4 + $0x238] sm:$0xf0] }
 0x2a8   :  { %5568 = vmatpush.bf16.msrb.mxu1 %v8275_v55  ;;  %5607 = vmatpush.bf16.msra.mxu0 %v9427_v5  ;;  %v8327_v55 = vor.u32 %v10517_v29, %v8326_v25  ;;  %v8279_v5 = vor.u32 %v10505_v27, %v8278_v39  ;;  %v8656_v25 = vld [vmem:[#allocation4 + $0x9b0] sm:$0xf0]  ;;  %v10367_v29 = vld [vmem:[#allocation4 + $0x26c] sm:$0xf]  ;;  %v10582_v27 = vld [vmem:[#allocation4 + $0x924] sm:$0xf] }
 0x2a9   :  { %v8659_v23 = vor.u32 %v10594_v24, %v8656_v25  ;;  %v7755_v39 = vor.u32 %v10367_v29, %v7752_v31  ;;  %v10769_v62 = vld [vmem:[#allocation4 + $0xef4] sm:$0xf0]  ;;  %v10331_v25 = vld [vmem:[#allocation4 + $0x14c] sm:$0xf]  ;;  %v7608_v29 = vld [vmem:[#allocation4 + $0x178] sm:$0xf0] }
 0x2aa   :  { %5530 = vmatpush.bf16.msra.mxu2 %v9375_v33  ;;  %5642 = vmatpush.bf16.msrb.mxu3 %v8471_v17  ;;  %v5389_v33 = vpop.f32.mrf.mxu3  ;;  %v10618_v17 = vld [vmem:[#allocation4 + $0xa44] sm:$0xf] }
 0x2ac   :  { %5569 = vmatpush.bf16.msrb.mxu1 %v8227_v56  ;;  %5608 = vmatpush.bf16.msra.mxu0 %v9379_v10  ;;  %v10637_v56 = vld [vmem:[#allocation4 + $0xad4] sm:$0xf0]  ;;  %v8231_v10 = vor.u32 %v10493_v60, %v8230_v18  ;;  %v9334_v60 = vld [vmem:[#allocation4 + $0xec8] sm:$0xf] }
 0x2ad   :  { %5531 = vmatmul.bf16.vlgmr.msra.gmra.mxu2 %v11262_v2 }
 0x2ae   :  { %5575 = vmatpush.bf16.msrb.mxu2 %v8947_v49  ;;  %5643 = vmatpush.bf16.msrb.mxu3 %v8423_v63  ;;  %v1937_v49 = vperm.slane %v10984_v44, 7  ;;  %v11419_v63 = vpop.f32.mrf.mxu1  ;;  %v10355_v44 = vld [vmem:[#allocation4 + $0x20c] sm:$0xf] }
 0x2af   :  { %5570 = vmatmul.bf16.vlgmr.msrb.gmra.mxu1 %v11240_v32  ;;  %5609 = vmatmul.bf16.vlgmr.msra.gmra.mxu0 %v11262_v2  ;;  %v7707_v18 = vor.u32 %v10355_v44, %v7704_v45 }
 0x2b0   :  { %5614 = vmatpush.bf16.msra.mxu1 %v7799_v40  ;;  %5653 = vmatpush.bf16.msrb.mxu0 %v8951_v16  ;;  %v8755_v40 = vor.u32 %v10618_v17, %v8752_v43  ;;  %v10325_v16 = vld [vmem:[#allocation4 + $0x114] sm:$0xf0]  ;;  %v8608_v43 = vld [vmem:[#allocation4 + $0x950] sm:$0xf0] }
 0x2b1   :  { %v7559_v47 = vor.u32 %v10325_v16, %v7558_v42  ;;  %v8134_v42 = vld [vmem:[#allocation4 + $0x568] sm:$0xf]  ;;  %v9335_v16 = vor.u32 %v10769_v62, %v9334_v60 }
 0x2b2   :  { %5576 = vmatpush.bf16.msrb.mxu2 %v8899_v51  ;;  %5644 = vmatpush.bf16.msrb.mxu3 %v8375_v30  ;;  %v8807_v51 = vor.u32 %v10637_v56, %v8806_v54  ;;  %v7803_v30 = vor.u32 %v10379_v6, %v7800_v4  ;;  %v5391_v22 = vpop.f32.mrf.mxu3  ;;  %v10481_v54 = vld [vmem:[#allocation4 + $0x5f4] sm:$0xf0]  ;;  %v10343_v4 = vld [vmem:[#allocation4 + $0x1ac] sm:$0xf] }
 0x2b3   :  { %v10601_v56 = vld [vmem:[#allocation4 + $0x9b4] sm:$0xf0]  ;;  %v9286_v22 = vld [vmem:[#allocation4 + $0xe68] sm:$0xf] }
 0x2b4   :  { %5615 = vmatpush.bf16.msra.mxu1 %v7751_v12  ;;  %5654 = vmatpush.bf16.msrb.mxu0 %v8903_v46  ;;  %v5390_v12 = vadd.f32 %v5389_v33, %v1937_v49  ;;  %v5324_v46 = vpop.f32.mrf.mxu2 }
 0x2b5   :  { %v5325_v50 = vadd.f32 %v5324_v46, %v5312_v13  ;;  %v8184_v13 = vld [vmem:[#allocation4 + $0x5f8] sm:$0xf0]  ;;  %v8086_v46 = vld [vmem:[#allocation4 + $0x508] sm:$0xf] }
 0x2b6   :  { %5577 = vmatpush.bf16.msrb.mxu2 %v8851_v26  ;;  %5645 = vmatpush.bf16.msrb.mxu3 %v8327_v55  ;;  %v5402_v26 = vpop.f32.mrf.mxu0  ;;  %v8710_v55 = vld [vmem:[#allocation4 + $0x9e8] sm:$0xf]  ;;  %v5365_v17 = vpop.f32.mrf.mxu1 }
 0x2b7   :  { %v11422_v7 = vadd.f32 %v5402_v26, %v5390_v12  ;;  %v5338_v33 = vadd.f32 %v11404_v15, %v5325_v50  ;;  %v8711_v49 = vor.u32 %v10613_v34, %v8710_v55  ;;  %v8611_v15 = vor.u32 %v10582_v27, %v8608_v43  ;;  %v8614_v12 = vld [vmem:[#allocation4 + $0x928] sm:$0xf]  ;;  %v10757_v26 = vld [vmem:[#allocation4 + $0xe94] sm:$0xf0]  ;;  %v10463_v50 = vld [vmem:[#allocation4 + $0x56c] sm:$0xf] }
 0x2b8   :  { %5616 = vmatpush.bf16.msra.mxu1 %v7703_v9  ;;  %5655 = vmatpush.bf16.msrb.mxu0 %v8855_v48  ;;  %v8759_v9 = vor.u32 %v10625_v59, %v8758_v0  ;;  %v7463_v59 = vor.u32 %v10301_v58, %v7462_v35  ;;  %v9287_v55 = vor.u32 %v10757_v26, %v9286_v22  ;;  %v10319_v27 = vld [vmem:[#allocation4 + $0xec] sm:$0xf]  ;;  %v8038_v17 = vld [vmem:[#allocation4 + $0x4a8] sm:$0xf]  ;;  %v10445_v43 = vld [vmem:[#allocation4 + $0x4d4] sm:$0xf0] }
 0x2b9   :  { %v7611_v34 = vor.u32 %v10331_v25, %v7608_v29  ;;  %v10307_v35 = vld [vmem:[#allocation4 + $0x8c] sm:$0xf]  ;;  %v7512_v58 = vld [vmem:[#allocation4 + $0xb8] sm:$0xf0]  ;;  %v9094_v29 = vld [vmem:[#allocation4 + $0xce8] sm:$0xf] }
 0x2ba   :  { %5578 = vmatpush.bf16.msrb.mxu2 %v8803_v38  ;;  %5646 = vmatpush.bf16.msrb.mxu3 %v8279_v5  ;;  %v10313_v38 = vld [vmem:[#allocation4 + $0xb4] sm:$0xf0]  ;;  %v8662_v5 = vld [vmem:[#allocation4 + $0x988] sm:$0xf]  ;;  %v10427_v26 = vld [vmem:[#allocation4 + $0x44c] sm:$0xf] }
 0x2bb   :  { %v7511_v48 = vor.u32 %v10313_v38, %v7510_v36  ;;  %v8136_v36 = vld [vmem:[#allocation4 + $0x598] sm:$0xf0]  ;;  %v9238_v38 = vld [vmem:[#allocation4 + $0xe08] sm:$0xf] }
 0x2bc   :  { %5617 = vmatpush.bf16.msra.mxu1 %v7655_v52  ;;  %5656 = vmatpush.bf16.msrb.mxu0 %v8807_v51  ;;  %v8182_v52 = vld [vmem:[#allocation4 + $0x5c8] sm:$0xf]  ;;  %v7656_v51 = vld [vmem:[#allocation4 + $0x1d8] sm:$0xf0]  ;;  %v5326_v0 = vpop.f32.mrf.mxu2  ;;  %v8139_v44 = vor.u32 %v10463_v50, %v8136_v36 }
 0x2bd   :  { %v8183_v6 = vor.u32 %v10481_v54, %v8182_v52  ;;  %v7659_v24 = vor.u32 %v10343_v4, %v7656_v51  ;;  %v8088_v52 = vld [vmem:[#allocation4 + $0x538] sm:$0xf0]  ;;  %v9190_v54 = vld [vmem:[#allocation4 + $0xda8] sm:$0xf]  ;;  %v10721_v0 = vld [vmem:[#allocation4 + $0xd74] sm:$0xf0] }
 0x2be   :  { %5579 = vmatpush.bf16.msrb.mxu2 %v8755_v40  ;;  %5647 = vmatpush.bf16.msrb.mxu3 %v8231_v10  ;;  %v5351_v40 = vadd.f32 %v11408_v3, %v5338_v33  ;;  %v5404_v1 = vpop.f32.mrf.mxu0  ;;  %v8663_v10 = vor.u32 %v10601_v56, %v8662_v5  ;;  %v10469_v3 = vld [vmem:[#allocation4 + $0x594] sm:$0xf0]  ;;  %v7560_v33 = vld [vmem:[#allocation4 + $0x118] sm:$0xf0]  ;;  %v8039_v56 = vor.u32 %v10445_v43, %v8038_v17  ;;  %v9142_v51 = vld [vmem:[#allocation4 + $0xd48] sm:$0xf] }
 0x2bf   :  { %v10733_v5 = vld [vmem:[#allocation4 + $0xdd4] sm:$0xf0]  ;;  %v10439_v1 = vld [vmem:[#allocation4 + $0x4ac] sm:$0xf]  ;;  %v8040_v4 = vld [vmem:[#allocation4 + $0x4d8] sm:$0xf0]  ;;  %v9143_v22 = vor.u32 %v10721_v0, %v9142_v51 }
 0x2c0   :  { %5618 = vmatpush.bf16.msra.mxu1 %v7607_v8  ;;  %5657 = vmatpush.bf16.msrb.mxu0 %v8759_v9  ;;  %v11428_v8 = vadd.f32 %v11419_v63, %v5351_v40  ;;  %v8135_v63 = vor.u32 %v10469_v3, %v8134_v42  ;;  %v10457_v9 = vld [vmem:[#allocation4 + $0x534] sm:$0xf0]  ;;  %v9191_v62 = vor.u32 %v10733_v5, %v9190_v54  ;;  %v7464_v42 = vld [vmem:[#allocation4 + $0x58] sm:$0xf0]  ;;  %v7942_v3 = vld [vmem:[#allocation4 + $0x3e8] sm:$0xf] }
 0x2c1   :  { %5648 = vmatmul.bf16.vlgmr.msrb.gmra.mxu3 %v11240_v32  ;;  %v7992_v25 = vld [vmem:[#allocation4 + $0x478] sm:$0xf0]  ;;  %v9046_v43 = vld [vmem:[#allocation4 + $0xc88] sm:$0xf]  ;;  %v10397_v54 = vld [vmem:[#allocation4 + $0x354] sm:$0xf0] }
 0x2c2   :  { %5580 = vmatpush.bf16.msrb.mxu2 %v8707_v20  ;;  %5692 = vmatpush.bf16.msra.mxu3 %v7803_v30  ;;  %v10589_v20 = vld [vmem:[#allocation4 + $0x954] sm:$0xf0]  ;;  %v10475_v30 = vld [vmem:[#allocation4 + $0x5cc] sm:$0xf]  ;;  %v9288_v36 = vld [vmem:[#allocation4 + $0xe98] sm:$0xf0] }
 0x2c3   :  { %v8615_v31 = vor.u32 %v10589_v20, %v8614_v12  ;;  %v10421_v12 = vld [vmem:[#allocation4 + $0x414] sm:$0xf0]  ;;  %v10763_v20 = vld [vmem:[#allocation4 + $0xecc] sm:$0xf]  ;;  %v7944_v17 = vld [vmem:[#allocation4 + $0x418] sm:$0xf0] }
 0x2c4   :  { %5619 = vmatpush.bf16.msra.mxu1 %v7559_v47  ;;  %5658 = vmatpush.bf16.msrb.mxu0 %v8711_v49  ;;  %v8187_v47 = vor.u32 %v10475_v30, %v8184_v13  ;;  %v10451_v49 = vld [vmem:[#allocation4 + $0x50c] sm:$0xf]  ;;  %v11433_v40 = vpop.f32.mrf.mxu3  ;;  %v9336_v30 = vld [vmem:[#allocation4 + $0xef8] sm:$0xf0]  ;;  %v8043_v13 = vor.u32 %v10439_v1, %v8040_v4  ;;  %v10685_v1 = vld [vmem:[#allocation4 + $0xc54] sm:$0xf0] }
 0x2c5   :  { %v8091_v60 = vor.u32 %v10451_v49, %v8088_v52  ;;  %v10739_v5 = vld [vmem:[#allocation4 + $0xe0c] sm:$0xf]  ;;  %v8568_v0 = vld [vmem:[#allocation4 + $0x8f8] sm:$0xf0] }
 0x2c6   :  { %5581 = vmatpush.bf16.msrb.mxu2 %v8659_v23  ;;  %5693 = vmatpush.bf16.msra.mxu3 %v7755_v39  ;;  %v10745_v23 = vld [vmem:[#allocation4 + $0xe34] sm:$0xf0]  ;;  %v8087_v39 = vor.u32 %v10457_v9, %v8086_v46  ;;  %v7943_v46 = vor.u32 %v10421_v12, %v7942_v3  ;;  %v9339_v9 = vor.u32 %v10763_v20, %v9336_v30  ;;  %v10571_v51 = vld [vmem:[#allocation4 + $0x8cc] sm:$0xf]  ;;  %v9192_v3 = vld [vmem:[#allocation4 + $0xdd8] sm:$0xf0] }
 0x2c7   :  { %v9239_v45 = vor.u32 %v10745_v23, %v9238_v38  ;;  %v7995_v23 = vor.u32 %v10427_v26, %v7992_v25  ;;  %v9670_v30 = vld [vmem:[#allocation4 + $0x1168] sm:$0xf]  ;;  %v7848_v26 = vld [vmem:[#allocation4 + $0x358] sm:$0xf0] }
 0x2c8   :  { %5620 = vmatpush.bf16.msra.mxu1 %v7511_v48  ;;  %5659 = vmatpush.bf16.msrb.mxu0 %v8663_v10  ;;  %v7563_v48 = vor.u32 %v10319_v27, %v7560_v33  ;;  %v10415_v27 = vld [vmem:[#allocation4 + $0x3ec] sm:$0xf] }
 0x2ca   :  { %5582 = vmatpush.bf16.msrb.mxu2 %v8611_v15  ;;  %5694 = vmatpush.bf16.msra.mxu3 %v7707_v18  ;;  %v7990_v15 = vld [vmem:[#allocation4 + $0x448] sm:$0xf]  ;;  %v10433_v18 = vld [vmem:[#allocation4 + $0x474] sm:$0xf0] }
 0x2cb   :  { %v7991_v10 = vor.u32 %v10433_v18, %v7990_v15  ;;  %v9718_v15 = vld [vmem:[#allocation4 + $0x11c8] sm:$0xf]  ;;  %v10403_v18 = vld [vmem:[#allocation4 + $0x38c] sm:$0xf] }
 0x2cc   :  { %5621 = vmatpush.bf16.msra.mxu1 %v7463_v59  ;;  %5660 = vmatpush.bf16.msrb.mxu0 %v8615_v31  ;;  %v10295_v59 = vld [vmem:[#allocation4 + $0x2c] sm:$0xf]  ;;  %v10709_v31 = vld [vmem:[#allocation4 + $0xd14] sm:$0xf0]  ;;  %v11438_v50 = vpop.f32.mrf.mxu0 }
 0x2cd   :  { %5583 = vmatmul.bf16.vlgmr.msrb.gmra.mxu2 %v11243_v19 }
 0x2ce   :  { %5627 = vmatpush.bf16.msra.mxu2 %v8183_v6  ;;  %5695 = vmatpush.bf16.msra.mxu3 %v7659_v24  ;;  %v7515_v6 = vor.u32 %v10307_v35, %v7512_v58  ;;  %v7947_v35 = vor.u32 %v10415_v27, %v7944_v17  ;;  %v9672_v17 = vld [vmem:[#allocation4 + $0x1198] sm:$0xf0] }
 0x2cf   :  { %5622 = vmatmul.bf16.vlgmr.msra.gmra.mxu1 %v11228_v14  ;;  %5661 = vmatmul.bf16.vlgmr.msrb.gmra.mxu0 %v11243_v19 }
 0x2d0   :  { %5666 = vmatpush.bf16.msrb.mxu1 %v9335_v16  ;;  %5705 = vmatpush.bf16.msra.mxu0 %v8187_v47  ;;  %v5415_v16 = vpop.f32.mrf.mxu1  ;;  %v7894_v47 = vld [vmem:[#allocation4 + $0x388] sm:$0xf]  ;;  %v5376_v38 = vpop.f32.mrf.mxu2 }
 0x2d1   :  { %v11436_v24 = vadd.f32 %v5415_v16, %v11422_v7  ;;  %v10751_v7 = vld [vmem:[#allocation4 + $0xe6c] sm:$0xf]  ;;  %v11441_v33 = vadd.f32 %v5376_v38, %v11428_v8  ;;  %v10865_v8 = vld [vmem:[#allocation4 + $0x11f4] sm:$0xf0] }
 0x2d2   :  { %5628 = vmatpush.bf16.msra.mxu2 %v8135_v63  ;;  %5696 = vmatpush.bf16.msra.mxu3 %v7611_v34  ;;  %v7467_v63 = vor.u32 %v10295_v59, %v7464_v42  ;;  %v10409_v34 = vld [vmem:[#allocation4 + $0x3b4] sm:$0xf0]  ;;  %v9291_v49 = vor.u32 %v10751_v7, %v9288_v36  ;;  %v9719_v59 = vor.u32 %v10865_v8, %v9718_v15  ;;  %v10727_v42 = vld [vmem:[#allocation4 + $0xdac] sm:$0xf]  ;;  %v9622_v7 = vld [vmem:[#allocation4 + $0x1108] sm:$0xf] }
 0x2d3   :  { %v9195_v25 = vor.u32 %v10727_v42, %v9192_v3  ;;  %v10841_v36 = vld [vmem:[#allocation4 + $0x1134] sm:$0xf0]  ;;  %v9624_v15 = vld [vmem:[#allocation4 + $0x1138] sm:$0xf0]  ;;  %v10535_v8 = vld [vmem:[#allocation4 + $0x7ac] sm:$0xf] }
 0x2d4   :  { %5667 = vmatpush.bf16.msrb.mxu1 %v9287_v55  ;;  %5706 = vmatpush.bf16.msra.mxu0 %v8139_v44  ;;  %v5443_v55 = vpop.f32.mrf.mxu3  ;;  %v10697_v44 = vld [vmem:[#allocation4 + $0xcb4] sm:$0xf0]  ;;  %v9576_v3 = vld [vmem:[#allocation4 + $0x10d8] sm:$0xf0] }
 0x2d5   :  { %v9047_v58 = vor.u32 %v10697_v44, %v9046_v43  ;;  %v9144_v55 = vld [vmem:[#allocation4 + $0xd78] sm:$0xf0]  ;;  %v10547_v43 = vld [vmem:[#allocation4 + $0x80c] sm:$0xf] }
 0x2d6   :  { %5629 = vmatpush.bf16.msra.mxu2 %v8087_v39  ;;  %5697 = vmatpush.bf16.msra.mxu3 %v7563_v48  ;;  %v9095_v39 = vor.u32 %v10709_v31, %v9094_v29  ;;  %v7846_v48 = vld [vmem:[#allocation4 + $0x328] sm:$0xf]  ;;  %v9720_v29 = vld [vmem:[#allocation4 + $0x11f8] sm:$0xf0]  ;;  %v10559_v31 = vld [vmem:[#allocation4 + $0x86c] sm:$0xf] }
 0x2d7   :  { %v8472_v44 = vld [vmem:[#allocation4 + $0x838] sm:$0xf0] }
 0x2d8   :  { %5668 = vmatpush.bf16.msrb.mxu1 %v9239_v45  ;;  %5707 = vmatpush.bf16.msra.mxu0 %v8091_v60  ;;  %v7895_v45 = vor.u32 %v10409_v34, %v7894_v47  ;;  %v5417_v52 = vpop.f32.mrf.mxu1  ;;  %v7896_v60 = vld [vmem:[#allocation4 + $0x3b8] sm:$0xf0]  ;;  %v5378_v16 = vpop.f32.mrf.mxu2  ;;  %v10715_v47 = vld [vmem:[#allocation4 + $0xd4c] sm:$0xf] }
 0x2d9   :  { %v7899_v12 = vor.u32 %v10403_v18, %v7896_v60  ;;  %v9147_v27 = vor.u32 %v10715_v47, %v9144_v55  ;;  %v9574_v52 = vld [vmem:[#allocation4 + $0x10a8] sm:$0xf]  ;;  %v8424_v18 = vld [vmem:[#allocation4 + $0x7d8] sm:$0xf0]  ;;  %v10523_v16 = vld [vmem:[#allocation4 + $0x74c] sm:$0xf] }
 0x2da   :  { %5630 = vmatpush.bf16.msra.mxu2 %v8039_v56  ;;  %5698 = vmatpush.bf16.msra.mxu3 %v7515_v6  ;;  %v9240_v56 = vld [vmem:[#allocation4 + $0xe38] sm:$0xf0]  ;;  %v7847_v6 = vor.u32 %v10397_v54, %v7846_v48  ;;  %v10829_v54 = vld [vmem:[#allocation4 + $0x10d4] sm:$0xf0] }
 0x2db   :  { %v9243_v4 = vor.u32 %v10739_v5, %v9240_v56  ;;  %v9096_v48 = vld [vmem:[#allocation4 + $0xd18] sm:$0xf0]  ;;  %v8475_v56 = vor.u32 %v10547_v43, %v8472_v44  ;;  %v9575_v60 = vor.u32 %v10829_v54, %v9574_v52  ;;  %v10888_v52 = vld [vmem:[#allocation6 + $0xb0] sm:$0xff] }
 0x2dc   :  { %5669 = vmatpush.bf16.msrb.mxu1 %v9191_v62  ;;  %5708 = vmatpush.bf16.msra.mxu0 %v8043_v13  ;;  %v8998_v62 = vld [vmem:[#allocation4 + $0xc28] sm:$0xf]  ;;  %v8571_v13 = vor.u32 %v10571_v51, %v8568_v0  ;;  %v10817_v51 = vld [vmem:[#allocation4 + $0x1074] sm:$0xf0]  ;;  %v9480_v44 = vld [vmem:[#allocation4 + $0x1018] sm:$0xf0] }
 0x2dd   :  { %v8999_v20 = vor.u32 %v10685_v1, %v8998_v62  ;;  %v10691_v62 = vld [vmem:[#allocation4 + $0xc8c] sm:$0xf]  ;;  %v9048_v1 = vld [vmem:[#allocation4 + $0xcb8] sm:$0xf0] }
 0x2de   :  { %5631 = vmatpush.bf16.msra.mxu2 %v7991_v10  ;;  %5699 = vmatpush.bf16.msra.mxu3 %v7467_v63  ;;  %v5456_v10 = vpop.f32.mrf.mxu0  ;;  %v10859_v63 = vld [vmem:[#allocation4 + $0x11cc] sm:$0xf]  ;;  %v9051_v42 = vor.u32 %v10691_v62, %v9048_v1  ;;  %v10889_v55 = vld [vmem:[#allocation6 + $0xb8] sm:$0xff] }
 0x2df   :  { %v9723_v38 = vor.u32 %v10859_v63, %v9720_v29  ;;  %v8427_v10 = vor.u32 %v10535_v8, %v8424_v18  ;;  %v10667_v8 = vld [vmem:[#allocation4 + $0xbcc] sm:$0xf]  ;;  %v8952_v18 = vld [vmem:[#allocation4 + $0xbf8] sm:$0xf0] }
 0x2e0   :  { %5670 = vmatpush.bf16.msrb.mxu1 %v9143_v22  ;;  %5709 = vmatpush.bf16.msra.mxu0 %v7995_v23  ;;  %v10391_v22 = vld [vmem:[#allocation4 + $0x32c] sm:$0xf]  ;;  %v9432_v62 = vld [vmem:[#allocation4 + $0xfb8] sm:$0xf0] }
 0x2e1   :  { %5700 = vmatmul.bf16.vlgmr.msra.gmra.mxu3 %v11228_v14  ;;  %v10853_v14 = vld [vmem:[#allocation4 + $0x1194] sm:$0xf0]  ;;  %v7851_v34 = vor.u32 %v10391_v22, %v7848_v26  ;;  %v10487_v1 = vld [vmem:[#allocation4 + $0x62c] sm:$0xf] }
 0x2e2   :  { %5632 = vmatpush.bf16.msra.mxu2 %v7943_v46  ;;  %5744 = vmatpush.bf16.msrb.mxu3 %v9339_v9  ;;  %v8520_v46 = vld [vmem:[#allocation4 + $0x898] sm:$0xf0]  ;;  %v9671_v9 = vor.u32 %v10853_v14, %v9670_v30  ;;  %v10805_v22 = vld [vmem:[#allocation4 + $0x1014] sm:$0xf0] }
 0x2e3   :  { %v8523_v23 = vor.u32 %v10559_v31, %v8520_v46  ;;  %v9000_v30 = vld [vmem:[#allocation4 + $0xc58] sm:$0xf0]  ;;  %v10511_v46 = vld [vmem:[#allocation4 + $0x6ec] sm:$0xf] }
 0x2e4   :  { %5671 = vmatpush.bf16.msrb.mxu1 %v9095_v39  ;;  %5710 = vmatpush.bf16.msra.mxu0 %v7947_v35  ;;  %v10847_v39 = vld [vmem:[#allocation4 + $0x116c] sm:$0xf]  ;;  %v9528_v31 = vld [vmem:[#allocation4 + $0x1078] sm:$0xf0] }
 0x2e5   :  { %v9675_v5 = vor.u32 %v10847_v39, %v9672_v17  ;;  %v10835_v35 = vld [vmem:[#allocation4 + $0x110c] sm:$0xf] }
 0x2e6   :  { %5633 = vmatpush.bf16.msra.mxu2 %v7895_v45  ;;  %5745 = vmatpush.bf16.msrb.mxu3 %v9291_v49  ;;  %v9623_v45 = vor.u32 %v10841_v36, %v9622_v7  ;;  %v10703_v49 = vld [vmem:[#allocation4 + $0xcec] sm:$0xf]  ;;  %v9627_v0 = vor.u32 %v10835_v35, %v9624_v15  ;;  %v9430_v36 = vld [vmem:[#allocation4 + $0xf88] sm:$0xf]  ;;  %v10781_v35 = vld [vmem:[#allocation4 + $0xf54] sm:$0xf0] }
 0x2e7   :  { %v10799_v17 = vld [vmem:[#allocation4 + $0xfec] sm:$0xf] }
 0x2e8   :  { %5672 = vmatpush.bf16.msrb.mxu1 %v9047_v58  ;;  %5711 = vmatpush.bf16.msra.mxu0 %v7899_v12  ;;  %v9099_v58 = vor.u32 %v10703_v49, %v9096_v48  ;;  %v8376_v12 = vld [vmem:[#allocation4 + $0x778] sm:$0xf0] }
 0x2e9   :  { %v8379_v63 = vor.u32 %v10523_v16, %v8376_v12  ;;  %v8280_v49 = vld [vmem:[#allocation4 + $0x6b8] sm:$0xf0]  ;;  %v10655_v16 = vld [vmem:[#allocation4 + $0xb6c] sm:$0xf] }
 0x2ea   :  { %5634 = vmatpush.bf16.msra.mxu2 %v7847_v6  ;;  %5746 = vmatpush.bf16.msrb.mxu3 %v9243_v4  ;;  %v11447_v6 = vpop.f32.mrf.mxu3  ;;  %v9526_v4 = vld [vmem:[#allocation4 + $0x1048] sm:$0xf]  ;;  %v8904_v12 = vld [vmem:[#allocation4 + $0xb98] sm:$0xf0] }
 0x2ec   :  { %5673 = vmatpush.bf16.msrb.mxu1 %v8999_v20  ;;  %5712 = vmatpush.bf16.msra.mxu0 %v7851_v34  ;;  %v10679_v20 = vld [vmem:[#allocation4 + $0xc2c] sm:$0xf]  ;;  %v11449_v14 = vpop.f32.mrf.mxu1  ;;  %v11451_v7 = vpop.f32.mrf.mxu0 }
 0x2ed   :  { %5635 = vmatmul.bf16.vlgmr.msra.gmra.mxu2 %v11232_v21  ;;  %v9003_v29 = vor.u32 %v10679_v20, %v9000_v30  ;;  %v9384_v20 = vld [vmem:[#allocation4 + $0xf58] sm:$0xf0]  ;;  %v8907_v30 = vor.u32 %v10655_v16, %v8904_v12  ;;  %v10583_v12 = vld [vmem:[#allocation4 + $0x92c] sm:$0xf] }
 0x2ee   :  { %5679 = vmatpush.bf16.msrb.mxu2 %v9719_v59  ;;  %5747 = vmatpush.bf16.msrb.mxu3 %v9195_v25  ;;  %v10823_v59 = vld [vmem:[#allocation4 + $0x10ac] sm:$0xf] }
 0x2ef   :  { %5674 = vmatmul.bf16.vlgmr.msrb.gmra.mxu1 %v11251_v41  ;;  %5713 = vmatmul.bf16.vlgmr.msra.gmra.mxu0 %v11232_v21  ;;  %v9527_v21 = vor.u32 %v10817_v51, %v9526_v4  ;;  %v9579_v26 = vor.u32 %v10823_v59, %v9576_v3  ;;  %v10811_v25 = vld [vmem:[#allocation4 + $0x104c] sm:$0xf]  ;;  %v8232_v4 = vld [vmem:[#allocation4 + $0x658] sm:$0xf0] }
 0x2f0   :  { %5718 = vmatpush.bf16.msra.mxu1 %v8571_v13  ;;  %5757 = vmatpush.bf16.msrb.mxu0 %v9723_v38  ;;  %v9478_v13 = vld [vmem:[#allocation4 + $0xfe8] sm:$0xf]  ;;  %v10793_v38 = vld [vmem:[#allocation4 + $0xfb4] sm:$0xf0]  ;;  %v9531_v39 = vor.u32 %v10811_v25, %v9528_v31  ;;  %v8235_v3 = vor.u32 %v10487_v1, %v8232_v4  ;;  %v10872_v25 = vld [vmem:[#allocation6 + $0x30] sm:$0xff] }
 0x2f1   :  { %v9479_v47 = vor.u32 %v10805_v22, %v9478_v13  ;;  %v9431_v48 = vor.u32 %v10793_v38, %v9430_v36  ;;  %v10887_v51 = vld [vmem:[#allocation6 + $0xa8] sm:$0xff]  ;;  %v8664_v4 = vld [vmem:[#allocation4 + $0x9b8] sm:$0xf0] }
 0x2f2   :  { %5680 = vmatpush.bf16.msrb.mxu2 %v9671_v9  ;;  %5748 = vmatpush.bf16.msrb.mxu3 %v9147_v27  ;;  %v8328_v9 = vld [vmem:[#allocation4 + $0x718] sm:$0xf0]  ;;  %v5495_v34 = vpop.f32.mrf.mxu3  ;;  %v10643_v22 = vld [vmem:[#allocation4 + $0xb0c] sm:$0xf] }
 0x2f3   :  { %v8331_v27 = vor.u32 %v10511_v46, %v8328_v9  ;;  %v10631_v46 = vld [vmem:[#allocation4 + $0xaac] sm:$0xf]  ;;  %v8808_v9 = vld [vmem:[#allocation4 + $0xad8] sm:$0xf0]  ;;  %v10884_v34 = vld [vmem:[#allocation6 + $0x90] sm:$0xff] }
 0x2f4   :  { %5719 = vmatpush.bf16.msra.mxu1 %v8523_v23  ;;  %5758 = vmatpush.bf16.msrb.mxu0 %v9675_v5  ;;  %v5428_v23 = vpop.f32.mrf.mxu2  ;;  %v5469_v5 = vpop.f32.mrf.mxu1  ;;  %v8811_v36 = vor.u32 %v10631_v46, %v8808_v9  ;;  %v10595_v1 = vld [vmem:[#allocation4 + $0x98c] sm:$0xf]  ;;  %v10905_v46 = vld [vmem:[#allocation6 + $0x138] sm:$0xff]  ;;  %v10918_v9 = vld [vmem:[#allocation6 + $0x1a0] sm:$0xff] }
 0x2f5   :  { %v5429_v43 = vadd.f32 %v5428_v23, %v11436_v24  ;;  %v10787_v24 = vld [vmem:[#allocation4 + $0xf8c] sm:$0xf]  ;;  %v10869_v5 = vld [vmem:[#allocation6 + $0x18] sm:$0xff] }
 0x2f6   :  { %5681 = vmatpush.bf16.msrb.mxu2 %v9623_v45  ;;  %5749 = vmatpush.bf16.msrb.mxu3 %v9099_v58  ;;  %v10499_v45 = vld [vmem:[#allocation4 + $0x68c] sm:$0xf]  ;;  %v9483_v58 = vor.u32 %v10799_v17, %v9480_v44  ;;  %v10870_v17 = vld [vmem:[#allocation6 + $0x20] sm:$0xff] }
 0x2f7   :  { %v5442_v54 = vadd.f32 %v11433_v40, %v5429_v43  ;;  %v8283_v15 = vor.u32 %v10499_v45, %v8280_v49  ;;  %v10619_v23 = vld [vmem:[#allocation4 + $0xa4c] sm:$0xf] }
 0x2f8   :  { %5720 = vmatpush.bf16.msra.mxu1 %v8475_v56  ;;  %5759 = vmatpush.bf16.msrb.mxu0 %v9627_v0  ;;  %v9382_v56 = vld [vmem:[#allocation4 + $0xf28] sm:$0xf]  ;;  %v5508_v0 = vpop.f32.mrf.mxu0 }
 0x2f9   :  { %v9383_v40 = vor.u32 %v10781_v35, %v9382_v56  ;;  %v10883_v43 = vld [vmem:[#allocation6 + $0x88] sm:$0xff]  ;;  %v10882_v56 = vld [vmem:[#allocation6 + $0x80] sm:$0xff]  ;;  %v10893_v0 = vld [vmem:[#allocation6 + $0xd8] sm:$0xff] }
 0x2fa   :  { %5682 = vmatpush.bf16.msrb.mxu2 %v9575_v60  ;;  %5750 = vmatpush.bf16.msrb.mxu3 %v9051_v42  ;;  %v11456_v60 = vadd.f32 %v11438_v50, %v5442_v54  ;;  %v9435_v42 = vor.u32 %v10787_v24, %v9432_v62  ;;  %v10873_v50 = vld [vmem:[#allocation6 + $0x38] sm:$0xff]  ;;  %v10894_v54 = vld [vmem:[#allocation6 + $0xe0] sm:$0xff] }
 0x2fc   :  { %5721 = vmatpush.bf16.msra.mxu1 %v8427_v10  ;;  %5760 = vmatpush.bf16.msrb.mxu0 %v9579_v26  ;;  %v8955_v10 = vor.u32 %v10667_v8, %v8952_v18  ;;  %v5430_v59 = vpop.f32.mrf.mxu2  ;;  %v8856_v26 = vld [vmem:[#allocation4 + $0xb38] sm:$0xf0]  ;;  %v5772_v8 = vmax.f32 %v11353_v57, 0.0 }
 0x2fd   :  { %v8859_v31 = vor.u32 %v10643_v22, %v8856_v26  ;;  %v10881_v26 = vld [vmem:[#allocation6 + $0x78] sm:$0xff] }
 0x2fe   :  { %5683 = vmatpush.bf16.msrb.mxu2 %v9527_v21  ;;  %5751 = vmatpush.bf16.msrb.mxu3 %v9003_v29  ;;  %v10775_v21 = vld [vmem:[#allocation4 + $0xf2c] sm:$0xf]  ;;  %v10885_v29 = vld [vmem:[#allocation6 + $0x98] sm:$0xff]  ;;  %v5784_v57 = vpack.c.bf16 %v5772_v8, %v5772_v8 }
 0x2ff   :  { %v9387_v13 = vor.u32 %v10775_v21, %v9384_v20  ;;  %v10892_v21 = vld [vmem:[#allocation6 + $0xd0] sm:$0xff]  ;;  %v10867_v20 = vld [vmem:[#allocation6 + $0x8] sm:$0xff] }
 0x300   :  { %5722 = vmatpush.bf16.msra.mxu1 %v8379_v63  ;;  %5761 = vmatpush.bf16.msrb.mxu0 %v9531_v39  ;;  %v10897_v63 = vld [vmem:[#allocation6 + $0xf8] sm:$0xff] }
 0x301   :  { %5752 = vmatmul.bf16.vlgmr.msrb.gmra.mxu3 %v11251_v41  ;;  %v10886_v41 = vld [vmem:[#allocation6 + $0xa0] sm:$0xff]  ;;  %v8760_v39 = vld [vmem:[#allocation4 + $0xa78] sm:$0xf0] }
 0x302   :  { %5684 = vmatpush.bf16.msrb.mxu2 %v9479_v47  ;;  %6592 = vmatpush.bf16.msra.mxu3 %v10889_v55  ;;  %v10896_v47 = vld [vmem:[#allocation6 + $0xf0] sm:$0xff]  ;;  %v10871_v55 = vld [vmem:[#allocation6 + $0x28] sm:$0xff]  ;;  %v8763_v45 = vor.u32 %v10619_v23, %v8760_v39  ;;  %v10917_v23 = vld [vmem:[#allocation6 + $0x198] sm:$0xff] }
 0x304   :  { %5723 = vmatpush.bf16.msra.mxu1 %v8331_v27  ;;  %5762 = vmatpush.bf16.msrb.mxu0 %v9483_v58  ;;  %v5545_v38 = vpop.f32.mrf.mxu3  ;;  %v11462_v27 = vld [vmem:[#allocation9 + $0xe] sm:$0xf] }
 0x305   :  { %v1939_v44 = vperm.slane %v11462_v27, 1  ;;  %v1938_v49 = vperm.slane %v11462_v27, 0 }
 0x306   :  { %5685 = vmatpush.bf16.msrb.mxu2 %v9431_v48  ;;  %6593 = vmatpush.bf16.msra.mxu3 %v10888_v52  ;;  %v10607_v48 = vld [vmem:[#allocation4 + $0x9ec] sm:$0xf]  ;;  %v8712_v52 = vld [vmem:[#allocation4 + $0xa18] sm:$0xf0] }
 0x307   :  { %v5546_v35 = vadd.f32 %v5545_v38, %v1939_v44  ;;  %v8715_v58 = vor.u32 %v10607_v48, %v8712_v52  ;;  %v5468_v18 = vadd.f32 %v11449_v14, %v1938_v49  ;;  %v10904_v38 = vld [vmem:[#allocation6 + $0x130] sm:$0xff]  ;;  %v10927_v44 = vld [vmem:[#allocation6 + $0x1e8] sm:$0xff]  ;;  %v10926_v52 = vld [vmem:[#allocation6 + $0x1e0] sm:$0xff] }
 0x308   :  { %5724 = vmatpush.bf16.msra.mxu1 %v8283_v15  ;;  %5763 = vmatpush.bf16.msrb.mxu0 %v9435_v42  ;;  %v10921_v15 = vld [vmem:[#allocation6 + $0x1b8] sm:$0xff]  ;;  %v8667_v42 = vor.u32 %v10595_v1, %v8664_v4  ;;  %v10915_v49 = vld [vmem:[#allocation6 + $0x188] sm:$0xff] }
 0x30a   :  { %5686 = vmatpush.bf16.msrb.mxu2 %v9383_v40  ;;  %6594 = vmatpush.bf16.msra.mxu3 %v10887_v51 }
 0x30c   :  { %5725 = vmatpush.bf16.msra.mxu1 %v8235_v3  ;;  %5764 = vmatpush.bf16.msrb.mxu0 %v9387_v13  ;;  %v5547_v24 = vpop.f32.mrf.mxu3  ;;  %v5558_v62 = vpop.f32.mrf.mxu0  ;;  %v10920_v3 = vld [vmem:[#allocation6 + $0x1b0] sm:$0xff]  ;;  %v10919_v13 = vld [vmem:[#allocation6 + $0x1a8] sm:$0xff] }
 0x30d   :  { %5687 = vmatmul.bf16.vlgmr.msrb.gmra.mxu2 %v11262_v2  ;;  %v11468_v40 = vadd.f32 %v5558_v62, %v5546_v35  ;;  %v5776_v35 = vmax.f32 %v11441_v33, 0.0  ;;  %v10900_v24 = vld [vmem:[#allocation6 + $0x110] sm:$0xff]  ;;  %v10875_v62 = vld [vmem:[#allocation6 + $0x48] sm:$0xff]  ;;  %v10874_v33 = vld [vmem:[#allocation6 + $0x40] sm:$0xff] }
 0x30e   :  { %5731 = vmatpush.bf16.msra.mxu2 %v8955_v10  ;;  %6595 = vmatpush.bf16.msra.mxu3 %v10886_v41  ;;  %v10868_v10 = vld [vmem:[#allocation6 + $0x10] sm:$0xff] }
 0x30f   :  { %5726 = vmatmul.bf16.vlgmr.msra.gmra.mxu1 %v11240_v32  ;;  %5765 = vmatmul.bf16.vlgmr.msrb.gmra.mxu0 %v11262_v2  ;;  %v10895_v32 = vld [vmem:[#allocation6 + $0xe8] sm:$0xff]  ;;  %v5519_v2 = vpop.f32.mrf.mxu1  ;;  %v5788_v1 = vpack.c.bf16 %v5776_v35, %v5776_v35  ;;  %v10949_v35 = vld [vmem:[#allocation6 + $0x298] sm:$0xff] }
 0x310   :  { %6566 = vmatpush.bf16.msrb.mxu1 %v10873_v50  ;;  %6605 = vmatpush.bf16.msra.mxu0 %v10897_v63  ;;  %v5480_v51 = vpop.f32.mrf.mxu2  ;;  %v8616_v50 = vld [vmem:[#allocation4 + $0x958] sm:$0xf0] }
 0x311   :  { %v5481_v59 = vadd.f32 %v5480_v51, %v5468_v18  ;;  %v10925_v18 = vld [vmem:[#allocation6 + $0x1d8] sm:$0xff]  ;;  %v10924_v51 = vld [vmem:[#allocation6 + $0x1d0] sm:$0xff] }
 0x312   :  { %5732 = vmatpush.bf16.msra.mxu2 %v8907_v30  ;;  %6596 = vmatpush.bf16.msra.mxu3 %v10885_v29  ;;  %v8619_v30 = vor.u32 %v10583_v12, %v8616_v50  ;;  %v10866_v29 = vld [vmem:[#allocation6] sm:$0xff]  ;;  %v10937_v12 = vld [vmem:[#allocation6 + $0x238] sm:$0xff] }
 0x313   :  { %v5494_v14 = vadd.f32 %v11447_v6, %v5481_v59  ;;  %v10891_v6 = vld [vmem:[#allocation6 + $0xc8] sm:$0xff] }
 0x314   :  { %6567 = vmatpush.bf16.msrb.mxu1 %v10872_v25  ;;  %6606 = vmatpush.bf16.msra.mxu0 %v10896_v47  ;;  %v5560_v22 = vpop.f32.mrf.mxu0  ;;  %v10890_v47 = vld [vmem:[#allocation6 + $0xc0] sm:$0xff] }
 0x315   :  { %v5507_v41 = vadd.f32 %v11451_v7, %v5494_v14  ;;  %v10880_v7 = vld [vmem:[#allocation6 + $0x70] sm:$0xff]  ;;  %v10898_v14 = vld [vmem:[#allocation6 + $0x100] sm:$0xff] }
 0x316   :  { %5733 = vmatpush.bf16.msra.mxu2 %v8859_v31  ;;  %6597 = vmatpush.bf16.msra.mxu3 %v10884_v34  ;;  %v5770_v31 = vmax.f32 %v11314_v28, 0.0  ;;  %v5773_v34 = vmax.f32 %v11368_v61, 0.0  ;;  %v10879_v28 = vld [vmem:[#allocation6 + $0x68] sm:$0xff]  ;;  %v10878_v61 = vld [vmem:[#allocation6 + $0x60] sm:$0xff] }
 0x317   :  { %v5521_v16 = vpop.f32.mrf.mxu1  ;;  %v11472_v63 = vadd.f32 %v5519_v2, %v5507_v41  ;;  %v10877_v2 = vld [vmem:[#allocation6 + $0x58] sm:$0xff] }
 0x318   :  { %6568 = vmatpush.bf16.msrb.mxu1 %v10871_v55  ;;  %6607 = vmatpush.bf16.msra.mxu0 %v10895_v32  ;;  %v5482_v25 = vpop.f32.mrf.mxu2  ;;  %v5782_v55 = vpack.c.bf16 %v5770_v31, %v5770_v31  ;;  %v5785_v39 = vpack.c.bf16 %v5773_v34, %v5773_v34  ;;  %v10928_v32 = vld [vmem:[#allocation6 + $0x1f0] sm:$0xff]  ;;  %v5774_v16 = vmax.f32 %v11398_v11, 0.0  ;;  %v10935_v11 = vld [vmem:[#allocation6 + $0x228] sm:$0xff]  ;;  %v10933_v31 = vld [vmem:[#allocation6 + $0x218] sm:$0xff] }
 0x319   :  { %v10932_v34 = vld [vmem:[#allocation6 + $0x210] sm:$0xff] }
 0x31a   :  { %5734 = vmatpush.bf16.msra.mxu2 %v8811_v36  ;;  %6598 = vmatpush.bf16.msra.mxu3 %v10883_v43  ;;  %v10929_v36 = vld [vmem:[#allocation6 + $0x1f8] sm:$0xff]  ;;  %v10916_v43 = vld [vmem:[#allocation6 + $0x190] sm:$0xff]  ;;  %v5786_v41 = vpack.c.bf16 %v5774_v16, %v5774_v16 }
 0x31c   :  { %6569 = vmatpush.bf16.msrb.mxu1 %v10870_v17  ;;  %6608 = vmatpush.bf16.msra.mxu0 %v10894_v54  ;;  %v10903_v17 = vld [vmem:[#allocation6 + $0x128] sm:$0xff]  ;;  %v10901_v54 = vld [vmem:[#allocation6 + $0x118] sm:$0xff] }
 0x31e   :  { %5735 = vmatpush.bf16.msra.mxu2 %v8763_v45  ;;  %6599 = vmatpush.bf16.msra.mxu3 %v10882_v56  ;;  %v10902_v45 = vld [vmem:[#allocation6 + $0x120] sm:$0xff]  ;;  %v10876_v56 = vld [vmem:[#allocation6 + $0x50] sm:$0xff] }
 0x320   :  { %6570 = vmatpush.bf16.msrb.mxu1 %v10869_v5  ;;  %6609 = vmatpush.bf16.msra.mxu0 %v10893_v0  ;;  %v10914_v5 = vld [vmem:[#allocation6 + $0x180] sm:$0xff]  ;;  %v10899_v0 = vld [vmem:[#allocation6 + $0x108] sm:$0xff] }
 0x321   :  { %6600 = vmatmul.bf16.vlgmr.msra.gmra.mxu3 %v5784_v57  ;;  %v10923_v57 = vld [vmem:[#allocation6 + $0x1c8] sm:$0xff] }
 0x322   :  { %5736 = vmatpush.bf16.msra.mxu2 %v8715_v58  ;;  %6644 = vmatpush.bf16.msrb.mxu3 %v10921_v15 }
 0x324   :  { %6571 = vmatpush.bf16.msrb.mxu1 %v10868_v10  ;;  %6610 = vmatpush.bf16.msra.mxu0 %v10892_v21  ;;  %v5771_v10 = vmax.f32 %v11324_v53, 0.0  ;;  %v10912_v21 = vld [vmem:[#allocation6 + $0x170] sm:$0xff]  ;;  %v5777_v53 = vmax.f32 %v11456_v60, 0.0 }
 0x326   :  { %5737 = vmatpush.bf16.msra.mxu2 %v8667_v42  ;;  %6645 = vmatpush.bf16.msrb.mxu3 %v10920_v3  ;;  %v10913_v42 = vld [vmem:[#allocation6 + $0x178] sm:$0xff]  ;;  %v5783_v50 = vpack.c.bf16 %v5771_v10, %v5771_v10  ;;  %v5789_v22 = vpack.c.bf16 %v5777_v53, %v5777_v53  ;;  %v10939_v10 = vld [vmem:[#allocation6 + $0x248] sm:$0xff] }
 0x328   :  { %6572 = vmatpush.bf16.msrb.mxu1 %v10867_v20  ;;  %6611 = vmatpush.bf16.msra.mxu0 %v10891_v6  ;;  %v10922_v20 = vld [vmem:[#allocation6 + $0x1c0] sm:$0xff] }
 0x329   :  { %v10934_v6 = vld [vmem:[#allocation6 + $0x220] sm:$0xff] }
 0x32a   :  { %5738 = vmatpush.bf16.msra.mxu2 %v8619_v30  ;;  %6646 = vmatpush.bf16.msrb.mxu3 %v10919_v13  ;;  %v10936_v30 = vld [vmem:[#allocation6 + $0x230] sm:$0xff]  ;;  %v10911_v13 = vld [vmem:[#allocation6 + $0x168] sm:$0xff] }
 0x32c   :  { %6573 = vmatpush.bf16.msrb.mxu1 %v10866_v29  ;;  %6612 = vmatpush.bf16.msra.mxu0 %v10890_v47  ;;  %v11479_v48 = vpop.f32.mrf.mxu1  ;;  %v11482_v15 = vpop.f32.mrf.mxu0  ;;  %v10909_v29 = vld [vmem:[#allocation6 + $0x158] sm:$0xff] }
 0x32d   :  { %5739 = vmatmul.bf16.vlgmr.msra.gmra.mxu2 %v11243_v19  ;;  %v11477_v19 = vpop.f32.mrf.mxu3 }
 0x32e   :  { %6579 = vmatpush.bf16.msrb.mxu2 %v10881_v26  ;;  %6647 = vmatpush.bf16.msrb.mxu3 %v10918_v9  ;;  %v10910_v26 = vld [vmem:[#allocation6 + $0x160] sm:$0xff]  ;;  %v5572_v9 = vadd.f32 %v11479_v48, %v11468_v40 }
 0x32f   :  { %6574 = vmatmul.bf16.vlgmr.msrb.gmra.mxu1 %v5782_v55  ;;  %6613 = vmatmul.bf16.vlgmr.msra.gmra.mxu0 %v5785_v39 }
 0x330   :  { %6618 = vmatpush.bf16.msra.mxu1 %v10905_v46  ;;  %6657 = vmatpush.bf16.msrb.mxu0 %v10929_v36  ;;  %v11484_v8 = vpop.f32.mrf.mxu2  ;;  %v10908_v46 = vld [vmem:[#allocation6 + $0x150] sm:$0xff]  ;;  %v10953_v36 = vld [vmem:[#allocation6 + $0x2b8] sm:$0xff] }
 0x331   :  { %v5533_v40 = vadd.f32 %v11484_v8, %v11472_v63  ;;  %v10944_v63 = vld [vmem:[#allocation6 + $0x270] sm:$0xff] }
 0x332   :  { %6580 = vmatpush.bf16.msrb.mxu2 %v10880_v7  ;;  %6648 = vmatpush.bf16.msrb.mxu3 %v10917_v23  ;;  %v10907_v23 = vld [vmem:[#allocation6 + $0x148] sm:$0xff]  ;;  %v10948_v8 = vld [vmem:[#allocation6 + $0x290] sm:$0xff] }
 0x334   :  { %6619 = vmatpush.bf16.msra.mxu1 %v10904_v38  ;;  %6658 = vmatpush.bf16.msrb.mxu0 %v10928_v32  ;;  %v5573_v4 = vpop.f32.mrf.mxu1  ;;  %v5612_v59 = vpop.f32.mrf.mxu0  ;;  %v10931_v32 = vld [vmem:[#allocation6 + $0x208] sm:$0xff] }
 0x335   :  { %v5599_v58 = vpop.f32.mrf.mxu3 }
 0x336   :  { %6581 = vmatpush.bf16.msrb.mxu2 %v10879_v28  ;;  %6649 = vmatpush.bf16.msrb.mxu3 %v10916_v43  ;;  %v10942_v58 = vld [vmem:[#allocation6 + $0x260] sm:$0xff] }
 0x338   :  { %6620 = vmatpush.bf16.msra.mxu1 %v10903_v17  ;;  %6659 = vmatpush.bf16.msrb.mxu0 %v10927_v44  ;;  %v5534_v3 = vpop.f32.mrf.mxu2  ;;  %v10952_v17 = vld [vmem:[#allocation6 + $0x2b0] sm:$0xff]  ;;  %v5775_v44 = vmax.f32 %v11413_v37, 0.0  ;;  %v10943_v37 = vld [vmem:[#allocation6 + $0x268] sm:$0xff] }
 0x339   :  { %v10938_v3 = vld [vmem:[#allocation6 + $0x240] sm:$0xff] }
 0x33a   :  { %6582 = vmatpush.bf16.msrb.mxu2 %v10878_v61  ;;  %6650 = vmatpush.bf16.msrb.mxu3 %v10915_v49  ;;  %v10906_v61 = vld [vmem:[#allocation6 + $0x140] sm:$0xff]  ;;  %v10945_v49 = vld [vmem:[#allocation6 + $0x278] sm:$0xff] }
 0x33c   :  { %6621 = vmatpush.bf16.msra.mxu1 %v10902_v45  ;;  %6660 = vmatpush.bf16.msrb.mxu0 %v10926_v52  ;;  %v5778_v52 = vmax.f32 %v5533_v40, 0.0 }
 0x33e   :  { %6583 = vmatpush.bf16.msrb.mxu2 %v10877_v2  ;;  %6651 = vmatpush.bf16.msrb.mxu3 %v10914_v5  ;;  %v10951_v2 = vld [vmem:[#allocation6 + $0x2a8] sm:$0xff]  ;;  %v5787_v5 = vpack.c.bf16 %v5775_v44, %v5775_v44 }
 0x340   :  { %6622 = vmatpush.bf16.msra.mxu1 %v10901_v54  ;;  %6661 = vmatpush.bf16.msrb.mxu0 %v10925_v18  ;;  %v10950_v54 = vld [vmem:[#allocation6 + $0x2a0] sm:$0xff]  ;;  %v10941_v18 = vld [vmem:[#allocation6 + $0x258] sm:$0xff] }
 0x341   :  { %6652 = vmatmul.bf16.vlgmr.msrb.gmra.mxu3 %v5788_v1  ;;  %v10940_v1 = vld [vmem:[#allocation6 + $0x250] sm:$0xff] }
 0x342   :  { %6584 = vmatpush.bf16.msrb.mxu2 %v10876_v56  ;;  %6696 = vmatpush.bf16.msra.mxu3 %v10953_v36  ;;  %v5790_v56 = vpack.c.bf16 %v5778_v52, %v5778_v52 }
 0x344   :  { %6623 = vmatpush.bf16.msra.mxu1 %v10900_v24  ;;  %6662 = vmatpush.bf16.msrb.mxu0 %v10924_v51  ;;  %v11489_v25 = vpop.f32.mrf.mxu3 }
 0x346   :  { %6585 = vmatpush.bf16.msrb.mxu2 %v10875_v62  ;;  %6697 = vmatpush.bf16.msra.mxu3 %v10952_v17  ;;  %v10947_v62 = vld [vmem:[#allocation6 + $0x288] sm:$0xff] }
 0x348   :  { %6624 = vmatpush.bf16.msra.mxu1 %v10899_v0  ;;  %6663 = vmatpush.bf16.msrb.mxu0 %v10923_v57  ;;  %v10946_v0 = vld [vmem:[#allocation6 + $0x280] sm:$0xff]  ;;  %v10960_v57 = vld [vmem:[#allocation6 + $0x2f0] sm:$0xff] }
 0x34a   :  { %6586 = vmatpush.bf16.msrb.mxu2 %v10874_v33  ;;  %6698 = vmatpush.bf16.msra.mxu3 %v10951_v2 }
 0x34c   :  { %6625 = vmatpush.bf16.msra.mxu1 %v10898_v14  ;;  %6664 = vmatpush.bf16.msrb.mxu0 %v10922_v20  ;;  %v11491_v60 = vpop.f32.mrf.mxu1  ;;  %v5651_v7 = vpop.f32.mrf.mxu3 }
 0x34d   :  { %6587 = vmatmul.bf16.vlgmr.msrb.gmra.mxu2 %v5783_v50  ;;  %v11495_v47 = vpop.f32.mrf.mxu0  ;;  %v1940_v50 = vperm.slane %v11462_v27, 2  ;;  %v10955_v7 = vld [vmem:[#allocation6 + $0x2c8] sm:$0xff] }
 0x34e   :  { %6631 = vmatpush.bf16.msra.mxu2 %v10913_v42  ;;  %6699 = vmatpush.bf16.msra.mxu3 %v10950_v54  ;;  %v10961_v42 = vld [vmem:[#allocation6 + $0x2f8] sm:$0xff] }
 0x34f   :  { %6626 = vmatmul.bf16.vlgmr.msra.gmra.mxu1 %v5786_v41  ;;  %6665 = vmatmul.bf16.vlgmr.msrb.gmra.mxu0 %v5789_v22  ;;  %v5624_v41 = vadd.f32 %v11491_v60, %v1940_v50  ;;  %v10968_v50 = vld [vmem:[#allocation7 + $0x30] sm:$0xff] }
 0x350   :  { %6670 = vmatpush.bf16.msrb.mxu1 %v10937_v12  ;;  %v5584_v55 = vpop.f32.mrf.mxu2  ;;  %6709 = vmatpush.bf16.msra.mxu0 %v10961_v42 }
 0x351   :  { %v5585_v38 = vadd.f32 %v5584_v55, %v5572_v9 }
 0x352   :  { %6632 = vmatpush.bf16.msra.mxu2 %v10912_v21  ;;  %6700 = vmatpush.bf16.msra.mxu3 %v10949_v35  ;;  %v10959_v21 = vld [vmem:[#allocation6 + $0x2e8] sm:$0xff] }
 0x353   :  { %v5598_v28 = vadd.f32 %v11477_v19, %v5585_v38  ;;  %v10930_v19 = vld [vmem:[#allocation6 + $0x200] sm:$0xff] }
 0x354   :  { %6671 = vmatpush.bf16.msrb.mxu1 %v10936_v30  ;;  %v5625_v39 = vpop.f32.mrf.mxu1  ;;  %6710 = vmatpush.bf16.msra.mxu0 %v10960_v57  ;;  %v10958_v30 = vld [vmem:[#allocation6 + $0x2e0] sm:$0xff] }
 0x355   :  { %v5611_v43 = vadd.f32 %v11482_v15, %v5598_v28  ;;  %v5664_v45 = vpop.f32.mrf.mxu0  ;;  %v10954_v38 = vld [vmem:[#allocation6 + $0x2c0] sm:$0xff]  ;;  %v1941_v39 = vperm.slane %v11462_v27, 3 }
 0x356   :  { %6633 = vmatpush.bf16.msra.mxu2 %v10911_v13  ;;  %6701 = vmatpush.bf16.msra.mxu3 %v10948_v8 }
 0x357   :  { %v5779_v14 = vmax.f32 %v5611_v43, 0.0 }
 0x358   :  { %6672 = vmatpush.bf16.msrb.mxu1 %v10935_v11  ;;  %v5586_v48 = vpop.f32.mrf.mxu2  ;;  %6711 = vmatpush.bf16.msra.mxu0 %v10959_v21  ;;  %v10957_v11 = vld [vmem:[#allocation6 + $0x2d8] sm:$0xff]  ;;  %v10967_v21 = vld [vmem:[#allocation7 + $0x28] sm:$0xff] }
 0x359   :  { %v5791_v20 = vpack.c.bf16 %v5779_v14, %v5779_v14 }
 0x35a   :  { %6634 = vmatpush.bf16.msra.mxu2 %v10910_v26  ;;  %6702 = vmatpush.bf16.msra.mxu3 %v10947_v62 }
 0x35c   :  { %6673 = vmatpush.bf16.msrb.mxu1 %v10934_v6  ;;  %6712 = vmatpush.bf16.msra.mxu0 %v10958_v30 }
 0x35e   :  { %6635 = vmatpush.bf16.msra.mxu2 %v10909_v29  ;;  %6703 = vmatpush.bf16.msra.mxu3 %v10946_v0  ;;  %v10956_v29 = vld [vmem:[#allocation6 + $0x2d0] sm:$0xff] }
 0x360   :  { %6674 = vmatpush.bf16.msrb.mxu1 %v10933_v31  ;;  %6713 = vmatpush.bf16.msra.mxu0 %v10957_v11  ;;  %v10962_v11 = vld [vmem:[#allocation7] sm:$0xff] }
 0x362   :  { %6636 = vmatpush.bf16.msra.mxu2 %v10908_v46 }
 0x364   :  { %6675 = vmatpush.bf16.msrb.mxu1 %v10932_v34  ;;  %v5701_v15 = vpop.f32.mrf.mxu3  ;;  %6714 = vmatpush.bf16.msra.mxu0 %v10956_v29 }
 0x366   :  { %6637 = vmatpush.bf16.msra.mxu2 %v10907_v23 }
 0x368   :  { %6676 = vmatpush.bf16.msrb.mxu1 %v10931_v32  ;;  %6715 = vmatpush.bf16.msra.mxu0 %v10955_v7  ;;  %v5702_v32 = vadd.f32 %v5701_v15, %v1941_v39 }
 0x36a   :  { %6638 = vmatpush.bf16.msra.mxu2 %v10906_v61 }
 0x36c   :  { %6677 = vmatpush.bf16.msrb.mxu1 %v10930_v19  ;;  %v5675_v24 = vpop.f32.mrf.mxu1  ;;  %v5703_v4 = vpop.f32.mrf.mxu3  ;;  %6716 = vmatpush.bf16.msra.mxu0 %v10954_v38 }
 0x36d   :  { %6639 = vmatmul.bf16.vlgmr.msra.gmra.mxu2 %v5787_v5  ;;  %v5714_v51 = vpop.f32.mrf.mxu0 }
 0x36e   :  { %6683 = vmatpush.bf16.msrb.mxu2 %v10945_v49  ;;  %v5715_v40 = vadd.f32 %v5714_v51, %v5702_v32 }
 0x36f   :  { %6678 = vmatmul.bf16.vlgmr.msrb.gmra.mxu1 %v5790_v56 }
 0x370   :  { %v5636_v33 = vpop.f32.mrf.mxu2 }
 0x371   :  { %v5637_v53 = vadd.f32 %v5636_v33, %v5624_v41  ;;  %v10966_v41 = vld [vmem:[#allocation7 + $0x20] sm:$0xff] }
 0x372   :  { %6684 = vmatpush.bf16.msrb.mxu2 %v10944_v63 }
 0x373   :  { %v5650_v13 = vadd.f32 %v11489_v25, %v5637_v53  ;;  %v10965_v53 = vld [vmem:[#allocation7 + $0x18] sm:$0xff] }
 0x374   :  { %v5677_v59 = vpop.f32.mrf.mxu1 }
 0x375   :  { %v5716_v16 = vpop.f32.mrf.mxu0  ;;  %v5663_v6 = vadd.f32 %v11495_v47, %v5650_v13  ;;  %v10964_v13 = vld [vmem:[#allocation7 + $0x10] sm:$0xff] }
 0x376   :  { %6685 = vmatpush.bf16.msrb.mxu2 %v10943_v37  ;;  %v10981_v37 = vld [vmem:[#allocation9 + $0x12] ss:$0 sm:$0xff] }
 0x377   :  { %v5676_v9 = vadd.f32 %v5675_v24, %v5663_v6 }
 0x378   :  { %v5638_v12 = vpop.f32.mrf.mxu2 }
 0x379   :  { %v10969_v12 = vld [vmem:[#allocation7 + $0x38] sm:$0xff] }
 0x37a   :  { %6686 = vmatpush.bf16.msrb.mxu2 %v10942_v58  ;;  %6792 = vmatpush.bf16.msra.mxu1 %v10969_v12 }
 0x37e   :  { %6687 = vmatpush.bf16.msrb.mxu2 %v10941_v18  ;;  %6793 = vmatpush.bf16.msra.mxu1 %v10968_v50 }
 0x382   :  { %6688 = vmatpush.bf16.msrb.mxu2 %v10940_v1  ;;  %6794 = vmatpush.bf16.msra.mxu1 %v10967_v21 }
 0x384   :  { %v5753_v22 = vpop.f32.mrf.mxu3 }
 0x386   :  { %6689 = vmatpush.bf16.msrb.mxu2 %v10939_v10  ;;  %6795 = vmatpush.bf16.msra.mxu1 %v10966_v41 }
 0x38a   :  { %6690 = vmatpush.bf16.msrb.mxu2 %v10938_v3  ;;  %6796 = vmatpush.bf16.msra.mxu1 %v10965_v53 }
 0x38c   :  { %v5727_v26 = vpop.f32.mrf.mxu1  ;;  %v5755_v31 = vpop.f32.mrf.mxu3 }
 0x38d   :  { %6691 = vmatmul.bf16.vlgmr.msrb.gmra.mxu2 %v5791_v20  ;;  %v5766_v46 = vpop.f32.mrf.mxu0  ;;  %v5728_v43 = vadd.f32 %v5727_v26, %v5715_v40 }
 0x38e   :  { %6797 = vmatpush.bf16.msra.mxu1 %v10964_v13 }
 0x390   :  { %v5688_v55 = vpop.f32.mrf.mxu2 }
 0x391   :  { %v5689_v60 = vadd.f32 %v5688_v55, %v5676_v9 }
 0x393   :  { %v5780_v34 = vmax.f32 %v5689_v60, 0.0 }
 0x394   :  { %v5729_v36 = vpop.f32.mrf.mxu1 }
 0x395   :  { %v5792_v23 = vpack.c.bf16 %v5780_v34, %v5780_v34  ;;  %v5768_v25 = vpop.f32.mrf.mxu0  ;;  %v10982_v34 = vld [vmem:[#allocation9 + $0x13] ss:$0 sm:$0xff] }
 0x397   :  { %6704 = vmatmul.bf16.vlgmr.msra.gmra.mxu3 %v5792_v23 }
 0x398   :  { %v5690_v28 = vpop.f32.mrf.mxu2 }
 0x3a4   :  { %v6601_v47 = vpop.f32.mrf.mxu3 }
 0x3ac   :  { %v6575_v17 = vpop.f32.mrf.mxu1  ;;  %v6603_v61 = vpop.f32.mrf.mxu3 }
 0x3ad   :  { %v6614_v44 = vpop.f32.mrf.mxu0  ;;  %v6576_v35 = vadd.f32 %v10981_v37, %v6575_v17 }
 0x3b0   :  { %v5740_v45 = vpop.f32.mrf.mxu2 }
 0x3b1   :  { %v5741_v49 = vadd.f32 %v5740_v45, %v5728_v43 }
 0x3b3   :  { %v5754_v2 = vadd.f32 %v5753_v22, %v5741_v49  ;;  %v10963_v22 = vld [vmem:[#allocation7 + $0x8] sm:$0xff] }
 0x3b4   :  { %v6577_v48 = vpop.f32.mrf.mxu1  ;;  %6798 = vmatpush.bf16.msra.mxu1 %v10963_v22 }
 0x3b5   :  { %v5767_v19 = vadd.f32 %v5766_v46, %v5754_v2  ;;  %v6616_v54 = vpop.f32.mrf.mxu0 }
 0x3b7   :  { %v5781_v52 = vmax.f32 %v5767_v19, 0.0 }
 0x3b8   :  { %v5742_v5 = vpop.f32.mrf.mxu2  ;;  %6799 = vmatpush.bf16.msra.mxu1 %v10962_v11 }
 0x3b9   :  { %v5793_v63 = vpack.c.bf16 %v5781_v52, %v5781_v52 }
 0x3bb   :  { %6717 = vmatmul.bf16.vlgmr.msra.gmra.mxu0 %v5793_v63 }
 0x3c4   :  { %v6653_v56 = vpop.f32.mrf.mxu3 }
 0x3cc   :  { %v6627_v27 = vpop.f32.mrf.mxu1  ;;  %v6655_v58 = vpop.f32.mrf.mxu3 }
 0x3cd   :  { %v6666_v15 = vpop.f32.mrf.mxu0 }
 0x3d0   :  { %v6588_v8 = vpop.f32.mrf.mxu2 }
 0x3d1   :  { %v6589_v18 = vadd.f32 %v6588_v8, %v6576_v35 }
 0x3d3   :  { %v6602_v24 = vadd.f32 %v6601_v47, %v6589_v18 }
 0x3d4   :  { %v6629_v62 = vpop.f32.mrf.mxu1 }
 0x3d5   :  { %v6615_v1 = vadd.f32 %v6614_v44, %v6602_v24  ;;  %v6668_v4 = vpop.f32.mrf.mxu0 }
 0x3d7   :  { %v6628_v51 = vadd.f32 %v6627_v27, %v6615_v1 }
 0x3d8   :  { %v6590_v0 = vpop.f32.mrf.mxu2 }
 0x3ec   :  { %v6679_v33 = vpop.f32.mrf.mxu1 }
 0x3f0   :  { %v6640_v10 = vpop.f32.mrf.mxu2 }
 0x3f1   :  { %v6641_v59 = vadd.f32 %v6640_v10, %v6628_v51 }
 0x3f3   :  { %v6654_v42 = vadd.f32 %v6653_v56, %v6641_v59 }
 0x3f4   :  { %v6681_v3 = vpop.f32.mrf.mxu1 }
 0x3f5   :  { %v6667_v57 = vadd.f32 %v6666_v15, %v6654_v42 }
 0x3f7   :  { %v6680_v14 = vadd.f32 %v6679_v33, %v6667_v57 }
 0x3f8   :  { %v6642_v16 = vpop.f32.mrf.mxu2 }
 0x410   :  { %v6692_v20 = vpop.f32.mrf.mxu2 }
 0x411   :  { %v6693_v29 = vadd.f32 %v6692_v20, %v6680_v14 }
 0x418   :  { %v6694_v30 = vpop.f32.mrf.mxu2 }
 0x41a   :  { %v6705_v26 = vpop.f32.mrf.mxu3 }
 0x41b   :  { %v6706_v31 = vadd.f32 %v6705_v26, %v6693_v29 }
 0x422   :  { %v6707_v6 = vpop.f32.mrf.mxu3 }
 0x438   :  { %v6718_v46 = vpop.f32.mrf.mxu0 }
 0x439   :  { %v6719_v9 = vadd.f32 %v6718_v46, %v6706_v31 }
 0x43b   :  { %v6722_v7 = vmax.f32 %v6719_v9, 0.0 }
 0x43d   :  { %v6723_v55 = vpack.c.bf16 %v6722_v7, %v6722_v7 }
 0x43f   :  { %6800 = vmatmul.bf16.vlgmr.msra.gmra.mxu1 %v6723_v55 }
 0x440   :  { %v6720_v60 = vpop.f32.mrf.mxu0 }
 0x4bc   :  { %v6801_v36 = vpop.f32.mrf.mxu1 }
 0x4bd   :  { %v6802_v38 = vadd.f32 %v10982_v34, %v6801_v36 }
 0x4bf   :  { %v6805_v23 = vmax.f32 %v6802_v38, 0.0 }
 0x4c1   :  { %6806 = vst [vmem:[%s11516_s6] sm:$0xff] %v6805_v23 }
 0x4c4   :  { %v6803_v25 = vpop.f32.mrf.mxu1 }
 0x4c5   :  { %6811 = vsyncpa [#allocation3], 1 }
 0x4c6   :  { %6812 = vsyncpa [#allocation5], 1 }
 0x4c7   :  { %6813 = vsyncpa [#allocation8], 1 }

</bundles_post_ra>
